<compile_context>
chip_gen: v6e
topology: v6e:2x2x1
jax: 0.10.0
libtpu: 0.0.40
codegen_flags: <defaults>
</compile_context>

<pallas_src>
import functools

import jax
import jax.numpy as jnp
from jax import lax
from jax.experimental import pallas as pl
from jax.experimental.pallas import tpu as pltpu

LANES = 128     # TPU vreg lane width
SUBLANES = 8    # TPU vreg sublane width


def _round_up(v, m):
    return ((v + m - 1) // m) * m


def _round_up_lanes(c):
    return max(LANES, _round_up(c, LANES))


# ----------------------------------------------------------------------------
# Pallas kernels
# ----------------------------------------------------------------------------
def _conv3d_slice_kernel(*refs, k, stride, Ho, Wo):
    """One output depth slice of a direct 3-D conv + fused BatchNorm stats.

    refs = (x_ref_0 .. x_ref_{k-1}, w_ref, y_ref, sum_ref, sq_ref)
      x_ref_kd: (1, 1, Hp, Wq, C)  padded input depth slice do*stride + kd
      w_ref   : (k*k, k*C, C)      weights, (kd,kh)-major, rows ordered (kw, c_in)
      y_ref   : (1, 1, Ho, Wo, C)  conv output slice (pre-BN)
      sum_ref : (1, 1, 1, C)       sum_{h,w} y over this slice
      sq_ref  : (1, 1, 1, C)       sum_{h,w} y*y over this slice
    """
    x_refs = refs[:k]
    w_ref = refs[k]
    y_ref, sum_ref, sq_ref = refs[k + 1:]
    C = y_ref.shape[-1]
    M = Ho * Wo

    # Small live accumulator (Ho*Wo x C f32); no bias init (bias cancels in BN).
    acc = jnp.zeros((M, C), jnp.float32)
    for kd in range(k):
        for kh in range(k):
            # H is a major (non-tiled) dim: this ref slice is cheap.
            if stride == 1:
                rows = x_refs[kd][0, 0, kh:kh + Ho]                # (Ho, Wq, C)
            else:
                rows = x_refs[kd][0, 0, pl.ds(kh, Ho, stride)]
            # W-axis im2col: the k width taps become one lane-dim concat so the
            # whole (kd, kh) slab is a single MXU matmul with K = k*C.
            if stride == 1:
                pieces = [rows[:, kw:kw + Wo, :] for kw in range(k)]
            else:
                pieces = [rows[:, kw:kw + (Wo - 1) * stride + 1:stride, :]
                          for kw in range(k)]
            lhs = jnp.concatenate(pieces, axis=-1).reshape(M, k * C)
            acc = acc + jnp.dot(lhs, w_ref[kd * k + kh],
                                preferred_element_type=jnp.float32)

    y_ref[...] = acc.reshape(1, 1, Ho, Wo, C).astype(y_ref.dtype)
    # Fused training-mode BatchNorm partial sums (no extra HBM pass over y).
    sum_ref[...] = jnp.sum(acc, axis=0).reshape(1, 1, 1, C)
    sq_ref[...] = jnp.sum(acc * acc, axis=0).reshape(1, 1, 1, C)


def _bn_relu_pad_kernel(y_ref, scale_ref, shift_ref, o_ref, *, pad):
    """Folded BatchNorm affine + ReLU; optionally writes into a zero-haloed
    buffer that is directly usable as the next conv's padded input."""
    _, Do, Ho, Wo, C = y_ref.shape
    y = y_ref[0].astype(jnp.float32)
    z = jnp.maximum(y * scale_ref[0] + shift_ref[0], 0.0).astype(o_ref.dtype)
    if pad == 0:
        o_ref[0] = z
    else:
        o_ref[...] = jnp.zeros_like(o_ref)                 # halo + W tail zeros
        o_ref[0, pad:pad + Do, pad:pad + Ho, pad:pad + Wo, :] = z


# ----------------------------------------------------------------------------
# pallas_call wrappers
# ----------------------------------------------------------------------------
def conv3d_bn_stats(xp, w2col, Do, Ho, Wo, *, k, stride):
    """xp: (N, Dp, Hp, Wq, C) halo + channel (+W-to-sublane) padded input.
       w2col: (k*k, k*C, C).  Returns (y, sum, sq), y: (N, Do, Ho, Wo, C)."""
    N, Dp, Hp, Wq, C = xp.shape
    kern = functools.partial(_conv3d_slice_kernel, k=k, stride=stride, Ho=Ho, Wo=Wo)

    # k overlapping depth-slice streams of the same input array (one per kd).
    in_specs = [
        pl.BlockSpec((1, 1, Hp, Wq, C),
                     lambda n, do, kd=kd: (n, do * stride + kd, 0, 0, 0))
        for kd in range(k)
    ]
    in_specs.append(pl.BlockSpec((k * k, k * C, C), lambda n, do: (0, 0, 0)))

    y, s, sq = pl.pallas_call(
        kern,
        out_shape=(
            jax.ShapeDtypeStruct((N, Do, Ho, Wo, C), xp.dtype),
            jax.ShapeDtypeStruct((N, Do, 1, C), jnp.float32),
            jax.ShapeDtypeStruct((N, Do, 1, C), jnp.float32),
        ),
        grid=(N, Do),
        in_specs=in_specs,
        out_specs=(
            pl.BlockSpec((1, 1, Ho, Wo, C), lambda n, do: (n, do, 0, 0, 0)),
            pl.BlockSpec((1, 1, 1, C), lambda n, do: (n, do, 0, 0)),
            pl.BlockSpec((1, 1, 1, C), lambda n, do: (n, do, 0, 0)),
        ),
        compiler_params=pltpu.CompilerParams(
            dimension_semantics=("parallel", "parallel")),
    )(*([xp] * k), w2col)
    return y, s, sq


def bn_relu(y, scale, shift, *, pad=0, out_w=None):
    """y: (N, D, H, W, C) channel-padded; scale/shift: (C,).  With pad>0 the
    result is written into a zero-haloed (and W-rounded) buffer."""
    N, Do, Ho, Wo, C = y.shape
    if pad == 0:
        oD, oH, oW = Do, Ho, Wo
    else:
        oD, oH = Do + 2 * pad, Ho + 2 * pad
        oW = out_w if out_w is not None else _round_up(Wo + 2 * pad, SUBLANES)
    kern = functools.partial(_bn_relu_pad_kernel, pad=pad)
    return pl.pallas_call(
        kern,
        out_shape=jax.ShapeDtypeStruct((N, oD, oH, oW, C), y.dtype),
        grid=(N,),
        in_specs=[
            pl.BlockSpec((1, Do, Ho, Wo, C), lambda n: (n, 0, 0, 0, 0)),
            pl.BlockSpec((1, C), lambda n: (0, 0)),
            pl.BlockSpec((1, C), lambda n: (0, 0)),
        ],
        out_specs=pl.BlockSpec((1, oD, oH, oW, C), lambda n: (n, 0, 0, 0, 0)),
        compiler_params=pltpu.CompilerParams(dimension_semantics=("parallel",)),
    )(y, scale.reshape(1, C), shift.reshape(1, C))


# ----------------------------------------------------------------------------
# JAX glue
# ----------------------------------------------------------------------------
def _bn_scale_shift(sum_, sq, count, gamma_p, beta_p, eps):
    """Finalize training-mode BN from kernel-emitted per-(sample, depth) sums."""
    mean = jnp.sum(sum_, axis=(0, 1, 2)) / count               # (C,)
    ex2 = jnp.sum(sq, axis=(0, 1, 2)) / count
    var = jnp.maximum(ex2 - mean * mean, 0.0)                  # biased variance
    scale = gamma_p / jnp.sqrt(var + eps)
    shift = beta_p - mean * scale
    return scale, shift


def _prep_weights(w, k, in_ch, out_ch, C):
    """(k,k,k,in,out) -> channel-padded, (kd,kh)-major W-im2col layout."""
    wp = jnp.zeros((k, k, k, C, C), w.dtype).at[:, :, :, :in_ch, :out_ch].set(w)
    return wp.reshape(k * k, k * C, C)     # rows ordered (kw, c_in)


def double_conv(x_ncdhw, params, eps=1e-5):
    """Forward pass of DoubleConv.  Input/output layout: NCDHW (PyTorch)."""
    w1, w2 = params["w1"], params["w2"]
    k1, s1 = params["k1"], params["s1"]
    in_ch, out_ch = w1.shape[3], w1.shape[4]
    C = _round_up_lanes(max(in_ch, out_ch))    # lane-dense channel width

    # Conv biases b1/b2 cancel exactly under train-mode BatchNorm (the batch
    # mean absorbs them), so the kernel path never touches them.
    w1p = _prep_weights(w1, k1, in_ch, out_ch, C)
    w2p = _prep_weights(w2, 3, out_ch, out_ch, C)
    g1p = jnp.zeros((C,), jnp.float32).at[:out_ch].set(params["g1"])
    be1p = jnp.zeros((C,), jnp.float32).at[:out_ch].set(params["beta1"])
    g2p = jnp.zeros((C,), jnp.float32).at[:out_ch].set(params["g2"])
    be2p = jnp.zeros((C,), jnp.float32).at[:out_ch].set(params["beta2"])

    N, _, D, H, W = x_ncdhw.shape
    p1 = k1 // 2
    Do1 = (D + 2 * p1 - k1) // s1 + 1
    Ho1 = (H + 2 * p1 - k1) // s1 + 1
    Wo1 = (W + 2 * p1 - k1) // s1 + 1

    # NCDHW -> NDHWC; halo + channel pad + W-to-sublane pad in one XLA pad.
    x = jnp.transpose(x_ncdhw, (0, 2, 3, 4, 1))
    Wq1 = _round_up(W + 2 * p1, SUBLANES)
    xp = jnp.pad(x, ((0, 0), (p1, p1), (p1, p1),
                     (p1, Wq1 - W - p1), (0, C - in_ch)))

    count = N * Do1 * Ho1 * Wo1

    # --- Conv1 (+ fused BN batch-stat sums), BN1 + ReLU fused with conv2 pad ---
    y, s, sq = conv3d_bn_stats(xp, w1p, Do1, Ho1, Wo1, k=k1, stride=s1)
    scale, shift = _bn_scale_shift(s, sq, count, g1p, be1p, eps)
    xp2 = bn_relu(y, scale, shift, pad=1)          # zero-haloed conv2 input

    # --- Conv2 (3x3x3, stride 1, pad 1) (+ fused sums), BN2 + ReLU ---
    y, s, sq = conv3d_bn_stats(xp2, w2p, Do1, Ho1, Wo1, k=3, stride=1)
    scale, shift = _bn_scale_shift(s, sq, count, g2p, be2p, eps)
    y = bn_relu(y, scale, shift, pad=0)

    # Drop channel padding, NDHWC -> NCDHW.
    return jnp.transpose(y[..., :out_ch], (0, 4, 1, 2, 3))


# ----------------------------------------------------------------------------
# Pure-JAX reference (for correctness check)
# ----------------------------------------------------------------------------
def double_conv_ref(x_ncdhw, params, eps=1e-5):
    x = jnp.transpose(x_ncdhw, (0, 2, 3, 4, 1))
    dn = ("NDHWC", "DHWIO", "NDHWC")

    def conv(x, w, b, k, stride):
        pad = k // 2
        y = lax.conv_general_dilated(
            x, w, window_strides=(stride,) * 3,
            padding=[(pad, pad)] * 3, dimension_numbers=dn)
        return y + b

    def bn_relu_ref(y, g, beta):
        mean = jnp.mean(y, axis=(0, 1, 2, 3))
        var = jnp.mean((y - mean) ** 2, axis=(0, 1, 2, 3))
        return jnp.maximum((y - mean) / jnp.sqrt(var + eps) * g + beta, 0.0)

    y = conv(x, params["w1"], params["b1"], params["k1"], params["s1"])
    y = bn_relu_ref(y, params["g1"], params["beta1"])
    y = conv(y, params["w2"], params["b2"], 3, 1)
    y = bn_relu_ref(y, params["g2"], params["beta2"])
    return jnp.transpose(y, (0, 4, 1, 2, 3))


# ----------------------------------------------------------------------------
# Main
# ----------------------------------------------------------------------------
if __name__ == "__main__":
    key = jax.random.PRNGKey(0)
    in_ch, out_ch = 4, 8
    k1, s1 = 3, 1                       # module defaults
    N, D, H, W = 2, 8, 8, 8

    keys = jax.random.split(key, 6)
    x = jax.random.normal(keys[0], (N, in_ch, D, H, W), jnp.float32)   # NCDHW

    params = {
        "w1": 0.1 * jax.random.normal(keys[1], (k1, k1, k1, in_ch, out_ch), jnp.float32),
        "b1": 0.1 * jax.random.normal(keys[2], (out_ch,), jnp.float32),
        "g1": jnp.ones((out_ch,), jnp.float32),       # BatchNorm weight init
        "beta1": jnp.zeros((out_ch,), jnp.float32),   # BatchNorm bias init
        "w2": 0.1 * jax.random.normal(keys[3], (3, 3, 3, out_ch, out_ch), jnp.float32),
        "b2": 0.1 * jax.random.normal(keys[4], (out_ch,), jnp.float32),
        "g2": jnp.ones((out_ch,), jnp.float32),
        "beta2": jnp.zeros((out_ch,), jnp.float32),
        "k1": k1,
        "s1": s1,
    }

    out = jax.block_until_ready(double_conv(x, params))
    ref = jax.block_until_ready(double_conv_ref(x, params))

    assert out.shape == (N, out_ch, D, H, W), out.shape
    err = float(jnp.max(jnp.abs(out - ref)))
    assert jnp.allclose(out, ref, rtol=1e-3, atol=1e-3), err

    print("KERNEL_OK")
</pallas_src>

<mosaic_0001>
module attributes {stable_mosaic.version = 11 : i64} {
  func.func @_conv3d_slice_kernel(%arg0: i32, %arg1: i32, %arg2: memref<1x1x10x16x128xf32, #tpu.memory_space<vmem>>, %arg3: memref<1x1x10x16x128xf32, #tpu.memory_space<vmem>>, %arg4: memref<1x1x10x16x128xf32, #tpu.memory_space<vmem>>, %arg5: memref<9x384x128xf32, #tpu.memory_space<vmem>>, %arg6: memref<1x1x8x8x128xf32, #tpu.memory_space<vmem>>, %arg7: memref<1x1x1x128xf32, #tpu.memory_space<vmem>>, %arg8: memref<1x1x1x128xf32, #tpu.memory_space<vmem>>) attributes {dimension_semantics = [#tpu.dimension_semantics<parallel>, #tpu.dimension_semantics<parallel>], iteration_bounds = array<i64: 2, 8>, scalar_prefetch = 0 : i64, scratch_operands = 0 : i64, tpu.core_type = #tpu.core_type<tc>, window_params = [{transform_indices = @transform_0, window_bounds = array<i64: 1, 1, 10, 16, 128>}, {transform_indices = @transform_1, window_bounds = array<i64: 1, 1, 10, 16, 128>}, {transform_indices = @transform_2, window_bounds = array<i64: 1, 1, 10, 16, 128>}, {pipeline_mode = #tpu.pipeline_mode<synchronous>, transform_indices = @transform_3, window_bounds = array<i64: 9, 384, 128>}, {transform_indices = @transform_4, window_bounds = array<i64: 1, 1, 8, 8, 128>}, {transform_indices = @transform_5, window_bounds = array<i64: 1, 1, 1, 128>}, {transform_indices = @transform_6, window_bounds = array<i64: 1, 1, 1, 128>}]} {
    %cst = arith.constant 0.000000e+00 : f32
    %0 = vector.broadcast %cst : f32 to vector<64x128xf32>
    %c0 = arith.constant 0 : index
    %c0_0 = arith.constant 0 : index
    %c0_1 = arith.constant 0 : index
    %c0_2 = arith.constant 0 : index
    %c0_3 = arith.constant 0 : index
    %1 = vector.load %arg2[%c0, %c0_0, %c0_1, %c0_2, %c0_3] : memref<1x1x10x16x128xf32, #tpu.memory_space<vmem>>, vector<1x1x8x16x128xf32>
    %2 = vector.shape_cast %1 : vector<1x1x8x16x128xf32> to vector<8x16x128xf32>
    %3 = vector.extract_strided_slice %2 {offsets = [0, 0, 0], sizes = [8, 8, 128], strides = [1, 1, 1]} : vector<8x16x128xf32> to vector<8x8x128xf32>
    %4 = vector.extract_strided_slice %2 {offsets = [0, 1, 0], sizes = [8, 8, 128], strides = [1, 1, 1]} : vector<8x16x128xf32> to vector<8x8x128xf32>
    %5 = vector.extract_strided_slice %2 {offsets = [0, 2, 0], sizes = [8, 8, 128], strides = [1, 1, 1]} : vector<8x16x128xf32> to vector<8x8x128xf32>
    %6 = tpu.concatenate %3, %4, %5 in 2 : vector<8x8x128xf32>, vector<8x8x128xf32>, vector<8x8x128xf32> -> vector<8x8x384xf32>
    %7 = vector.shape_cast %6 : vector<8x8x384xf32> to vector<64x384xf32>
    %c0_4 = arith.constant 0 : index
    %c0_5 = arith.constant 0 : index
    %c0_6 = arith.constant 0 : index
    %8 = vector.load %arg5[%c0_4, %c0_5, %c0_6] : memref<9x384x128xf32, #tpu.memory_space<vmem>>, vector<1x384x128xf32>
    %9 = vector.shape_cast %8 : vector<1x384x128xf32> to vector<384x128xf32>
    %cst_7 = arith.constant dense<0.000000e+00> : vector<64x128xf32>
    %10 = tpu.matmul %7, %9, %cst_7 {dimension_numbers = #tpu.dot_dimension_numbers<[1], [0], [0], [1], [0, 0, 1, 1], [], []>} : vector<64x384xf32>, vector<384x128xf32>, vector<64x128xf32> -> vector<64x128xf32>
    %11 = arith.addf %0, %10 : vector<64x128xf32>
    %c0_8 = arith.constant 0 : index
    %c0_9 = arith.constant 0 : index
    %c1 = arith.constant 1 : index
    %c0_10 = arith.constant 0 : index
    %c0_11 = arith.constant 0 : index
    %12 = vector.load %arg2[%c0_8, %c0_9, %c1, %c0_10, %c0_11] : memref<1x1x10x16x128xf32, #tpu.memory_space<vmem>>, vector<1x1x8x16x128xf32>
    %13 = vector.shape_cast %12 : vector<1x1x8x16x128xf32> to vector<8x16x128xf32>
    %14 = vector.extract_strided_slice %13 {offsets = [0, 0, 0], sizes = [8, 8, 128], strides = [1, 1, 1]} : vector<8x16x128xf32> to vector<8x8x128xf32>
    %15 = vector.extract_strided_slice %13 {offsets = [0, 1, 0], sizes = [8, 8, 128], strides = [1, 1, 1]} : vector<8x16x128xf32> to vector<8x8x128xf32>
    %16 = vector.extract_strided_slice %13 {offsets = [0, 2, 0], sizes = [8, 8, 128], strides = [1, 1, 1]} : vector<8x16x128xf32> to vector<8x8x128xf32>
    %17 = tpu.concatenate %14, %15, %16 in 2 : vector<8x8x128xf32>, vector<8x8x128xf32>, vector<8x8x128xf32> -> vector<8x8x384xf32>
    %18 = vector.shape_cast %17 : vector<8x8x384xf32> to vector<64x384xf32>
    %c1_12 = arith.constant 1 : index
    %c0_13 = arith.constant 0 : index
    %c0_14 = arith.constant 0 : index
    %19 = vector.load %arg5[%c1_12, %c0_13, %c0_14] : memref<9x384x128xf32, #tpu.memory_space<vmem>>, vector<1x384x128xf32>
    %20 = vector.shape_cast %19 : vector<1x384x128xf32> to vector<384x128xf32>
    %cst_15 = arith.constant dense<0.000000e+00> : vector<64x128xf32>
    %21 = tpu.matmul %18, %20, %cst_15 {dimension_numbers = #tpu.dot_dimension_numbers<[1], [0], [0], [1], [0, 0, 1, 1], [], []>} : vector<64x384xf32>, vector<384x128xf32>, vector<64x128xf32> -> vector<64x128xf32>
    %22 = arith.addf %11, %21 : vector<64x128xf32>
    %c0_16 = arith.constant 0 : index
    %c0_17 = arith.constant 0 : index
    %c2 = arith.constant 2 : index
    %c0_18 = arith.constant 0 : index
    %c0_19 = arith.constant 0 : index
    %23 = vector.load %arg2[%c0_16, %c0_17, %c2, %c0_18, %c0_19] : memref<1x1x10x16x128xf32, #tpu.memory_space<vmem>>, vector<1x1x8x16x128xf32>
    %24 = vector.shape_cast %23 : vector<1x1x8x16x128xf32> to vector<8x16x128xf32>
    %25 = vector.extract_strided_slice %24 {offsets = [0, 0, 0], sizes = [8, 8, 128], strides = [1, 1, 1]} : vector<8x16x128xf32> to vector<8x8x128xf32>
    %26 = vector.extract_strided_slice %24 {offsets = [0, 1, 0], sizes = [8, 8, 128], strides = [1, 1, 1]} : vector<8x16x128xf32> to vector<8x8x128xf32>
    %27 = vector.extract_strided_slice %24 {offsets = [0, 2, 0], sizes = [8, 8, 128], strides = [1, 1, 1]} : vector<8x16x128xf32> to vector<8x8x128xf32>
    %28 = tpu.concatenate %25, %26, %27 in 2 : vector<8x8x128xf32>, vector<8x8x128xf32>, vector<8x8x128xf32> -> vector<8x8x384xf32>
    %29 = vector.shape_cast %28 : vector<8x8x384xf32> to vector<64x384xf32>
    %c2_20 = arith.constant 2 : index
    %c0_21 = arith.constant 0 : index
    %c0_22 = arith.constant 0 : index
    %30 = vector.load %arg5[%c2_20, %c0_21, %c0_22] : memref<9x384x128xf32, #tpu.memory_space<vmem>>, vector<1x384x128xf32>
    %31 = vector.shape_cast %30 : vector<1x384x128xf32> to vector<384x128xf32>
    %cst_23 = arith.constant dense<0.000000e+00> : vector<64x128xf32>
    %32 = tpu.matmul %29, %31, %cst_23 {dimension_numbers = #tpu.dot_dimension_numbers<[1], [0], [0], [1], [0, 0, 1, 1], [], []>} : vector<64x384xf32>, vector<384x128xf32>, vector<64x128xf32> -> vector<64x128xf32>
    %33 = arith.addf %22, %32 : vector<64x128xf32>
    %c0_24 = arith.constant 0 : index
    %c0_25 = arith.constant 0 : index
    %c0_26 = arith.constant 0 : index
    %c0_27 = arith.constant 0 : index
    %c0_28 = arith.constant 0 : index
    %34 = vector.load %arg3[%c0_24, %c0_25, %c0_26, %c0_27, %c0_28] : memref<1x1x10x16x128xf32, #tpu.memory_space<vmem>>, vector<1x1x8x16x128xf32>
    %35 = vector.shape_cast %34 : vector<1x1x8x16x128xf32> to vector<8x16x128xf32>
    %36 = vector.extract_strided_slice %35 {offsets = [0, 0, 0], sizes = [8, 8, 128], strides = [1, 1, 1]} : vector<8x16x128xf32> to vector<8x8x128xf32>
    %37 = vector.extract_strided_slice %35 {offsets = [0, 1, 0], sizes = [8, 8, 128], strides = [1, 1, 1]} : vector<8x16x128xf32> to vector<8x8x128xf32>
    %38 = vector.extract_strided_slice %35 {offsets = [0, 2, 0], sizes = [8, 8, 128], strides = [1, 1, 1]} : vector<8x16x128xf32> to vector<8x8x128xf32>
    %39 = tpu.concatenate %36, %37, %38 in 2 : vector<8x8x128xf32>, vector<8x8x128xf32>, vector<8x8x128xf32> -> vector<8x8x384xf32>
    %40 = vector.shape_cast %39 : vector<8x8x384xf32> to vector<64x384xf32>
    %c3 = arith.constant 3 : index
    %c0_29 = arith.constant 0 : index
    %c0_30 = arith.constant 0 : index
    %41 = vector.load %arg5[%c3, %c0_29, %c0_30] : memref<9x384x128xf32, #tpu.memory_space<vmem>>, vector<1x384x128xf32>
    %42 = vector.shape_cast %41 : vector<1x384x128xf32> to vector<384x128xf32>
    %cst_31 = arith.constant dense<0.000000e+00> : vector<64x128xf32>
    %43 = tpu.matmul %40, %42, %cst_31 {dimension_numbers = #tpu.dot_dimension_numbers<[1], [0], [0], [1], [0, 0, 1, 1], [], []>} : vector<64x384xf32>, vector<384x128xf32>, vector<64x128xf32> -> vector<64x128xf32>
    %44 = arith.addf %33, %43 : vector<64x128xf32>
    %c0_32 = arith.constant 0 : index
    %c0_33 = arith.constant 0 : index
    %c1_34 = arith.constant 1 : index
    %c0_35 = arith.constant 0 : index
    %c0_36 = arith.constant 0 : index
    %45 = vector.load %arg3[%c0_32, %c0_33, %c1_34, %c0_35, %c0_36] : memref<1x1x10x16x128xf32, #tpu.memory_space<vmem>>, vector<1x1x8x16x128xf32>
    %46 = vector.shape_cast %45 : vector<1x1x8x16x128xf32> to vector<8x16x128xf32>
    %47 = vector.extract_strided_slice %46 {offsets = [0, 0, 0], sizes = [8, 8, 128], strides = [1, 1, 1]} : vector<8x16x128xf32> to vector<8x8x128xf32>
    %48 = vector.extract_strided_slice %46 {offsets = [0, 1, 0], sizes = [8, 8, 128], strides = [1, 1, 1]} : vector<8x16x128xf32> to vector<8x8x128xf32>
    %49 = vector.extract_strided_slice %46 {offsets = [0, 2, 0], sizes = [8, 8, 128], strides = [1, 1, 1]} : vector<8x16x128xf32> to vector<8x8x128xf32>
    %50 = tpu.concatenate %47, %48, %49 in 2 : vector<8x8x128xf32>, vector<8x8x128xf32>, vector<8x8x128xf32> -> vector<8x8x384xf32>
    %51 = vector.shape_cast %50 : vector<8x8x384xf32> to vector<64x384xf32>
    %c4 = arith.constant 4 : index
    %c0_37 = arith.constant 0 : index
    %c0_38 = arith.constant 0 : index
    %52 = vector.load %arg5[%c4, %c0_37, %c0_38] : memref<9x384x128xf32, #tpu.memory_space<vmem>>, vector<1x384x128xf32>
    %53 = vector.shape_cast %52 : vector<1x384x128xf32> to vector<384x128xf32>
    %cst_39 = arith.constant dense<0.000000e+00> : vector<64x128xf32>
    %54 = tpu.matmul %51, %53, %cst_39 {dimension_numbers = #tpu.dot_dimension_numbers<[1], [0], [0], [1], [0, 0, 1, 1], [], []>} : vector<64x384xf32>, vector<384x128xf32>, vector<64x128xf32> -> vector<64x128xf32>
    %55 = arith.addf %44, %54 : vector<64x128xf32>
    %c0_40 = arith.constant 0 : index
    %c0_41 = arith.constant 0 : index
    %c2_42 = arith.constant 2 : index
    %c0_43 = arith.constant 0 : index
    %c0_44 = arith.constant 0 : index
    %56 = vector.load %arg3[%c0_40, %c0_41, %c2_42, %c0_43, %c0_44] : memref<1x1x10x16x128xf32, #tpu.memory_space<vmem>>, vector<1x1x8x16x128xf32>
    %57 = vector.shape_cast %56 : vector<1x1x8x16x128xf32> to vector<8x16x128xf32>
    %58 = vector.extract_strided_slice %57 {offsets = [0, 0, 0], sizes = [8, 8, 128], strides = [1, 1, 1]} : vector<8x16x128xf32> to vector<8x8x128xf32>
    %59 = vector.extract_strided_slice %57 {offsets = [0, 1, 0], sizes = [8, 8, 128], strides = [1, 1, 1]} : vector<8x16x128xf32> to vector<8x8x128xf32>
    %60 = vector.extract_strided_slice %57 {offsets = [0, 2, 0], sizes = [8, 8, 128], strides = [1, 1, 1]} : vector<8x16x128xf32> to vector<8x8x128xf32>
    %61 = tpu.concatenate %58, %59, %60 in 2 : vector<8x8x128xf32>, vector<8x8x128xf32>, vector<8x8x128xf32> -> vector<8x8x384xf32>
    %62 = vector.shape_cast %61 : vector<8x8x384xf32> to vector<64x384xf32>
    %c5 = arith.constant 5 : index
    %c0_45 = arith.constant 0 : index
    %c0_46 = arith.constant 0 : index
    %63 = vector.load %arg5[%c5, %c0_45, %c0_46] : memref<9x384x128xf32, #tpu.memory_space<vmem>>, vector<1x384x128xf32>
    %64 = vector.shape_cast %63 : vector<1x384x128xf32> to vector<384x128xf32>
    %cst_47 = arith.constant dense<0.000000e+00> : vector<64x128xf32>
    %65 = tpu.matmul %62, %64, %cst_47 {dimension_numbers = #tpu.dot_dimension_numbers<[1], [0], [0], [1], [0, 0, 1, 1], [], []>} : vector<64x384xf32>, vector<384x128xf32>, vector<64x128xf32> -> vector<64x128xf32>
    %66 = arith.addf %55, %65 : vector<64x128xf32>
    %c0_48 = arith.constant 0 : index
    %c0_49 = arith.constant 0 : index
    %c0_50 = arith.constant 0 : index
    %c0_51 = arith.constant 0 : index
    %c0_52 = arith.constant 0 : index
    %67 = vector.load %arg4[%c0_48, %c0_49, %c0_50, %c0_51, %c0_52] : memref<1x1x10x16x128xf32, #tpu.memory_space<vmem>>, vector<1x1x8x16x128xf32>
    %68 = vector.shape_cast %67 : vector<1x1x8x16x128xf32> to vector<8x16x128xf32>
    %69 = vector.extract_strided_slice %68 {offsets = [0, 0, 0], sizes = [8, 8, 128], strides = [1, 1, 1]} : vector<8x16x128xf32> to vector<8x8x128xf32>
    %70 = vector.extract_strided_slice %68 {offsets = [0, 1, 0], sizes = [8, 8, 128], strides = [1, 1, 1]} : vector<8x16x128xf32> to vector<8x8x128xf32>
    %71 = vector.extract_strided_slice %68 {offsets = [0, 2, 0], sizes = [8, 8, 128], strides = [1, 1, 1]} : vector<8x16x128xf32> to vector<8x8x128xf32>
    %72 = tpu.concatenate %69, %70, %71 in 2 : vector<8x8x128xf32>, vector<8x8x128xf32>, vector<8x8x128xf32> -> vector<8x8x384xf32>
    %73 = vector.shape_cast %72 : vector<8x8x384xf32> to vector<64x384xf32>
    %c6 = arith.constant 6 : index
    %c0_53 = arith.constant 0 : index
    %c0_54 = arith.constant 0 : index
    %74 = vector.load %arg5[%c6, %c0_53, %c0_54] : memref<9x384x128xf32, #tpu.memory_space<vmem>>, vector<1x384x128xf32>
    %75 = vector.shape_cast %74 : vector<1x384x128xf32> to vector<384x128xf32>
    %cst_55 = arith.constant dense<0.000000e+00> : vector<64x128xf32>
    %76 = tpu.matmul %73, %75, %cst_55 {dimension_numbers = #tpu.dot_dimension_numbers<[1], [0], [0], [1], [0, 0, 1, 1], [], []>} : vector<64x384xf32>, vector<384x128xf32>, vector<64x128xf32> -> vector<64x128xf32>
    %77 = arith.addf %66, %76 : vector<64x128xf32>
    %c0_56 = arith.constant 0 : index
    %c0_57 = arith.constant 0 : index
    %c1_58 = arith.constant 1 : index
    %c0_59 = arith.constant 0 : index
    %c0_60 = arith.constant 0 : index
    %78 = vector.load %arg4[%c0_56, %c0_57, %c1_58, %c0_59, %c0_60] : memref<1x1x10x16x128xf32, #tpu.memory_space<vmem>>, vector<1x1x8x16x128xf32>
    %79 = vector.shape_cast %78 : vector<1x1x8x16x128xf32> to vector<8x16x128xf32>
    %80 = vector.extract_strided_slice %79 {offsets = [0, 0, 0], sizes = [8, 8, 128], strides = [1, 1, 1]} : vector<8x16x128xf32> to vector<8x8x128xf32>
    %81 = vector.extract_strided_slice %79 {offsets = [0, 1, 0], sizes = [8, 8, 128], strides = [1, 1, 1]} : vector<8x16x128xf32> to vector<8x8x128xf32>
    %82 = vector.extract_strided_slice %79 {offsets = [0, 2, 0], sizes = [8, 8, 128], strides = [1, 1, 1]} : vector<8x16x128xf32> to vector<8x8x128xf32>
    %83 = tpu.concatenate %80, %81, %82 in 2 : vector<8x8x128xf32>, vector<8x8x128xf32>, vector<8x8x128xf32> -> vector<8x8x384xf32>
    %84 = vector.shape_cast %83 : vector<8x8x384xf32> to vector<64x384xf32>
    %c7 = arith.constant 7 : index
    %c0_61 = arith.constant 0 : index
    %c0_62 = arith.constant 0 : index
    %85 = vector.load %arg5[%c7, %c0_61, %c0_62] : memref<9x384x128xf32, #tpu.memory_space<vmem>>, vector<1x384x128xf32>
    %86 = vector.shape_cast %85 : vector<1x384x128xf32> to vector<384x128xf32>
    %cst_63 = arith.constant dense<0.000000e+00> : vector<64x128xf32>
    %87 = tpu.matmul %84, %86, %cst_63 {dimension_numbers = #tpu.dot_dimension_numbers<[1], [0], [0], [1], [0, 0, 1, 1], [], []>} : vector<64x384xf32>, vector<384x128xf32>, vector<64x128xf32> -> vector<64x128xf32>
    %88 = arith.addf %77, %87 : vector<64x128xf32>
    %c0_64 = arith.constant 0 : index
    %c0_65 = arith.constant 0 : index
    %c2_66 = arith.constant 2 : index
    %c0_67 = arith.constant 0 : index
    %c0_68 = arith.constant 0 : index
    %89 = vector.load %arg4[%c0_64, %c0_65, %c2_66, %c0_67, %c0_68] : memref<1x1x10x16x128xf32, #tpu.memory_space<vmem>>, vector<1x1x8x16x128xf32>
    %90 = vector.shape_cast %89 : vector<1x1x8x16x128xf32> to vector<8x16x128xf32>
    %91 = vector.extract_strided_slice %90 {offsets = [0, 0, 0], sizes = [8, 8, 128], strides = [1, 1, 1]} : vector<8x16x128xf32> to vector<8x8x128xf32>
    %92 = vector.extract_strided_slice %90 {offsets = [0, 1, 0], sizes = [8, 8, 128], strides = [1, 1, 1]} : vector<8x16x128xf32> to vector<8x8x128xf32>
    %93 = vector.extract_strided_slice %90 {offsets = [0, 2, 0], sizes = [8, 8, 128], strides = [1, 1, 1]} : vector<8x16x128xf32> to vector<8x8x128xf32>
    %94 = tpu.concatenate %91, %92, %93 in 2 : vector<8x8x128xf32>, vector<8x8x128xf32>, vector<8x8x128xf32> -> vector<8x8x384xf32>
    %95 = vector.shape_cast %94 : vector<8x8x384xf32> to vector<64x384xf32>
    %c8 = arith.constant 8 : index
    %c0_69 = arith.constant 0 : index
    %c0_70 = arith.constant 0 : index
    %96 = vector.load %arg5[%c8, %c0_69, %c0_70] : memref<9x384x128xf32, #tpu.memory_space<vmem>>, vector<1x384x128xf32>
    %97 = vector.shape_cast %96 : vector<1x384x128xf32> to vector<384x128xf32>
    %cst_71 = arith.constant dense<0.000000e+00> : vector<64x128xf32>
    %98 = tpu.matmul %95, %97, %cst_71 {dimension_numbers = #tpu.dot_dimension_numbers<[1], [0], [0], [1], [0, 0, 1, 1], [], []>} : vector<64x384xf32>, vector<384x128xf32>, vector<64x128xf32> -> vector<64x128xf32>
    %99 = arith.addf %88, %98 : vector<64x128xf32>
    %100 = vector.shape_cast %99 : vector<64x128xf32> to vector<1x1x8x8x128xf32>
    %c0_72 = arith.constant 0 : index
    %c0_73 = arith.constant 0 : index
    %c0_74 = arith.constant 0 : index
    %c0_75 = arith.constant 0 : index
    %c0_76 = arith.constant 0 : index
    %101 = vector.load %arg6[%c0_72, %c0_73, %c0_74, %c0_75, %c0_76] : memref<1x1x8x8x128xf32, #tpu.memory_space<vmem>>, vector<1x1x8x8x128xf32>
    tpu.vector_store %arg6[%c0_72, %c0_73, %c0_74, %c0_75, %c0_76], %100 {strides = array<i32>} : memref<1x1x8x8x128xf32, #tpu.memory_space<vmem>>, vector<1x1x8x8x128xf32>,
    %cst_77 = arith.constant dense<0.000000e+00> : vector<128xf32>
    %102 = vector.multi_reduction <add>, %99, %cst_77 [0] : vector<64x128xf32> to vector<128xf32>
    %103 = vector.shape_cast %102 : vector<128xf32> to vector<1x1x1x128xf32>
    %c0_78 = arith.constant 0 : index
    %c0_79 = arith.constant 0 : index
    %c0_80 = arith.constant 0 : index
    %c0_81 = arith.constant 0 : index
    %104 = vector.load %arg7[%c0_78, %c0_79, %c0_80, %c0_81] : memref<1x1x1x128xf32, #tpu.memory_space<vmem>>, vector<1x1x1x128xf32>
    tpu.vector_store %arg7[%c0_78, %c0_79, %c0_80, %c0_81], %103 {strides = array<i32>} : memref<1x1x1x128xf32, #tpu.memory_space<vmem>>, vector<1x1x1x128xf32>,
    %105 = arith.mulf %99, %99 : vector<64x128xf32>
    %cst_82 = arith.constant dense<0.000000e+00> : vector<128xf32>
    %106 = vector.multi_reduction <add>, %105, %cst_82 [0] : vector<64x128xf32> to vector<128xf32>
    %107 = vector.shape_cast %106 : vector<128xf32> to vector<1x1x1x128xf32>
    %c0_83 = arith.constant 0 : index
    %c0_84 = arith.constant 0 : index
    %c0_85 = arith.constant 0 : index
    %c0_86 = arith.constant 0 : index
    %108 = vector.load %arg8[%c0_83, %c0_84, %c0_85, %c0_86] : memref<1x1x1x128xf32, #tpu.memory_space<vmem>>, vector<1x1x1x128xf32>
    tpu.vector_store %arg8[%c0_83, %c0_84, %c0_85, %c0_86], %107 {strides = array<i32>} : memref<1x1x1x128xf32, #tpu.memory_space<vmem>>, vector<1x1x1x128xf32>,
    return
  }
  func.func @transform_0(%arg0: i32, %arg1: i32) -> (i32, i32, i32, i32, i32) {
    %c1_i32 = arith.constant 1 : i32
    %0 = arith.muli %arg1, %c1_i32 : i32
    %c0_i32 = arith.constant 0 : i32
    %1 = arith.addi %0, %c0_i32 : i32
    %c0_i32_0 = arith.constant 0 : i32
    %c0_i32_1 = arith.constant 0 : i32
    %c0_i32_2 = arith.constant 0 : i32
    %c0_i32_3 = arith.constant 0 : i32
    return %arg0, %1, %c0_i32_0, %c0_i32_1, %c0_i32_2 : i32, i32, i32, i32, i32
  }
  func.func @transform_1(%arg0: i32, %arg1: i32) -> (i32, i32, i32, i32, i32) {
    %c1_i32 = arith.constant 1 : i32
    %0 = arith.muli %arg1, %c1_i32 : i32
    %c1_i32_0 = arith.constant 1 : i32
    %1 = arith.addi %0, %c1_i32_0 : i32
    %c0_i32 = arith.constant 0 : i32
    %c0_i32_1 = arith.constant 0 : i32
    %c0_i32_2 = arith.constant 0 : i32
    %c0_i32_3 = arith.constant 0 : i32
    return %arg0, %1, %c0_i32, %c0_i32_1, %c0_i32_2 : i32, i32, i32, i32, i32
  }
  func.func @transform_2(%arg0: i32, %arg1: i32) -> (i32, i32, i32, i32, i32) {
    %c1_i32 = arith.constant 1 : i32
    %0 = arith.muli %arg1, %c1_i32 : i32
    %c2_i32 = arith.constant 2 : i32
    %1 = arith.addi %0, %c2_i32 : i32
    %c0_i32 = arith.constant 0 : i32
    %c0_i32_0 = arith.constant 0 : i32
    %c0_i32_1 = arith.constant 0 : i32
    %c0_i32_2 = arith.constant 0 : i32
    return %arg0, %1, %c0_i32, %c0_i32_0, %c0_i32_1 : i32, i32, i32, i32, i32
  }
  func.func @transform_3(%arg0: i32, %arg1: i32) -> (i32, i32, i32) {
    %c0_i32 = arith.constant 0 : i32
    %c0_i32_0 = arith.constant 0 : i32
    %c0_i32_1 = arith.constant 0 : i32
    %c0_i32_2 = arith.constant 0 : i32
    return %c0_i32, %c0_i32_0, %c0_i32_1 : i32, i32, i32
  }
  func.func @transform_4(%arg0: i32, %arg1: i32) -> (i32, i32, i32, i32, i32) {
    %c0_i32 = arith.constant 0 : i32
    %c0_i32_0 = arith.constant 0 : i32
    %c0_i32_1 = arith.constant 0 : i32
    %c0_i32_2 = arith.constant 0 : i32
    return %arg0, %arg1, %c0_i32, %c0_i32_0, %c0_i32_1 : i32, i32, i32, i32, i32
  }
  func.func @transform_5(%arg0: i32, %arg1: i32) -> (i32, i32, i32, i32) {
    %c0_i32 = arith.constant 0 : i32
    %c0_i32_0 = arith.constant 0 : i32
    %c0_i32_1 = arith.constant 0 : i32
    return %arg0, %arg1, %c0_i32, %c0_i32_0 : i32, i32, i32, i32
  }
  func.func @transform_6(%arg0: i32, %arg1: i32) -> (i32, i32, i32, i32) {
    %c0_i32 = arith.constant 0 : i32
    %c0_i32_0 = arith.constant 0 : i32
    %c0_i32_1 = arith.constant 0 : i32
    return %arg0, %arg1, %c0_i32, %c0_i32_0 : i32, i32, i32, i32
  }
}

</mosaic_0001>

<bundles_post_ra>
// kernel: tpu_custom_call.1
= control target key start
LH: loop header
LB: loop body
LE: loop exit
PB: predicated region body
PF: predicated region fallthrough
CT: control target
= control target key end

     0   :  { %s6909_s0 = inlined_call_operand.hbm [shape: f32[2,10,10,16,128], index: 0, kind: input, shape index: {}]   ;;  %s6910_s1 = inlined_call_operand.hbm [shape: f32[2,10,10,16,128], index: 1, kind: input, shape index: {}]   ;;  %s6911_s2 = inlined_call_operand.hbm [shape: f32[2,10,10,16,128], index: 2, kind: input, shape index: {}]   ;;  %s6912_s3 = inlined_call_operand.hbm [shape: f32[9,384,128], index: 3, kind: input, shape index: {}]   ;;  %s6913_s4 = inlined_call_operand.hbm [shape: f32[2,8,8,8,128], index: 4, kind: output, shape index: {0}]   ;;  %s6914_s5 = inlined_call_operand.hbm [shape: f32[2,8,1,128], index: 5, kind: output, shape index: {1}]   ;;  %s6915_s6 = inlined_call_operand.hbm [shape: f32[2,8,1,128], index: 6, kind: output, shape index: {2}]  }
   0x1   :  { %6934 = sst [smem:[#allocation36_spill]] %s6909_s0 }
   0x2   :  { %6935 = sst [smem:[#allocation37_spill]] %s6910_s1 }
   0x3   :  { %6936 = sst [smem:[#allocation38_spill]] %s6911_s2 }
   0x4   :  { %6937 = sst [smem:[#allocation39_spill]] %s6912_s3 }
   0x5   :  { %6938 = sst [smem:[#allocation40_spill]] %s6913_s4 }
   0x6   :  { %6939 = sst [smem:[#allocation41_spill]] %s6914_s5 }
   0x7   :  { %6940 = sst [smem:[#allocation42_spill]] %s6915_s6 }
   0x8   :  { %12 = vsyncpa [#allocation3], 0 }
   0x9   :  { %14 = vsyncpa [#allocation3 + $0x1], 0 }
   0xa   :  { %15 = vsyncpa [#allocation6], 0 }
   0xb   :  { %17 = vsyncpa [#allocation6 + $0x1], 0 }
   0xc   :  { %18 = vsyncpa [#allocation9], 0 }
   0xd   :  { %19 = vsyncpa [#allocation4], 0 }
   0xe   :  { %21 = vsyncpa [#allocation4 + $0x1], 0 }
   0xf   :  { %22 = vsyncpa [#allocation12], 0 }
  0x10   :  { %24 = vsyncpa [#allocation12 + $0x1], 0  ;;  %s5754_s21 = smov 0   ;;  %s5756_s22 = smov 0  }
  0x11   :  { %s5758_s23 = smov 0   ;;  %s5760_s24 = smov 0  }
  0x12   :  { %s5762_s25 = smov 0   ;;  %s5764_s26 = smov 0  }
  0x13   :  { %s5766_s27 = smov 0   ;;  %s5768_s28 = smov 0  }
  0x14   :  { %s5770_s29 = smov 0   ;;  %s5772_s30 = smov 0  }
  0x15   :  { %s5774_s7 = smov 0   ;;  %s5776_s8 = smov 0  }
  0x16   :  { %s5778_s9 = smov 0   ;;  %s5780_s10 = smov 0  }
  0x17 LB: > { %6941 = sst [smem:[#allocation20_spill]] %s5654_s21  ;;  %s39_s11 = sadd.s32 1, %s5698_s8  ;;  %s5706_s10 = sphi %s5780_s10, %s30_s10   ;;  %s5702_s9 = sphi %s5778_s9, %s7006_s9   ;;  %s5698_s8 = sphi %s5776_s8, %s7005_s8   ;;  %s5694_s7 = sphi %s5774_s7, %s7004_s7   ;;  %s5690_s30 = sphi %s5772_s30, %s7003_s30   ;;  %s5686_s29 = sphi %s5770_s29, %s7014_s29   ;;  %s5682_s28 = sphi %s5768_s28, %s7013_s28   ;;  %s5678_s27 = sphi %s5766_s27, %s7012_s27   ;;  %s5674_s26 = sphi %s5764_s26, %s7001_s26   ;;  %s5670_s25 = sphi %s5762_s25, %s7011_s25   ;;  %s5666_s24 = sphi %s5760_s24, %s7010_s24   ;;  %s5662_s23 = sphi %s5758_s23, %s7009_s23   ;;  %s5658_s22 = sphi %s5756_s22, %s7008_s22   ;;  %s5654_s21 = sphi %s5754_s21, %s7007_s21  }
  0x18   : > { %6942 = sst [smem:[#allocation21_spill]] %s5674_s26  ;;  %s42_s12 = sadd.s32 1, %s5702_s9 }
  0x19   : > { %6943 = sst [smem:[#allocation22_spill]] %s5690_s30  ;;  %p40_p0 = scmp.ge.s32.totalorder %s39_s11, 8 }
  0x1a   : > { %6944 = sst [smem:[#allocation23_spill]] %s5694_s7  ;;  %p6925_p1 = scmp.eq.s32.totalorder %s5706_s10, 0 }
  0x1b   : > { %6945 = sst [smem:[#allocation24_spill]] %s5698_s8  ;;  %s81_s13 = sadd.s32 1, %s5674_s26 }
  0x1c   : > { %6946 = sst [smem:[#allocation25_spill]] %s5702_s9  ;;  %p88_p2 = scmp.ne.s32.totalorder %s5674_s26, %s5670_s25 }
  0x1d   : > { %s5830_s14 = scalar_select %p40_p0, 0, %s39_s11  }
  0x1e   : > { %s7016_s12 = smov (!%p40_p0, %s42_s12), %s5702_s9  ;;  %p5838_p4 = por %p88_p2, %p6925_p1 }
  0x1f   : > { %6947 = sst [smem:[#allocation26_spill]] %s5830_s14  ;;  %s75_s16 = sadd.s32 1, %s5830_s14 }
  0x20   : > { %p44_p3 = scmp.ge.s32.totalorder %s7016_s12, 2  ;;  %s77_s17 = ssub.s32 %s39_s11, %s75_s16 }
  0x21   : > { %p94_p5 = scmp.ne.s32.totalorder %s5670_s25, %s5666_s24  ;;  %s104_s19 = sadd.s32 2, %s5698_s8 }
  0x22   : > { %s7018_s12 = smov (%p44_p3, %s7016_s12), 0  ;;  %s105_s20 = sadd.s32 2, %s5830_s14 }
  0x23   : > { %6949 = sst [smem:[#allocation27_spill]] %s7018_s12  ;;  %s5850_s15 = ssub.s32 %s5702_s9, %s7018_s12 }
  0x24   : > { %s107_s11 = ssub.s32 %s104_s19, %s105_s20  ;;  %s78_s16 = sor.u32 %s77_s17, %s5850_s15 }
  0x25   : > { %s108_s6 = sor.u32 %s107_s11, %s5850_s15  ;;  %p79_p6 = scmp.eq.s32.totalorder %s78_s16, 0 }
  0x26   : > { %p5854_p7 = scmp.eq.s32.totalorder %s108_s6, 0  ;;  %p6924_p8 = scmp.lt.s32.totalorder %s5706_s10, 16 }
  0x27   : > { %s5859_s4 = scalar_select %p79_p6, %s5674_s26, %s81_s13  }
  0x28   : > { %s5214_s7 = smul.u32 20, %s5698_s8  ;;  %s289_s30 = sand.u32 1, %s5706_s10  }
  0x29   : > { %6951 = sst [smem:[#allocation28_spill]] %s5859_s4  ;;  %s5215_s2 = smul.u32 200, %s5702_s9 }
  0x2a   : > { %s291_s21 = sand.u32 1, %s5674_s26   ;;  %p5870_p9 = pnand %p6924_p8, %p5838_p4 }
  0x2b   : > { %s276_s17 = sadd.s32 %s5215_s2, %s5214_s7  ;;  %s5216_s19 = smul.u32 160, %s291_s21 }
  0x2c   : > { %s5874_s6 = sshll.u32 %s276_s17, 7  ;;  %s6953_s1 = sld [smem:[#allocation37_spill]] }
  0x2d   : > { %s293_s4 = scalar_lea.vmem [#allocation5], %s5216_s19  ;;  %s5880_s18 = scalar_lea.sflag [#allocation6], %s289_s30 }
  0x2e   : > { %s303_s9 = sshll.u32 %s293_s4, 4  ;;  %p5384_p10 = pneg %p5870_p9  ;;  %s304_s9 = int_to_ptr.vmem [resolvable:$true] %s303_s9 }
  0x2f   : > { %s5395_s26 = scalar_lea.vmem %s304_s9, 2560  ;;  %s5708_s2 = smov [#allocation5]  }
  0x30   : > { %p5396_p11 = scmp.ne.s32.totalorder %s304_s9, %s5395_s26  ;;  %s5400_s21 = sshll.u32 %s5708_s2, 4  ;;  %s5401_s21 = int_to_ptr.vmem [resolvable:$false] %s5400_s21 }
  0x31   : > { %s5402_s7 = scalar_lea.vmem %s5401_s21, 5120  ;;  %p5403_p0 = scmp.lt.s32.totalorder %s304_s9, %s5401_s21 }
  0x32   : > { %s3837_s11 = scalar_lea.hbm %s6953_s1, %s5874_s6  ;;  %p5398_p12 = pnand %p5396_p11, %p5384_p10 }
  0x33   : > { %s3838_s16 = scalar_lea.hbm %s3837_s11, 2560  ;;  %p5404_p2 = scmp.lt.s32.totalorder %s5402_s7, %s5395_s26 }
  0x34   : > { %p5399_p13 = pneg %p5398_p12 }
  0x35   : > { %p5405_p3 = por %p5404_p2, %p5403_p0 }
  0x37   : > { %p5406_p4 = pnand %p5405_p3, %p5399_p13 }
  0x39   : > { %5409 = shalt.err (!%p5406_p4)
}
  0x3a   : > { %s6927_s17 = smov 128   ;;  %s6929_s4 = smov 8  }
  0x3b   : > { %5247 = dma.hbm_to_vmem [thread:$0]  (!%p5870_p9), %s3838_s16, 2560, %s304_s9, %s5880_s18, %s6927_s17, %s6927_s17, %s6929_s4  }
  0x3c   : > { %s5891_s30 = sadd.s32 4294967295, %s5706_s10   ;;  %p3982_p11 = scmp.ge.s32.totalorder %s5706_s10, 1 }
  0x3d   : > { %p6931_p6 = scmp.eq.s32.totalorder %s5891_s30, 0  ;;  %p240_p12 = scmp.lt.s32.totalorder %s5706_s10, 17 }
  0x3e   : > { %s5711_s9 = smov [#allocation8]   ;;  %s6926_s20 = sadd.s32 4294967294, %s5706_s10  }
  0x3f   : > { %p5902_p13 = por %p94_p5, %p6931_p6  ;;  %p5906_p0 = pnand %p3982_p11, %p240_p12 }
  0x40   : > { %s252_s19 = sshll.u32 %s5711_s9, 4  ;;  %s253_s19 = int_to_ptr.vmem [resolvable:$true] %s252_s19 }
  0x41   : > { %p5237_p9 = pneg %p5906_p0  ;;  %s5422_s13 = scalar_lea.vmem %s253_s19, 55296 }
  0x42   : > { %p5423_p4 = scmp.ne.s32.totalorder %s253_s19, %s5422_s13  ;;  %p5430_p10 = scmp.lt.s32.totalorder %s253_s19, %s253_s19 }
  0x43   : > { %p5238_p2 = pnand %p5237_p9, %p6931_p6  ;;  %p5431_p1 = scmp.lt.s32.totalorder %s5422_s13, %s5422_s13 }
  0x45   : > { %p5413_p3 = pneg %p5238_p2  ;;  %p5432_p11 = por %p5431_p1, %p5430_p10 }
  0x47   : > { %p5425_p5 = pnand %p5423_p4, %p5413_p3 }
  0x49   : > { %p5426_p8 = pneg %p5425_p5 }
  0x4b   : > { %p5433_p12 = pnand %p5432_p11, %p5426_p8 }
  0x4d   : > { %5436 = shalt.err (!%p5433_p12)
}
  0x4e   : > { %s6956_s3 = sld [smem:[#allocation39_spill]]  ;;  %s6957_s16 = ssub.s32 %s5698_s8, %s5830_s14 }
  0x4f   : > { %s48_s2 = sor.u32 %s6957_s16, %s5850_s15  ;;  %s51_s21 = sadd.s32 1, %s5686_s29 }
  0x50   : > { %p49_p1 = scmp.eq.s32.totalorder %s48_s2, 0  ;;  %p58_p8 = scmp.ne.s32.totalorder %s5686_s29, %s5682_s28 }
  0x51   : > { %p64_p10 = scmp.ne.s32.totalorder %s5682_s28, %s5678_s27  ;;  %p177_p9 = scmp.eq.s32.totalorder %s6926_s20, 15 }
  0x52   : > { %s5933_s7 = scalar_select %p49_p1, %s5686_s29, %s51_s21  }
  0x53   : > { %p6959_p3 = scmp.eq.s32.totalorder %s5706_s10, 0  ;;  %p5939_p5 = por %p6931_p6, %p64_p10 }
  0x54   : > { %5240 = dma.hbm_to_vmem [thread:$0]  (!%p5238_p2), %s6956_s3, 55296, %s253_s19, [#allocation9], %s6927_s17, %s6927_s17, %s6929_s4  }
  0x55   : > { %6958 = sst [smem:[#allocation29_spill]] %s5933_s7  ;;  %p60_p4 = por %p6959_p3, %p58_p8 }
  0x56   : > { %p6961_p11 = scmp.eq.s32.totalorder %s5891_s30, 15  ;;  %p5949_p2 = por %p177_p9, %p64_p10 }
  0x57   : > { %s266_s13 = sand.u32 1, %s5686_s29   ;;  %s6964_s0 = sld [smem:[#allocation36_spill]] }
  0x58   : > { %p5945_p12 = por %p6961_p11, %p58_p8  ;;  %s5213_s2 = smul.u32 160, %s266_s13 }
  0x59   : > { %s6963_s15 = scalar_select %p5949_p2, 1, 0 }
  0x5a   : > { %p6965_p1 = scmp.lt.s32.totalorder %s5706_s10, 16  ;;  %s270_s20 = scalar_lea.vmem [#allocation2], %s5213_s2 }
  0x5b   : > { %s279_s17 = sshll.u32 %s270_s20, 4  ;;  %s267_s4 = scalar_lea.sflag [#allocation3], %s266_s13  ;;  %s280_s17 = int_to_ptr.vmem [resolvable:$true] %s279_s17 }
  0x5c   : > { %p5960_p3 = pnand %p6965_p1, %p60_p4  ;;  %s5450_s1 = scalar_lea.vmem %s280_s17, 2560 }
  0x5d   : > { %s278_s16 = scalar_lea.hbm %s6964_s0, %s5874_s6  ;;  %p5451_p10 = scmp.ne.s32.totalorder %s280_s17, %s5450_s1 }
  0x5e   : > { %p5439_p8 = pneg %p5960_p3  ;;  %s5712_s3 = smov [#allocation2]  }
  0x5f   : > { %s5455_s24 = sshll.u32 %s5712_s3, 4  ;;  %s5456_s24 = int_to_ptr.vmem [resolvable:$false] %s5455_s24 }
  0x60   : > { %p5453_p9 = pnand %p5451_p10, %p5439_p8  ;;  %s5457_s11 = scalar_lea.vmem %s5456_s24, 5120 }
  0x61   : > { %p5458_p6 = scmp.lt.s32.totalorder %s280_s17, %s5456_s24  ;;  %p5459_p4 = scmp.lt.s32.totalorder %s5457_s11, %s5450_s1 }
  0x62   : > { %p5454_p11 = pneg %p5453_p9 }
  0x63   : > { %p5460_p1 = por %p5459_p4, %p5458_p6 }
  0x65   : > { %p5461_p2 = pnand %p5460_p1, %p5454_p11 }
  0x67   : > { %5464 = shalt.err (!%p5461_p2)
}
  0x68   : > { %s6967_s20 = smov 8   ;;  %s6968_s2 = smov 128  }
  0x69   : > { %s6969_s13 = sld [smem:[#allocation20_spill]]  ;;  %s111_s1 = sadd.s32 1, %s5662_s23 }
  0x6a   : > { %5244 = dma.hbm_to_vmem [thread:$0]  (!%p5960_p3), %s278_s16, 2560, %s280_s17, %s267_s4, %s6968_s2, %s6968_s2, %s6967_s20  }
  0x6b   : > { %s5975_s3 = scalar_select %p5854_p7, %s5662_s23, %s111_s1  }
  0x6c   : > { %p118_p6 = scmp.ne.s32.totalorder %s5662_s23, %s5658_s22  ;;  %s315_s21 = sand.u32 1, %s5662_s23  }
  0x6d   : > { %s6970_s0 = sld [smem:[#allocation38_spill]]  ;;  %p6971_p8 = scmp.eq.s32.totalorder %s5706_s10, 0 }
  0x6e   : > { %p6972_p9 = scmp.eq.s32.totalorder %s5891_s30, 0  ;;  %s5217_s7 = smul.u32 160, %s315_s21 }
  0x6f   : > { %p124_p2 = scmp.ne.s32.totalorder %s5658_s22, %s6969_s13  ;;  %p120_p10 = por %p118_p6, %p6971_p8 }
  0x70   : > { %p6974_p3 = scmp.lt.s32.totalorder %s5706_s10, 16  ;;  %s317_s4 = scalar_lea.vmem [#allocation7], %s5217_s7 }
  0x71   : > { %p5990_p11 = por %p124_p2, %p6972_p9  ;;  %s327_s16 = sshll.u32 %s317_s4, 4  ;;  %s328_s16 = int_to_ptr.vmem [resolvable:$true] %s327_s16 }
  0x72   : > { %p5996_p4 = pnand %p6974_p3, %p120_p10 }
  0x73   : > { %s3846_s14 = scalar_lea.hbm %s6970_s0, %s5874_s6  ;;  %s5478_s0 = scalar_lea.vmem %s328_s16, 2560 }
  0x74   : > { %s3847_s17 = scalar_lea.hbm %s3846_s14, 5120  ;;  %p5467_p7 = pneg %p5996_p4 }
  0x75   : > { %p5479_p1 = scmp.ne.s32.totalorder %s328_s16, %s5478_s0  ;;  %s5713_s6 = smov [#allocation7]  }
  0x76   : > { %s5483_s13 = sshll.u32 %s5713_s6, 4  ;;  %s5484_s13 = int_to_ptr.vmem [resolvable:$false] %s5483_s13 }
  0x77   : > { %p5481_p6 = pnand %p5479_p1, %p5467_p7  ;;  %s5485_s1 = scalar_lea.vmem %s5484_s13, 5120 }
  0x78   : > { %p5486_p8 = scmp.lt.s32.totalorder %s328_s16, %s5484_s13  ;;  %p5487_p10 = scmp.lt.s32.totalorder %s5485_s1, %s5478_s0 }
  0x79   : > { %p5482_p2 = pneg %p5481_p6 }
  0x7a   : > { %p5488_p9 = por %p5487_p10, %p5486_p8 }
  0x7c   : > { %p5489_p3 = pnand %p5488_p9, %p5482_p2 }
  0x7e   : > { %5492 = shalt.err (!%p5489_p3)
}
  0x7f   : > { %5250 = dma.hbm_to_vmem [thread:$0]  (!%p5996_p4), %s3847_s17, 2560, %s328_s16, %s5880_s18, %s6968_s2, %s6968_s2, %s6967_s20  }
  0x80   : > { %339 = sbr.rel (%p5906_p0) target bundleno = 830 (0x33e), region = 36 }
  0x85   : > { %s6011_s14 = sand.u32 1, %s5682_s28  }
  0x86   : > { %s5218_s7 = smul.u32 160, %s6011_s14  ;;  %s342_s21 = scalar_lea.sflag [#allocation3], %s6011_s14 }
  0x88   : > { %s6015_s24 = scalar_lea.vmem [#allocation2], %s5218_s7 }
  0x89   : > { %5629 = dma.done.wait (%p5939_p5), %s342_s21, 2560  }
  0x8a   : > { %5631 = vsyncadd (%p5939_p5), %s342_s21, 4294964736  ;;  %s350_s18 = sand.u32 1, %s5891_s30   ;;  %s352_s12 = sand.u32 1, %s5670_s25  }
  0x8b   : > { %s5219_s20 = smul.u32 160, %s352_s12  ;;  %s351_s2 = scalar_lea.sflag [#allocation6], %s350_s18 }
  0x8d   : > { %s6025_s11 = scalar_lea.vmem [#allocation5], %s5219_s20 }
  0x8e   : > { %5633 = dma.done.wait (%p5902_p13), %s351_s2, 2560  }
  0x8f   : > { %5635 = vsyncadd (%p5902_p13), %s351_s2, 4294964736  ;;  %s361_s9 = sand.u32 1, %s5658_s22  }
  0x90   : > { %s5220_s5 = smul.u32 160, %s361_s9 }
  0x92   : > { %s6032_s17 = scalar_lea.vmem [#allocation7], %s5220_s5 }
  0x93   : > { %5637 = dma.done.wait (%p5990_p11), %s351_s2, 2560  }
  0x94   : > { %5639 = vsyncadd (%p5990_p11), %s351_s2, 4294964736  ;;  %p6976_p0 = scmp.eq.s32.totalorder %s5891_s30, 0 }
  0x96   : > { %5641 = dma.done.wait (%p6976_p0), [#allocation9], 55296   ;;  %p6977_p5 = pmov %p6976_p0 }
  0x97   : > { %v691_v0 = vld [vmem:[#allocation8 + $0x278] sm:$0xff]  ;;  %v690_v2 = vld [vmem:[#allocation8 + $0x270] sm:$0xff]  ;;  %v689_v5 = vld [vmem:[#allocation8 + $0x268] sm:$0xff]  ;;  %vm448_vm0 = vcmask 1046528   ;;  %vm481_vm1 = vcmask 1045504   ;;  %s3990_s8 = sshll.u32 %s6011_s14, 6 }
  0x98   : > { %5643 = vsyncadd (%p6977_p5), [#allocation9], 4294912000  ;;  %v675_v1 = vld [vmem:[#allocation8 + $0x1f8] sm:$0xff]  ;;  %4097 = vmatprep.subr.mxu0 %v691_v0  ;;  %v674_v4 = vld [vmem:[#allocation8 + $0x1f0] sm:$0xff]  ;;  %s6715_s26 = scalar_lea.vmem [#allocation10], %s3990_s8  ;;  %s6984_s4 = sld [smem:[#allocation22_spill]] }
  0x99   : > { %v707_v3 = vld [vmem:[#allocation8 + $0x2f8] sm:$0xff]  ;;  %4098 = vmatpush3.msra.mxu0 %v675_v1  ;;  %v706_v6 = vld [vmem:[#allocation8 + $0x2f0] sm:$0xff]  ;;  %v673_v7 = vld [vmem:[#allocation8 + $0x1e8] sm:$0xff]  ;;  %s6985_s16 = sld [smem:[#allocation23_spill]]  ;;  %s3742_s1 = sshll.u32 %s6715_s26, 4  ;;  %s6755_s1 = int_to_ptr.vmem [resolvable:$true] %s3742_s1 }
  0x9a   : > { %4817 = vmatprep.subr.mxu1 %v707_v3  ;;  %4099 = vmatprep.subr.mxu0 %v690_v2  ;;  %v705_v8 = vld [vmem:[#allocation8 + $0x2e8] sm:$0xff]  ;;  %v688_v9 = vld [vmem:[#allocation8 + $0x260] sm:$0xff]  ;;  %v687_v12 = vld [vmem:[#allocation8 + $0x258] sm:$0xff]  ;;  %s6992_s12 = sld [smem:[#allocation40_spill]]  ;;  %s3719_s2 = scalar_lea.sflag [#allocation4], %s6011_s14 }
  0x9b   : > { %4818 = vmatpush3.msra.mxu1 %v707_v3  ;;  %4100 = vmatpush3.msra.mxu0 %v674_v4  ;;  %v672_v10 = vld [vmem:[#allocation8 + $0x1e0] sm:$0xff]  ;;  %v671_v13 = vld [vmem:[#allocation8 + $0x1d8] sm:$0xff]  ;;  %v686_v15 = vld [vmem:[#allocation8 + $0x250] sm:$0xff]  ;;  %s5714_s9 = smov [#allocation10]  }
  0x9c   : > { %4819 = vmatprep.subr.mxu1 %v706_v6  ;;  %4101 = vmatprep.subr.mxu0 %v689_v5  ;;  %v704_v11 = vld [vmem:[#allocation8 + $0x2e0] sm:$0xff]  ;;  %v703_v14 = vld [vmem:[#allocation8 + $0x2d8] sm:$0xff]  ;;  %v670_v16 = vld [vmem:[#allocation8 + $0x1d0] sm:$0xff]  ;;  %s5498_s5 = sshll.u32 %s5714_s9, 4  ;;  %s5499_s5 = int_to_ptr.vmem [resolvable:$false] %s5498_s5 }
  0x9d   : > { %4820 = vmatpush3.msra.mxu1 %v706_v6  ;;  %4102 = vmatpush3.msra.mxu0 %v673_v7  ;;  %v702_v17 = vld [vmem:[#allocation8 + $0x2d0] sm:$0xff]  ;;  %v685_v18 = vld [vmem:[#allocation8 + $0x248] sm:$0xff]  ;;  %v684_v21 = vld [vmem:[#allocation8 + $0x240] sm:$0xff]  ;;  %p5501_p7 = scmp.lt.s32.totalorder %s6755_s1, %s5499_s5 }
  0x9e   : > { %4821 = vmatprep.subr.mxu1 %v705_v8  ;;  %4103 = vmatprep.subr.mxu0 %v688_v9  ;;  %v669_v19 = vld [vmem:[#allocation8 + $0x1c8] sm:$0xff]  ;;  %v668_v22 = vld [vmem:[#allocation8 + $0x1c0] sm:$0xff]  ;;  %v683_v24 = vld [vmem:[#allocation8 + $0x238] sm:$0xff]  ;;  %s4088_s0 = sshll.u32 %s6984_s4, 3 }
  0x9f   : > { %4822 = vmatpush3.msra.mxu1 %v705_v8  ;;  %4104 = vmatpush3.msra.mxu0 %v672_v10  ;;  %v701_v20 = vld [vmem:[#allocation8 + $0x2c8] sm:$0xff]  ;;  %v700_v23 = vld [vmem:[#allocation8 + $0x2c0] sm:$0xff]  ;;  %v667_v25 = vld [vmem:[#allocation8 + $0x1b8] sm:$0xff]  ;;  %s4089_s6 = sshll.u32 %s6985_s16, 6 }
  0xa0   : > { %4823 = vmatprep.subr.mxu1 %v704_v11  ;;  %4105 = vmatprep.subr.mxu0 %v687_v12  ;;  %v699_v26 = vld [vmem:[#allocation8 + $0x2b8] sm:$0xff]  ;;  %v682_v27 = vld [vmem:[#allocation8 + $0x230] sm:$0xff]  ;;  %v681_v30 = vld [vmem:[#allocation8 + $0x228] sm:$0xff]  ;;  %s3739_s13 = sadd.s32 %s4089_s6, %s4088_s0 }
  0xa1   : > { %4824 = vmatpush3.msra.mxu1 %v704_v11  ;;  %4106 = vmatpush3.msra.mxu0 %v671_v13  ;;  %v666_v28 = vld [vmem:[#allocation8 + $0x1b0] sm:$0xff]  ;;  %v665_v31 = vld [vmem:[#allocation8 + $0x1a8] sm:$0xff]  ;;  %v680_v33 = vld [vmem:[#allocation8 + $0x220] sm:$0xff]  ;;  %s4090_s7 = sshll.u32 %s3739_s13, 7 }
  0xa2   : > { %4825 = vmatprep.subr.mxu1 %v703_v14  ;;  %4107 = vmatprep.subr.mxu0 %v686_v15  ;;  %v698_v29 = vld [vmem:[#allocation8 + $0x2b0] sm:$0xff]  ;;  %v697_v32 = vld [vmem:[#allocation8 + $0x2a8] sm:$0xff]  ;;  %v664_v34 = vld [vmem:[#allocation8 + $0x1a0] sm:$0xff]  ;;  %s6761_s20 = scalar_lea.hbm %s6992_s12, %s4090_s7 }
  0xa3   : > { %4826 = vmatpush3.msra.mxu1 %v703_v14  ;;  %4108 = vmatpush3.msra.mxu0 %v670_v16  ;;  %v696_v35 = vld [vmem:[#allocation8 + $0x2a0] sm:$0xff]  ;;  %v6043_v36 = vld [vmem:[%s6015_s24 + $0x10] sm:$0xff]  ;;  %v3992_v37 = vld [vmem:[%s6015_s24 + $0x18] sm:$0xff] }
  0xa4   : > { %4827 = vmatprep.subr.mxu1 %v702_v17  ;;  %4109 = vmatprep.subr.mxu0 %v685_v18  ;;  %v679_v38 = vld [vmem:[#allocation8 + $0x218] sm:$0xff]  ;;  %v678_v41 = vld [vmem:[#allocation8 + $0x210] sm:$0xff]  ;;  %v595_v42 = vrot.slane %v6043_v36, 1  ;;  %v596_v43 = vrot.slane %v3992_v37, 1  ;;  %v677_v46 = vld [vmem:[#allocation8 + $0x208] sm:$0xff]  ;;  %v627_v53 = vrot.slane %v6043_v36, 2 }
  0xa5   : > { %4828 = vmatpush3.msra.mxu1 %v702_v17  ;;  %4110 = vmatpush3.msra.mxu0 %v669_v19  ;;  %v663_v39 = vld [vmem:[#allocation8 + $0x198] sm:$0xff]  ;;  %v662_v44 = vld [vmem:[#allocation8 + $0x190] sm:$0xff]  ;;  %v6048_v47 = vld [vmem:[%s6015_s24 + $0x20] sm:$0xff]  ;;  %v628_v54 = vrot.slane %v3992_v37, 2 }
  0xa6   : > { %4829 = vmatprep.subr.mxu1 %v701_v20  ;;  %4111 = vmatprep.subr.mxu0 %v684_v21  ;;  %v695_v40 = vld [vmem:[#allocation8 + $0x298] sm:$0xff]  ;;  %v694_v45 = vld [vmem:[#allocation8 + $0x290] sm:$0xff]  ;;  %v3994_v48 = vld [vmem:[%s6015_s24 + $0x28] sm:$0xff]  ;;  %v6052_v52 = vsel %vm448_vm0, %v595_v42, %v596_v43  ;;  %v630_v56 = vrot.slane %v6048_v47, 2  ;;  %v598_v59 = vrot.slane %v6048_v47, 1 }
  0xa7   : > { %4830 = vmatpush3.msra.mxu1 %v701_v20  ;;  %4112 = vmatpush3.msra.mxu0 %v668_v22  ;;  %v661_v49 = vld [vmem:[#allocation8 + $0x188] sm:$0xff]  ;;  %v676_v51 = vld [vmem:[#allocation8 + $0x200] sm:$0xff]  ;;  %v631_v57 = vrot.slane %v3994_v48, 2  ;;  %v599_v60 = vrot.slane %v3994_v48, 1  ;;  %v545_v61 = vld [vmem:[#allocation8 + $0xf8] sm:$0xff]  ;;  %v6059_v62 = vsel %vm481_vm1, %v627_v53, %v628_v54 }
  0xa8   : > { %4831 = vmatprep.subr.mxu1 %v700_v23  ;;  %4113 = vmatprep.subr.mxu0 %v683_v24  ;;  %v693_v50 = vld [vmem:[#allocation8 + $0x288] sm:$0xff]  ;;  %v660_v55 = vld [vmem:[#allocation8 + $0x180] sm:$0xff]  ;;  %v529_v63 = vld [vmem:[#allocation8 + $0x78] sm:$0xff] }
  0xa9   : > { %4832 = vmatpush3.msra.mxu1 %v700_v23  ;;  %4114 = vmatpush3.msra.mxu0 %v667_v25  ;;  %v692_v58 = vld [vmem:[#allocation8 + $0x280] sm:$0xff]  ;;  %v6062_v0 = vld [vmem:[%s6015_s24 + $0x30] sm:$0xff]  ;;  %v3996_v1 = vld [vmem:[%s6015_s24 + $0x38] sm:$0xff]  ;;  %v6067_v2 = vsel %vm481_vm1, %v630_v56, %v631_v57  ;;  %v6070_v5 = vsel %vm448_vm0, %v598_v59, %v599_v60 }
  0xaa   : > { %4833 = vmatprep.subr.mxu1 %v699_v26  ;;  %4115 = vmatprep.subr.mxu0 %v682_v27  ;;  %v544_v3 = vld [vmem:[#allocation8 + $0xf0] sm:$0xff]  ;;  %v561_v4 = vld [vmem:[#allocation8 + $0x178] sm:$0xff]  ;;  %v601_v7 = vrot.slane %v6062_v0, 1  ;;  %v602_v8 = vrot.slane %v3996_v1, 1  ;;  %v543_v9 = vld [vmem:[#allocation8 + $0xe8] sm:$0xff]  ;;  %v633_v15 = vrot.slane %v6062_v0, 2 }
  0xab   : > { %4834 = vmatpush3.msra.mxu1 %v699_v26  ;;  %4116 = vmatpush3.msra.mxu0 %v666_v28  ;;  %v528_v6 = vld [vmem:[#allocation8 + $0x70] sm:$0xff]  ;;  %v527_v11 = vld [vmem:[#allocation8 + $0x68] sm:$0xff]  ;;  %v6077_v12 = vld [vmem:[%s6015_s24 + $0x40] sm:$0xff]  ;;  %v634_v16 = vrot.slane %v3996_v1, 2 }
  0xac   : > { %4835 = vmatprep.subr.mxu1 %v698_v29  ;;  %4117 = vmatprep.subr.mxu0 %v681_v30  ;;  %v560_v10 = vld [vmem:[#allocation8 + $0x170] sm:$0xff]  ;;  %v3998_v13 = vld [vmem:[%s6015_s24 + $0x48] sm:$0xff]  ;;  %v542_v14 = vld [vmem:[#allocation8 + $0xe0] sm:$0xff]  ;;  %v6083_v18 = vsel %vm448_vm0, %v601_v7, %v602_v8  ;;  %v636_v20 = vrot.slane %v6077_v12, 2  ;;  %v604_v23 = vrot.slane %v6077_v12, 1 }
  0xad   : > { %4836 = vmatpush3.msra.mxu1 %v698_v29  ;;  %4118 = vmatpush3.msra.mxu0 %v665_v31  ;;  %v559_v17 = vld [vmem:[#allocation8 + $0x168] sm:$0xff]  ;;  %v526_v19 = vld [vmem:[#allocation8 + $0x60] sm:$0xff]  ;;  %v637_v21 = vrot.slane %v3998_v13, 2  ;;  %v541_v22 = vld [vmem:[#allocation8 + $0xd8] sm:$0xff]  ;;  %v605_v24 = vrot.slane %v3998_v13, 1  ;;  %v6089_v26 = vsel %vm481_vm1, %v633_v15, %v634_v16 }
  0xae   : > { %4837 = vmatprep.subr.mxu1 %v697_v32  ;;  %4119 = vmatprep.subr.mxu0 %v680_v33  ;;  %v558_v25 = vld [vmem:[#allocation8 + $0x160] sm:$0xff]  ;;  %v525_v27 = vld [vmem:[#allocation8 + $0x58] sm:$0xff]  ;;  %v6092_v28 = vld [vmem:[%s6015_s24 + $0x50] sm:$0xff] }
  0xaf   : > { %4838 = vmatpush3.msra.mxu1 %v697_v32  ;;  %4120 = vmatpush3.msra.mxu0 %v664_v34  ;;  %v4000_v29 = vld [vmem:[%s6015_s24 + $0x58] sm:$0xff]  ;;  %v6097_v30 = vsel %vm481_vm1, %v636_v20, %v637_v21  ;;  %v540_v31 = vld [vmem:[#allocation8 + $0xd0] sm:$0xff]  ;;  %v6101_v33 = vsel %vm448_vm0, %v604_v23, %v605_v24  ;;  %v4002_v42 = vld [vmem:[%s6015_s24 + $0x68] sm:$0xff] }
  0xb0   : > { %4839 = vmatprep.subr.mxu1 %v696_v35  ;;  %4121 = vmatprep.subr.mxu0 %v679_v38  ;;  %v557_v32 = vld [vmem:[#allocation8 + $0x158] sm:$0xff]  ;;  %v524_v34 = vld [vmem:[#allocation8 + $0x50] sm:$0xff]  ;;  %v608_v37 = vrot.slane %v4000_v29, 1  ;;  %v539_v38 = vld [vmem:[#allocation8 + $0xc8] sm:$0xff] }
  0xb1   : > { %4840 = vmatpush3.msra.mxu1 %v696_v35  ;;  %4122 = vmatpush3.msra.mxu0 %v663_v39  ;;  %v607_v35 = vrot.slane %v6092_v28, 1  ;;  %v556_v39 = vld [vmem:[#allocation8 + $0x150] sm:$0xff]  ;;  %v538_v43 = vld [vmem:[#allocation8 + $0xc0] sm:$0xff]  ;;  %v537_v53 = vld [vmem:[#allocation8 + $0xb8] sm:$0xff] }
  0xb2   : > { %4841 = vmatprep.subr.mxu1 %v695_v40  ;;  %4123 = vmatprep.subr.mxu0 %v678_v41  ;;  %v6107_v41 = vld [vmem:[%s6015_s24 + $0x60] sm:$0xff]  ;;  %v6122_v59 = vld [vmem:[%s6015_s24 + $0x70] sm:$0xff]  ;;  %v4004_v60 = vld [vmem:[%s6015_s24 + $0x78] sm:$0xff] }
  0xb3   : > { %4842 = vmatpush3.msra.mxu1 %v695_v40  ;;  %4124 = vmatpush3.msra.mxu0 %v662_v44  ;;  %v523_v40 = vld [vmem:[#allocation8 + $0x48] sm:$0xff]  ;;  %v639_v44 = vrot.slane %v6092_v28, 2  ;;  %v6113_v48 = vsel %vm448_vm0, %v607_v35, %v608_v37  ;;  %v610_v54 = vrot.slane %v6107_v41, 1  ;;  %v554_v56 = vld [vmem:[#allocation8 + $0x140] sm:$0xff]  ;;  %v553_v1 = vld [vmem:[#allocation8 + $0x138] sm:$0xff]  ;;  %v614_v7 = vrot.slane %v4004_v60, 1 }
  0xb4   : > { %4843 = vmatprep.subr.mxu1 %v694_v45  ;;  %4125 = vmatprep.subr.mxu0 %v677_v46  ;;  %v555_v46 = vld [vmem:[#allocation8 + $0x148] sm:$0xff]  ;;  %v645_v15 = vrot.slane %v6122_v59, 2  ;;  %v646_v16 = vrot.slane %v4004_v60, 2  ;;  %v518_v20 = vld [vmem:[#allocation8 + $0x20] sm:$0xff]  ;;  %v533_v23 = vld [vmem:[#allocation8 + $0x98] sm:$0xff] }
  0xb5   : > { %4844 = vmatpush3.msra.mxu1 %v694_v45  ;;  %4126 = vmatpush3.msra.mxu0 %v661_v49  ;;  %v640_v45 = vrot.slane %v4000_v29, 2  ;;  %v522_v49 = vld [vmem:[#allocation8 + $0x40] sm:$0xff]  ;;  %v535_v8 = vld [vmem:[#allocation8 + $0xa8] sm:$0xff]  ;;  %v1241_v60 = vld [vmem:[#allocation8 + $0x378] sm:$0xff] }
  0xb6   : > { %4845 = vmatprep.subr.mxu1 %v693_v50  ;;  %4127 = vmatprep.subr.mxu0 %v676_v51  ;;  %v643_v51 = vrot.slane %v4002_v42, 2  ;;  %v4006_v13 = vld [vmem:[%s6015_s24 + $0x88] sm:$0xff]  ;;  %v6149_v29 = vsel %vm481_vm1, %v645_v15, %v646_v16  ;;  %v416_v35 = vld [vmem:[%s6015_s24] sm:$0xff]  ;;  %v1253_v15 = vld [vmem:[#allocation8 + $0x3d8] sm:$0xff] }
  0xb7   : > { %772 = vmatprep.mubr.f32.mxu0 %v6052_v52  ;;  %4128 = vmatpush3.msra.mxu0 %v660_v55  ;;  %v611_v55 = vrot.slane %v4002_v42, 1  ;;  %v6119_v57 = vsel %vm481_vm1, %v639_v44, %v640_v45  ;;  %v417_v37 = vld [vmem:[%s6015_s24 + $0x8] sm:$0xff]  ;;  %v548_v45 = vld [vmem:[#allocation8 + $0x110] sm:$0xff] }
  0xb8   : > { %4846 = vmatpush3.msra.mxu1 %v693_v50  ;;  %773 = vmatmul.mubr.f32.vlgmr.msra.gmra.mxu0 %v6043_v36  ;;  %v642_v50 = vrot.slane %v6107_v41, 2  ;;  %v531_v42 = vld [vmem:[#allocation8 + $0x88] sm:$0xff]  ;;  %v450_v44 = vrot.slane %v417_v37, 1  ;;  %v1252_v16 = vld [vmem:[#allocation8 + $0x3d0] sm:$0xff] }
  0xb9   : > { %4847 = vmatprep.subr.mxu1 %v692_v58  ;;  %4177 = vmatprep.subr.mxu0 %v545_v61 }
  0xba   : > { %4848 = vmatpush3.msra.mxu1 %v692_v58  ;;  %4849 = vmatprep.mubr.f32.mxu1 %v6059_v62  ;;  %v521_v58 = vld [vmem:[#allocation8 + $0x38] sm:$0xff]  ;;  %v6127_v61 = vsel %vm481_vm1, %v642_v50, %v643_v51  ;;  %v547_v50 = vld [vmem:[#allocation8 + $0x108] sm:$0xff]  ;;  %v514_v51 = vld [vmem:[#allocation8] sm:$0xff] }
  0xbb   : > { %4178 = vmatpush3.msra.mxu0 %v529_v63  ;;  %4850 = vmatmul.mubr.f32.vlgmr.msra.gmra.mxu1 %v6067_v2  ;;  %v536_v63 = vld [vmem:[#allocation8 + $0xb0] sm:$0xff] }
  0xbc   : > { %4179 = vmatprep.subr.mxu0 %v544_v3  ;;  %4861 = vmatprep.subr.mxu1 %v561_v4  ;;  %v6131_v3 = vsel %vm448_vm0, %v610_v54, %v611_v55  ;;  %v483_v54 = vrot.slane %v417_v37, 2  ;;  %v1265_v37 = vld [vmem:[#allocation8 + $0x438] sm:$0xff] }
  0xbd   : > { %777 = vmatprep.mubr.f32.mxu0 %v6070_v5  ;;  %4180 = vmatpush3.msra.mxu0 %v528_v6  ;;  %v613_v6 = vrot.slane %v6122_v59, 1 }
  0xbe   : > { %4862 = vmatpush3.msra.mxu1 %v561_v4  ;;  %778 = vmatmul.mubr.f32.gmra.mxu0 %v6048_v47  ;;  %v520_v4 = vld [vmem:[#allocation8 + $0x30] sm:$0xff] }
  0xbf   : > { %4181 = vmatprep.subr.mxu0 %v543_v9  ;;  %4863 = vmatprep.subr.mxu1 %v560_v10  ;;  %v552_v9 = vld [vmem:[#allocation8 + $0x130] sm:$0xff] }
  0xc0   : > { %4182 = vmatpush3.msra.mxu0 %v527_v11  ;;  %4864 = vmatpush3.msra.mxu1 %v560_v10  ;;  %v519_v10 = vld [vmem:[#allocation8 + $0x28] sm:$0xff]  ;;  %v6137_v11 = vld [vmem:[%s6015_s24 + $0x80] sm:$0xff] }
  0xc1   : > { %4183 = vmatprep.subr.mxu0 %v542_v14  ;;  %4865 = vmatprep.subr.mxu1 %v559_v17  ;;  %v534_v14 = vld [vmem:[#allocation8 + $0xa0] sm:$0xff]  ;;  %v648_v21 = vrot.slane %v6137_v11, 2  ;;  %v616_v24 = vrot.slane %v6137_v11, 1 }
  0xc2   : > { %782 = vmatprep.mubr.f32.mxu0 %v6083_v18  ;;  %4184 = vmatpush3.msra.mxu0 %v526_v19  ;;  %v6143_v19 = vsel %vm448_vm0, %v613_v6, %v614_v7  ;;  %v1240_v6 = vld [vmem:[#allocation8 + $0x370] sm:$0xff]  ;;  %v1255_v7 = vld [vmem:[#allocation8 + $0x3e8] sm:$0xff] }
  0xc3   : > { %4866 = vmatpush3.msra.mxu1 %v559_v17  ;;  %783 = vmatmul.mubr.f32.gmra.mxu0 %v6062_v0  ;;  %v551_v17 = vld [vmem:[#allocation8 + $0x128] sm:$0xff] }
  0xc4   : > { %4185 = vmatprep.subr.mxu0 %v541_v22  ;;  %4867 = vmatprep.subr.mxu1 %v558_v25  ;;  %v649_v22 = vrot.slane %v4006_v13, 2 }
  0xc5   : > { %4852 = vmatprep.mubr.f32.mxu1 %v6089_v26  ;;  %4186 = vmatpush3.msra.mxu0 %v525_v27  ;;  %v550_v27 = vld [vmem:[#allocation8 + $0x120] sm:$0xff] }
  0xc6   : > { %4868 = vmatpush3.msra.mxu1 %v558_v25  ;;  %4187 = vmatprep.subr.mxu0 %v540_v31  ;;  %v617_v25 = vrot.slane %v4006_v13, 1  ;;  %v517_v31 = vld [vmem:[#allocation8 + $0x18] sm:$0xff]  ;;  %v1271_v13 = vld [vmem:[#allocation8 + $0x468] sm:$0xff] }
  0xc7   : > { %4853 = vmatmul.mubr.f32.gmra.mxu1 %v6097_v30  ;;  %4869 = vmatprep.subr.mxu1 %v557_v32 }
  0xc8   : > { %787 = vmatprep.mubr.f32.mxu0 %v6101_v33  ;;  %4188 = vmatpush3.msra.mxu0 %v524_v34  ;;  %v532_v34 = vld [vmem:[#allocation8 + $0x90] sm:$0xff] }
  0xc9   : > { %4870 = vmatpush3.msra.mxu1 %v557_v32  ;;  %788 = vmatmul.mubr.f32.gmra.mxu0 %v6077_v12  ;;  %v6153_v32 = vsel %vm481_vm1, %v648_v21, %v649_v22  ;;  %v1268_v21 = vld [vmem:[#allocation8 + $0x450] sm:$0xff]  ;;  %v1235_v22 = vld [vmem:[#allocation8 + $0x348] sm:$0xff] }
  0xca   : > { %4189 = vmatprep.subr.mxu0 %v539_v38  ;;  %4871 = vmatprep.subr.mxu1 %v556_v39  ;;  %v549_v38 = vld [vmem:[#allocation8 + $0x118] sm:$0xff] }
  0xcb   : > { %4190 = vmatpush3.msra.mxu0 %v523_v40  ;;  %4872 = vmatpush3.msra.mxu1 %v556_v39  ;;  %v6159_v39 = vsel %vm448_vm0, %v616_v24, %v617_v25  ;;  %v516_v40 = vld [vmem:[#allocation8 + $0x10] sm:$0xff]  ;;  %v1267_v24 = vld [vmem:[#allocation8 + $0x448] sm:$0xff]  ;;  %v1234_v25 = vld [vmem:[#allocation8 + $0x340] sm:$0xff] }
  0xcc   : > { %4191 = vmatprep.subr.mxu0 %v538_v43  ;;  %4873 = vmatprep.subr.mxu1 %v555_v46  ;;  %v449_v43 = vrot.slane %v416_v35, 1 }
  0xcd   : > { %792 = vmatprep.mubr.f32.mxu0 %v6113_v48  ;;  %4192 = vmatpush3.msra.mxu0 %v522_v49  ;;  %v530_v49 = vld [vmem:[#allocation8 + $0x80] sm:$0xff] }
  0xce   : > { %4874 = vmatpush3.msra.mxu1 %v555_v46  ;;  %793 = vmatmul.mubr.f32.gmra.mxu0 %v6092_v28  ;;  %v515_v46 = vld [vmem:[#allocation8 + $0x8] sm:$0xff]  ;;  %v451_v55 = vsel %vm448_vm0, %v449_v43, %v450_v44  ;;  %v1246_v44 = vld [vmem:[#allocation8 + $0x3a0] sm:$0xff] }
  0xcf   : > { %4193 = vmatprep.subr.mxu0 %v537_v53  ;;  %4875 = vmatprep.subr.mxu1 %v554_v56  ;;  %v482_v53 = vrot.slane %v416_v35, 2  ;;  %v1231_v43 = vld [vmem:[#allocation8 + $0x328] sm:$0xff] }
  0xd0   : > { %4855 = vmatprep.mubr.f32.mxu1 %v6119_v57  ;;  %4194 = vmatpush3.msra.mxu0 %v521_v58  ;;  %v1257_v58 = vld [vmem:[#allocation8 + $0x3f8] sm:$0xff] }
  0xd1   : > { %4876 = vmatpush3.msra.mxu1 %v554_v56  ;;  %4195 = vmatprep.subr.mxu0 %v536_v63  ;;  %v546_v56 = vld [vmem:[#allocation8 + $0x100] sm:$0xff]  ;;  %v484_v63 = vsel %vm481_vm1, %v482_v53, %v483_v54  ;;  %v1244_v53 = vld [vmem:[#allocation8 + $0x390] sm:$0xff]  ;;  %v1261_v54 = vld [vmem:[#allocation8 + $0x418] sm:$0xff] }
  0xd2   : > { %4856 = vmatmul.mubr.f32.gmra.mxu1 %v6127_v61  ;;  %4877 = vmatprep.subr.mxu1 %v553_v1 }
  0xd3   : > { %797 = vmatprep.mubr.f32.mxu0 %v6131_v3  ;;  %4196 = vmatpush3.msra.mxu0 %v520_v4  ;;  %v1273_v4 = vld [vmem:[#allocation8 + $0x478] sm:$0xff] }
  0xd4   : > { %4878 = vmatpush3.msra.mxu1 %v553_v1  ;;  %798 = vmatmul.mubr.f32.gmra.mxu0 %v6107_v41  ;;  %v1256_v1 = vld [vmem:[#allocation8 + $0x3f0] sm:$0xff] }
  0xd5   : > { %4197 = vmatprep.subr.mxu0 %v535_v8  ;;  %4879 = vmatprep.subr.mxu1 %v552_v9  ;;  %v1272_v8 = vld [vmem:[#allocation8 + $0x470] sm:$0xff] }
  0xd6   : > { %4198 = vmatpush3.msra.mxu0 %v519_v10  ;;  %4880 = vmatpush3.msra.mxu1 %v552_v9  ;;  %v1239_v9 = vld [vmem:[#allocation8 + $0x368] sm:$0xff]  ;;  %v1254_v10 = vld [vmem:[#allocation8 + $0x3e0] sm:$0xff] }
  0xd7   : > { %4199 = vmatprep.subr.mxu0 %v534_v14  ;;  %4881 = vmatprep.subr.mxu1 %v551_v17  ;;  %v1238_v14 = vld [vmem:[#allocation8 + $0x360] sm:$0xff] }
  0xd8   : > { %802 = vmatprep.mubr.f32.mxu0 %v6143_v19  ;;  %4200 = vmatpush3.msra.mxu0 %v518_v20  ;;  %v1251_v20 = vld [vmem:[#allocation8 + $0x3c8] sm:$0xff] }
  0xd9   : > { %4882 = vmatpush3.msra.mxu1 %v551_v17  ;;  %803 = vmatmul.mubr.f32.gmra.mxu0 %v6122_v59  ;;  %v1236_v17 = vld [vmem:[#allocation8 + $0x350] sm:$0xff] }
  0xda   : > { %4201 = vmatprep.subr.mxu0 %v533_v23  ;;  %4883 = vmatprep.subr.mxu1 %v550_v27  ;;  %v1250_v23 = vld [vmem:[#allocation8 + $0x3c0] sm:$0xff] }
  0xdb   : > { %4858 = vmatprep.mubr.f32.mxu1 %v6149_v29  ;;  %4202 = vmatpush3.msra.mxu0 %v517_v31  ;;  %v1266_v31 = vld [vmem:[#allocation8 + $0x440] sm:$0xff] }
  0xdc   : > { %4884 = vmatpush3.msra.mxu1 %v550_v27  ;;  %4203 = vmatprep.subr.mxu0 %v532_v34  ;;  %v1249_v27 = vld [vmem:[#allocation8 + $0x3b8] sm:$0xff] }
  0xdd   : > { %4859 = vmatmul.mubr.f32.gmra.mxu1 %v6153_v32  ;;  %4885 = vmatprep.subr.mxu1 %v549_v38  ;;  %v1233_v34 = vld [vmem:[#allocation8 + $0x338] sm:$0xff] }
  0xde   : > { %807 = vmatprep.mubr.f32.mxu0 %v6159_v39  ;;  %4204 = vmatpush3.msra.mxu0 %v516_v40  ;;  %v1247_v40 = vld [vmem:[#allocation8 + $0x3a8] sm:$0xff] }
  0xdf   : > { %4886 = vmatpush3.msra.mxu1 %v549_v38  ;;  %808 = vmatmul.mubr.f32.gmra.mxu0 %v6137_v11  ;;  %v1232_v38 = vld [vmem:[#allocation8 + $0x330] sm:$0xff] }
  0xe0   : > { %4205 = vmatprep.subr.mxu0 %v531_v42  ;;  %4887 = vmatprep.subr.mxu1 %v548_v45  ;;  %v1264_v42 = vld [vmem:[#allocation8 + $0x430] sm:$0xff] }
  0xe1   : > { %4206 = vmatpush3.msra.mxu0 %v515_v46  ;;  %4888 = vmatpush3.msra.mxu1 %v548_v45  ;;  %v1263_v45 = vld [vmem:[#allocation8 + $0x428] sm:$0xff]  ;;  %v1230_v46 = vld [vmem:[#allocation8 + $0x320] sm:$0xff] }
  0xe2   : > { %4207 = vmatprep.subr.mxu0 %v530_v49  ;;  %4889 = vmatprep.subr.mxu1 %v547_v50  ;;  %v1245_v49 = vld [vmem:[#allocation8 + $0x398] sm:$0xff] }
  0xe3   : > { %4208 = vmatpush3.msra.mxu0 %v514_v51  ;;  %982 = vmatprep.mubr.f32.mxu0 %v451_v55  ;;  %v1229_v51 = vld [vmem:[#allocation8 + $0x318] sm:$0xff]  ;;  %v1228_v55 = vld [vmem:[#allocation8 + $0x310] sm:$0xff] }
  0xe4   : > { %4890 = vmatpush3.msra.mxu1 %v547_v50  ;;  %983 = vmatmul.mubr.f32.vlgmr.msra.gmra.mxu0 %v416_v35  ;;  %v1248_v35 = vld [vmem:[#allocation8 + $0x3b0] sm:$0xff]  ;;  %v1262_v50 = vld [vmem:[#allocation8 + $0x420] sm:$0xff] }
  0xe5   : > { %4891 = vmatprep.subr.mxu1 %v546_v56  ;;  %4257 = vmatprep.subr.mxu0 %v1257_v58  ;;  %v1260_v58 = vld [vmem:[#allocation8 + $0x410] sm:$0xff] }
  0xe6   : > { %4892 = vmatpush3.msra.mxu1 %v546_v56  ;;  %4258 = vmatpush3.msra.mxu0 %v1241_v60  ;;  %v1243_v56 = vld [vmem:[#allocation8 + $0x388] sm:$0xff] }
  0xe7   : > { %4893 = vmatprep.mubr.f32.mxu1 %v484_v63  ;;  %4259 = vmatprep.subr.mxu0 %v1256_v1  ;;  %v1227_v60 = vld [vmem:[#allocation8 + $0x308] sm:$0xff]  ;;  %v1242_v63 = vld [vmem:[#allocation8 + $0x380] sm:$0xff] }
  0xe8   : > { %4905 = vmatprep.subr.mxu1 %v1273_v4  ;;  %987 = vmatprep.mubr.f32.mxu0 %v6052_v52  ;;  %v1270_v52 = vld [vmem:[#allocation8 + $0x460] sm:$0xff]  ;;  %v1259_v1 = vld [vmem:[#allocation8 + $0x408] sm:$0xff] }
  0xe9   : > { %4894 = vmatmul.mubr.f32.vlgmr.msra.gmra.mxu1 %v6059_v62  ;;  %4260 = vmatpush3.msra.mxu0 %v1240_v6  ;;  %v1237_v62 = vld [vmem:[#allocation8 + $0x358] sm:$0xff]  ;;  %v1258_v6 = vld [vmem:[#allocation8 + $0x400] sm:$0xff] }
  0xea   : > { %4906 = vmatpush3.msra.mxu1 %v1273_v4  ;;  %988 = vmatmul.mubr.f32.gmra.mxu0 %v6043_v36  ;;  %v1269_v36 = vld [vmem:[#allocation8 + $0x458] sm:$0xff]  ;;  %v1226_v4 = vld [vmem:[#allocation8 + $0x300] sm:$0xff] }
  0xeb   : > { %4261 = vmatprep.subr.mxu0 %v1255_v7  ;;  %4907 = vmatprep.subr.mxu1 %v1272_v8  ;;  %v1620_v7 = vld [vmem:[#allocation8 + $0x578] sm:$0xff] }
  0xec   : > { %4262 = vmatpush3.msra.mxu0 %v1239_v9  ;;  %4908 = vmatpush3.msra.mxu1 %v1272_v8  ;;  %v1604_v8 = vld [vmem:[#allocation8 + $0x4f8] sm:$0xff]  ;;  %v1619_v9 = vld [vmem:[#allocation8 + $0x570] sm:$0xff] }
  0xed   : > { %4263 = vmatprep.subr.mxu0 %v1254_v10  ;;  %4909 = vmatprep.subr.mxu1 %v1271_v13  ;;  %v1636_v10 = vld [vmem:[#allocation8 + $0x5f8] sm:$0xff] }
  0xee   : > { %992 = vmatprep.mubr.f32.mxu0 %v6070_v5  ;;  %4264 = vmatpush3.msra.mxu0 %v1238_v14  ;;  %v1618_v14 = vld [vmem:[#allocation8 + $0x568] sm:$0xff] }
  0xef   : > { %4910 = vmatpush3.msra.mxu1 %v1271_v13  ;;  %993 = vmatmul.mubr.f32.gmra.mxu0 %v6048_v47  ;;  %v1603_v13 = vld [vmem:[#allocation8 + $0x4f0] sm:$0xff] }
  0xf0   : > { %4265 = vmatprep.subr.mxu0 %v1253_v15  ;;  %4911 = vmatprep.subr.mxu1 %v1270_v52  ;;  %v1602_v15 = vld [vmem:[#allocation8 + $0x4e8] sm:$0xff] }
  0xf1   : > { %4266 = vmatpush3.msra.mxu0 %v1237_v62  ;;  %4912 = vmatpush3.msra.mxu1 %v1270_v52  ;;  %v1634_v52 = vld [vmem:[#allocation8 + $0x5e8] sm:$0xff]  ;;  %v1633_v62 = vld [vmem:[#allocation8 + $0x5e0] sm:$0xff] }
  0xf2   : > { %4267 = vmatprep.subr.mxu0 %v1252_v16  ;;  %4913 = vmatprep.subr.mxu1 %v1269_v36  ;;  %v1615_v16 = vld [vmem:[#allocation8 + $0x550] sm:$0xff] }
  0xf3   : > { %997 = vmatprep.mubr.f32.mxu0 %v6083_v18  ;;  %4896 = vmatprep.mubr.f32.mxu1 %v6067_v2 }
  0xf4   : > { %4268 = vmatpush3.msra.mxu0 %v1236_v17  ;;  %4914 = vmatpush3.msra.mxu1 %v1269_v36  ;;  %v1599_v36 = vld [vmem:[#allocation8 + $0x4d0] sm:$0xff]  ;;  %v1614_v17 = vld [vmem:[#allocation8 + $0x548] sm:$0xff] }
  0xf5   : > { %998 = vmatmul.mubr.f32.gmra.mxu0 %v6062_v0  ;;  %4897 = vmatmul.mubr.f32.gmra.mxu1 %v6089_v26 }
  0xf6   : > { %4269 = vmatprep.subr.mxu0 %v1251_v20  ;;  %4915 = vmatprep.subr.mxu1 %v1268_v21  ;;  %v1598_v20 = vld [vmem:[#allocation8 + $0x4c8] sm:$0xff] }
  0xf7   : > { %4270 = vmatpush3.msra.mxu0 %v1235_v22  ;;  %4916 = vmatpush3.msra.mxu1 %v1268_v21  ;;  %v1597_v21 = vld [vmem:[#allocation8 + $0x4c0] sm:$0xff] }
  0xf8   : > { %4271 = vmatprep.subr.mxu0 %v1250_v23  ;;  %4917 = vmatprep.subr.mxu1 %v1267_v24  ;;  %v1629_v22 = vld [vmem:[#allocation8 + $0x5c0] sm:$0xff]  ;;  %v1628_v23 = vld [vmem:[#allocation8 + $0x5b8] sm:$0xff] }
  0xf9   : > { %1002 = vmatprep.mubr.f32.mxu0 %v6101_v33  ;;  %4272 = vmatpush3.msra.mxu0 %v1234_v25  ;;  %v1627_v25 = vld [vmem:[#allocation8 + $0x5b0] sm:$0xff] }
  0xfa   : > { %4918 = vmatpush3.msra.mxu1 %v1267_v24  ;;  %1003 = vmatmul.mubr.f32.gmra.mxu0 %v6077_v12  ;;  %v1595_v24 = vld [vmem:[#allocation8 + $0x4b0] sm:$0xff] }
  0xfb   : > { %4273 = vmatprep.subr.mxu0 %v1249_v27  ;;  %4919 = vmatprep.subr.mxu1 %v1266_v31  ;;  %v4021_v27 = vld [vmem:[%s6015_s24 + $0x90] sm:$0xff] }
  0xfc   : > { %4274 = vmatpush3.msra.mxu0 %v1233_v34  ;;  %4920 = vmatpush3.msra.mxu1 %v1266_v31  ;;  %v4022_v31 = vld [vmem:[%s6015_s24 + $0x98] sm:$0xff]  ;;  %v1609_v34 = vld [vmem:[#allocation8 + $0x520] sm:$0xff] }
  0xfd   : > { %4275 = vmatprep.subr.mxu0 %v1248_v35  ;;  %4921 = vmatprep.subr.mxu1 %v1265_v37  ;;  %v1593_v35 = vld [vmem:[#allocation8 + $0x4a0] sm:$0xff] }
  0xfe   : > { %1007 = vmatprep.mubr.f32.mxu0 %v6113_v48  ;;  %4899 = vmatprep.mubr.f32.mxu1 %v6097_v30 }
  0xff   : > { %4276 = vmatpush3.msra.mxu0 %v1232_v38  ;;  %4922 = vmatpush3.msra.mxu1 %v1265_v37  ;;  %v1215_v37 = vrot.slane %v4022_v31, 2  ;;  %v1182_v38 = vrot.slane %v4021_v27, 1 }
 0x100   : > { %1008 = vmatmul.mubr.f32.gmra.mxu0 %v6092_v28  ;;  %4900 = vmatmul.mubr.f32.gmra.mxu1 %v6119_v57 }
 0x101   : > { %4277 = vmatprep.subr.mxu0 %v1247_v40  ;;  %4923 = vmatprep.subr.mxu1 %v1264_v42  ;;  %v1183_v40 = vrot.slane %v4022_v31, 1  ;;  %v1997_v31 = vld [vmem:[#allocation8 + $0x760] sm:$0xff] }
 0x102   : > { %4278 = vmatpush3.msra.mxu0 %v1231_v43  ;;  %4924 = vmatpush3.msra.mxu1 %v1264_v42  ;;  %v1625_v42 = vld [vmem:[#allocation8 + $0x5a0] sm:$0xff] }
 0x103   : > { %4279 = vmatprep.subr.mxu0 %v1246_v44  ;;  %4925 = vmatprep.subr.mxu1 %v1263_v45  ;;  %v1607_v44 = vld [vmem:[#allocation8 + $0x510] sm:$0xff] }
 0x104   : > { %1012 = vmatprep.mubr.f32.mxu0 %v6131_v3  ;;  %4280 = vmatpush3.msra.mxu0 %v1230_v46  ;;  %v1493_v46 = vld [vmem:[%s6025_s11 + $0x8] sm:$0xff] }
 0x105   : > { %4926 = vmatpush3.msra.mxu1 %v1263_v45  ;;  %1013 = vmatmul.mubr.f32.gmra.mxu0 %v6107_v41  ;;  %v1492_v45 = vld [vmem:[%s6025_s11] sm:$0xff] }
 0x106   : > { %4281 = vmatprep.subr.mxu0 %v1245_v49  ;;  %4927 = vmatprep.subr.mxu1 %v1262_v50  ;;  %v1624_v49 = vld [vmem:[#allocation8 + $0x598] sm:$0xff] }
 0x107   : > { %4282 = vmatpush3.msra.mxu0 %v1229_v51  ;;  %4928 = vmatpush3.msra.mxu1 %v1262_v50  ;;  %v1591_v50 = vld [vmem:[#allocation8 + $0x490] sm:$0xff] }
 0x108   : > { %4283 = vmatprep.subr.mxu0 %v1244_v53  ;;  %4929 = vmatprep.subr.mxu1 %v1261_v54  ;;  %v1623_v51 = vld [vmem:[#allocation8 + $0x590] sm:$0xff]  ;;  %v1524_v53 = vrot.slane %v1492_v45, 1 }
 0x109   : > { %1017 = vmatprep.mubr.f32.mxu0 %v6143_v19  ;;  %4902 = vmatprep.mubr.f32.mxu1 %v6127_v61 }
 0x10a   : > { %4284 = vmatpush3.msra.mxu0 %v1228_v55  ;;  %4930 = vmatpush3.msra.mxu1 %v1261_v54  ;;  %v1525_v54 = vrot.slane %v1493_v46, 1  ;;  %v1590_v55 = vld [vmem:[#allocation8 + $0x488] sm:$0xff] }
 0x10b   : > { %1018 = vmatmul.mubr.f32.gmra.mxu0 %v6122_v59  ;;  %4903 = vmatmul.mubr.f32.gmra.mxu1 %v6149_v29 }
 0x10c   : > { %4285 = vmatprep.subr.mxu0 %v1243_v56  ;;  %4931 = vmatprep.subr.mxu1 %v1260_v58  ;;  %v6215_v56 = vld [vmem:[%s6025_s11 + $0x10] sm:$0xff] }
 0x10d   : > { %4286 = vmatpush3.msra.mxu0 %v1227_v60  ;;  %4932 = vmatpush3.msra.mxu1 %v1260_v58  ;;  %v1495_v58 = vld [vmem:[%s6025_s11 + $0x18] sm:$0xff]  ;;  %v1622_v60 = vld [vmem:[#allocation8 + $0x588] sm:$0xff] }
 0x10e   : > { %4287 = vmatprep.subr.mxu0 %v1242_v63  ;;  %4933 = vmatprep.subr.mxu1 %v1259_v1  ;;  %v1589_v63 = vld [vmem:[#allocation8 + $0x480] sm:$0xff] }
 0x10f   : > { %4288 = vmatpush3.msra.mxu0 %v1226_v4  ;;  %1338 = vmatprep.mubr.f32.mxu0 %v6070_v5  ;;  %v1635_v5 = vld [vmem:[#allocation8 + $0x5f0] sm:$0xff]  ;;  %v1557_v4 = vrot.slane %v1493_v46, 2  ;;  %v1962_v46 = vld [vmem:[#allocation8 + $0x648] sm:$0xff] }
 0x110   : > { %4934 = vmatpush3.msra.mxu1 %v1259_v1  ;;  %1339 = vmatmul.mubr.f32.vlgmr.msra.gmra.mxu0 %v6048_v47  ;;  %v1617_v47 = vld [vmem:[#allocation8 + $0x560] sm:$0xff]  ;;  %v1556_v1 = vrot.slane %v1492_v45, 2 }
 0x111   : > { %4935 = vmatprep.subr.mxu1 %v1258_v6  ;;  %4337 = vmatprep.subr.mxu0 %v1620_v7  ;;  %v1559_v7 = vrot.slane %v6215_v56, 2 }
 0x112   : > { %4936 = vmatpush3.msra.mxu1 %v1258_v6  ;;  %4937 = vmatprep.mubr.f32.mxu1 %v6067_v2  ;;  %v1601_v2 = vld [vmem:[#allocation8 + $0x4e0] sm:$0xff]  ;;  %v1526_v6 = vsel %vm448_vm0, %v1524_v53, %v1525_v54  ;;  %v1994_v53 = vld [vmem:[#allocation8 + $0x748] sm:$0xff] }
 0x113   : > { %4338 = vmatpush3.msra.mxu0 %v1604_v8  ;;  %4938 = vmatmul.mubr.f32.vlgmr.msra.gmra.mxu1 %v6089_v26  ;;  %v1616_v26 = vld [vmem:[#allocation8 + $0x558] sm:$0xff]  ;;  %v1560_v8 = vrot.slane %v1495_v58, 2 }
 0x114   : > { %4339 = vmatprep.subr.mxu0 %v1619_v9  ;;  %4949 = vmatprep.subr.mxu1 %v1636_v10  ;;  %v1621_v9 = vld [vmem:[#allocation8 + $0x580] sm:$0xff] }
 0x115   : > { %1343 = vmatprep.mubr.f32.mxu0 %v6083_v18  ;;  %4340 = vmatpush3.msra.mxu0 %v1603_v13  ;;  %v1600_v18 = vld [vmem:[#allocation8 + $0x4d8] sm:$0xff]  ;;  %v1528_v13 = vrot.slane %v1495_v58, 1 }
 0x116   : > { %4950 = vmatpush3.msra.mxu1 %v1636_v10  ;;  %1344 = vmatmul.mubr.f32.gmra.mxu0 %v6062_v0  ;;  %v1632_v0 = vld [vmem:[#allocation8 + $0x5d8] sm:$0xff]  ;;  %v1527_v10 = vrot.slane %v6215_v56, 1 }
 0x117   : > { %4341 = vmatprep.subr.mxu0 %v1618_v14  ;;  %4951 = vmatprep.subr.mxu1 %v1635_v5  ;;  %v1984_v14 = vld [vmem:[#allocation8 + $0x6f8] sm:$0xff] }
 0x118   : > { %4342 = vmatpush3.msra.mxu0 %v1602_v15  ;;  %4952 = vmatpush3.msra.mxu1 %v1635_v5  ;;  %v1558_v5 = vsel %vm481_vm1, %v1556_v1, %v1557_v4  ;;  %v1968_v15 = vld [vmem:[#allocation8 + $0x678] sm:$0xff]  ;;  %v1993_v4 = vld [vmem:[#allocation8 + $0x740] sm:$0xff] }
 0x119   : > { %4343 = vmatprep.subr.mxu0 %v1617_v47  ;;  %4953 = vmatprep.subr.mxu1 %v1634_v52  ;;  %v6223_v47 = vld [vmem:[%s6025_s11 + $0x20] sm:$0xff] }
 0x11a   : > { %1348 = vmatprep.mubr.f32.mxu0 %v6101_v33  ;;  %4344 = vmatpush3.msra.mxu0 %v1601_v2  ;;  %v1631_v33 = vld [vmem:[#allocation8 + $0x5d0] sm:$0xff]  ;;  %v6227_v2 = vsel %vm481_vm1, %v1559_v7, %v1560_v8  ;;  %v1960_v7 = vld [vmem:[#allocation8 + $0x638] sm:$0xff]  ;;  %v6281_v8 = vld [vmem:[%s6025_s11 + $0x60] sm:$0xff] }
 0x11b   : > { %4954 = vmatpush3.msra.mxu1 %v1634_v52  ;;  %1349 = vmatmul.mubr.f32.gmra.mxu0 %v6077_v12  ;;  %v1613_v12 = vld [vmem:[#allocation8 + $0x540] sm:$0xff]  ;;  %v1497_v52 = vld [vmem:[%s6025_s11 + $0x28] sm:$0xff] }
 0x11c   : > { %4345 = vmatprep.subr.mxu0 %v1616_v26  ;;  %4955 = vmatprep.subr.mxu1 %v1633_v62  ;;  %v1983_v26 = vld [vmem:[#allocation8 + $0x6f0] sm:$0xff] }
 0x11d   : > { %4940 = vmatprep.mubr.f32.mxu1 %v6097_v30  ;;  %4346 = vmatpush3.msra.mxu0 %v1600_v18  ;;  %v1630_v30 = vld [vmem:[#allocation8 + $0x5c8] sm:$0xff]  ;;  %v6230_v18 = vsel %vm448_vm0, %v1527_v10, %v1528_v13  ;;  %v1975_v13 = vld [vmem:[#allocation8 + $0x6b0] sm:$0xff] }
 0x11e   : > { %4956 = vmatpush3.msra.mxu1 %v1633_v62  ;;  %4347 = vmatprep.subr.mxu0 %v1615_v16  ;;  %v2000_v62 = vld [vmem:[#allocation8 + $0x778] sm:$0xff]  ;;  %v1967_v16 = vld [vmem:[#allocation8 + $0x670] sm:$0xff] }
 0x11f   : > { %4941 = vmatmul.mubr.f32.gmra.mxu1 %v6119_v57  ;;  %4957 = vmatprep.subr.mxu1 %v1632_v0  ;;  %v1612_v57 = vld [vmem:[#allocation8 + $0x538] sm:$0xff] }
 0x120   : > { %1353 = vmatprep.mubr.f32.mxu0 %v6113_v48  ;;  %4348 = vmatpush3.msra.mxu0 %v1599_v36  ;;  %v1596_v48 = vld [vmem:[#allocation8 + $0x4b8] sm:$0xff]  ;;  %v1531_v36 = vrot.slane %v1497_v52, 1 }
 0x121   : > { %4958 = vmatpush3.msra.mxu1 %v1632_v0  ;;  %1354 = vmatmul.mubr.f32.gmra.mxu0 %v6092_v28  ;;  %v1611_v28 = vld [vmem:[#allocation8 + $0x530] sm:$0xff]  ;;  %v1530_v0 = vrot.slane %v6223_v47, 1 }
 0x122   : > { %4349 = vmatprep.subr.mxu0 %v1614_v17  ;;  %4959 = vmatprep.subr.mxu1 %v1631_v33  ;;  %v1982_v17 = vld [vmem:[#allocation8 + $0x6e8] sm:$0xff] }
 0x123   : > { %4350 = vmatpush3.msra.mxu0 %v1598_v20  ;;  %4960 = vmatpush3.msra.mxu1 %v1631_v33  ;;  %v1999_v33 = vld [vmem:[#allocation8 + $0x770] sm:$0xff]  ;;  %v1966_v20 = vld [vmem:[#allocation8 + $0x668] sm:$0xff] }
 0x124   : > { %4351 = vmatprep.subr.mxu0 %v1613_v12  ;;  %4961 = vmatprep.subr.mxu1 %v1630_v30  ;;  %v6236_v12 = vld [vmem:[%s6025_s11 + $0x30] sm:$0xff] }
 0x125   : > { %1358 = vmatprep.mubr.f32.mxu0 %v6131_v3  ;;  %4352 = vmatpush3.msra.mxu0 %v1597_v21  ;;  %v1610_v3 = vld [vmem:[#allocation8 + $0x528] sm:$0xff]  ;;  %v1981_v21 = vld [vmem:[#allocation8 + $0x6e0] sm:$0xff] }
 0x126   : > { %4962 = vmatpush3.msra.mxu1 %v1630_v30  ;;  %1359 = vmatmul.mubr.f32.gmra.mxu0 %v6107_v41  ;;  %v1594_v41 = vld [vmem:[#allocation8 + $0x4a8] sm:$0xff]  ;;  %v1499_v30 = vld [vmem:[%s6025_s11 + $0x38] sm:$0xff] }
 0x127   : > { %4353 = vmatprep.subr.mxu0 %v1612_v57  ;;  %4963 = vmatprep.subr.mxu1 %v1629_v22  ;;  %v1562_v57 = vrot.slane %v6223_v47, 2 }
 0x128   : > { %4943 = vmatprep.mubr.f32.mxu1 %v6127_v61  ;;  %4354 = vmatpush3.msra.mxu0 %v1596_v48  ;;  %v1626_v61 = vld [vmem:[#allocation8 + $0x5a8] sm:$0xff] }
 0x129   : > { %4964 = vmatpush3.msra.mxu1 %v1629_v22  ;;  %4355 = vmatprep.subr.mxu0 %v1611_v28  ;;  %v1563_v22 = vrot.slane %v1497_v52, 2  ;;  %v1998_v48 = vld [vmem:[#allocation8 + $0x768] sm:$0xff]  ;;  %v6242_v28 = vsel %vm448_vm0, %v1530_v0, %v1531_v36  ;;  %v1542_v52 = vrot.slane %v6281_v8, 1  ;;  %v6296_v36 = vld [vmem:[%s6025_s11 + $0x70] sm:$0xff] }
 0x12a   : > { %4944 = vmatmul.mubr.f32.gmra.mxu1 %v6149_v29  ;;  %4965 = vmatprep.subr.mxu1 %v1628_v23  ;;  %v1214_v29 = vrot.slane %v4021_v27, 2  ;;  %v1958_v0 = vld [vmem:[#allocation8 + $0x628] sm:$0xff] }
 0x12b   : > { %1363 = vmatprep.mubr.f32.mxu0 %v6143_v19  ;;  %4356 = vmatpush3.msra.mxu0 %v1595_v24  ;;  %v1608_v19 = vld [vmem:[#allocation8 + $0x518] sm:$0xff]  ;;  %v1565_v24 = vrot.slane %v6236_v12, 2 }
 0x12c   : > { %4966 = vmatpush3.msra.mxu1 %v1628_v23  ;;  %1364 = vmatmul.mubr.f32.gmra.mxu0 %v6122_v59  ;;  %v1592_v59 = vld [vmem:[#allocation8 + $0x498] sm:$0xff]  ;;  %v1216_v43 = vsel %vm481_vm1, %v1214_v29, %v1215_v37  ;;  %v1965_v23 = vld [vmem:[#allocation8 + $0x660] sm:$0xff]  ;;  %v1501_v29 = vld [vmem:[%s6025_s11 + $0x48] sm:$0xff] }
 0x12d   : > { %4357 = vmatprep.subr.mxu0 %v1610_v3  ;;  %4967 = vmatprep.subr.mxu1 %v1627_v25  ;;  %v1566_v3 = vrot.slane %v1499_v30, 2 }
 0x12e   : > { %4358 = vmatpush3.msra.mxu0 %v1594_v41  ;;  %4968 = vmatpush3.msra.mxu1 %v1627_v25  ;;  %v1980_v25 = vld [vmem:[#allocation8 + $0x6d8] sm:$0xff]  ;;  %v1533_v41 = vrot.slane %v6236_v12, 1 }
 0x12f   : > { %4359 = vmatprep.subr.mxu0 %v1609_v34  ;;  %4969 = vmatprep.subr.mxu1 %v1626_v61  ;;  %v6248_v34 = vsel %vm481_vm1, %v1562_v57, %v1563_v22  ;;  %v6256_v37 = vsel %vm481_vm1, %v1565_v24, %v1566_v3  ;;  %v1957_v22 = vld [vmem:[#allocation8 + $0x620] sm:$0xff]  ;;  %v1972_v24 = vld [vmem:[#allocation8 + $0x698] sm:$0xff]  ;;  %v1545_v3 = vrot.slane %v6296_v36, 1 }
 0x130   : > { %1368 = vmatprep.mubr.f32.mxu0 %v6159_v39  ;;  %4360 = vmatpush3.msra.mxu0 %v1593_v35  ;;  %v1184_v39 = vsel %vm448_vm0, %v1182_v38, %v1183_v40  ;;  %v6251_v35 = vld [vmem:[%s6025_s11 + $0x40] sm:$0xff]  ;;  %v1996_v38 = vld [vmem:[#allocation8 + $0x758] sm:$0xff] }
 0x131   : > { %4970 = vmatpush3.msra.mxu1 %v1626_v61  ;;  %1369 = vmatmul.mubr.f32.gmra.mxu0 %v6137_v11  ;;  %v1606_v11 = vld [vmem:[#allocation8 + $0x508] sm:$0xff]  ;;  %v1964_v61 = vld [vmem:[#allocation8 + $0x658] sm:$0xff] }
 0x132   : > { %4361 = vmatprep.subr.mxu0 %v1608_v19  ;;  %4971 = vmatprep.subr.mxu1 %v1625_v42  ;;  %v1979_v19 = vld [vmem:[#allocation8 + $0x6d0] sm:$0xff] }
 0x133   : > { %4946 = vmatprep.mubr.f32.mxu1 %v6153_v32  ;;  %4362 = vmatpush3.msra.mxu0 %v1592_v59  ;;  %v1605_v32 = vld [vmem:[#allocation8 + $0x500] sm:$0xff]  ;;  %v1536_v59 = vrot.slane %v6251_v35, 1 }
 0x134   : > { %4972 = vmatpush3.msra.mxu1 %v1625_v42  ;;  %4363 = vmatprep.subr.mxu0 %v1607_v44  ;;  %v1963_v42 = vld [vmem:[#allocation8 + $0x650] sm:$0xff]  ;;  %v1978_v44 = vld [vmem:[#allocation8 + $0x6c8] sm:$0xff] }
 0x135   : > { %4947 = vmatmul.mubr.f32.gmra.mxu1 %v1216_v43  ;;  %4973 = vmatprep.subr.mxu1 %v1624_v49  ;;  %v1537_v43 = vrot.slane %v1501_v29, 1 }
 0x136   : > { %1373 = vmatprep.mubr.f32.mxu0 %v1184_v39  ;;  %4364 = vmatpush3.msra.mxu0 %v1591_v50  ;;  %v1503_v39 = vld [vmem:[%s6025_s11 + $0x58] sm:$0xff]  ;;  %v1977_v50 = vld [vmem:[#allocation8 + $0x6c0] sm:$0xff] }
 0x137   : > { %4974 = vmatpush3.msra.mxu1 %v1624_v49  ;;  %1374 = vmatmul.mubr.f32.gmra.mxu0 %v4021_v27  ;;  %v1534_v27 = vrot.slane %v1499_v30, 1  ;;  %v6266_v49 = vld [vmem:[%s6025_s11 + $0x50] sm:$0xff]  ;;  %v6272_v54 = vsel %vm448_vm0, %v1536_v59, %v1537_v43  ;;  %v1540_v1 = vrot.slane %v1503_v39, 1  ;;  %v1970_v59 = vld [vmem:[#allocation8 + $0x688] sm:$0xff] }
 0x138   : > { %4365 = vmatprep.subr.mxu0 %v1606_v11  ;;  %4975 = vmatprep.subr.mxu1 %v1623_v51  ;;  %v1568_v11 = vrot.slane %v6251_v35, 2  ;;  %v1571_v58 = vrot.slane %v6266_v49, 2  ;;  %v1987_v43 = vld [vmem:[#allocation8 + $0x710] sm:$0xff] }
 0x139   : > { %4366 = vmatpush3.msra.mxu0 %v1590_v55  ;;  %4976 = vmatpush3.msra.mxu1 %v1623_v51  ;;  %v6260_v40 = vsel %vm448_vm0, %v1533_v41, %v1534_v27  ;;  %v1569_v51 = vrot.slane %v1501_v29, 2  ;;  %v1961_v55 = vld [vmem:[#allocation8 + $0x640] sm:$0xff]  ;;  %v1971_v29 = vld [vmem:[#allocation8 + $0x690] sm:$0xff] }
 0x13a   : > { %4367 = vmatprep.subr.mxu0 %v1605_v32  ;;  %4977 = vmatprep.subr.mxu1 %v1622_v60  ;;  %v1572_v32 = vrot.slane %v1503_v39, 2  ;;  %v1989_v41 = vld [vmem:[#allocation8 + $0x720] sm:$0xff] }
 0x13b   : > { %4368 = vmatpush3.msra.mxu0 %v1589_v63  ;;  %1701 = vmatprep.mubr.f32.mxu0 %v1526_v6  ;;  %v1539_v63 = vrot.slane %v6266_v49, 1  ;;  %v6278_v6 = vsel %vm481_vm1, %v1568_v11, %v1569_v51  ;;  %v1953_v39 = vld [vmem:[#allocation8 + $0x600] sm:$0xff]  ;;  %v2348_v11 = vld [vmem:[#allocation8 + $0x878] sm:$0xff] }
 0x13c   : > { %4978 = vmatpush3.msra.mxu1 %v1622_v60  ;;  %1702 = vmatmul.mubr.f32.vlgmr.msra.gmra.mxu0 %v1492_v45  ;;  %v1995_v45 = vld [vmem:[#allocation8 + $0x750] sm:$0xff]  ;;  %v1976_v60 = vld [vmem:[#allocation8 + $0x6b8] sm:$0xff]  ;;  %v6286_v10 = vsel %vm481_vm1, %v1571_v58, %v1572_v32  ;;  %v2346_v32 = vld [vmem:[#allocation8 + $0x868] sm:$0xff] }
 0x13d   : > { %4979 = vmatprep.subr.mxu1 %v1621_v9  ;;  %4417 = vmatprep.subr.mxu0 %v1984_v14  ;;  %v1992_v14 = vld [vmem:[#allocation8 + $0x738] sm:$0xff]  ;;  %v2331_v58 = vld [vmem:[#allocation8 + $0x7f0] sm:$0xff] }
 0x13e   : > { %4980 = vmatpush3.msra.mxu1 %v1621_v9  ;;  %4981 = vmatprep.mubr.f32.mxu1 %v1558_v5  ;;  %v1505_v9 = vld [vmem:[%s6025_s11 + $0x68] sm:$0xff]  ;;  %v6290_v5 = vsel %vm448_vm0, %v1539_v63, %v1540_v1  ;;  %v2332_v51 = vld [vmem:[#allocation8 + $0x7f8] sm:$0xff] }
 0x13f   : > { %4418 = vmatpush3.msra.mxu0 %v1968_v15  ;;  %4982 = vmatmul.mubr.f32.vlgmr.msra.gmra.mxu1 %v6227_v2  ;;  %v1959_v15 = vld [vmem:[#allocation8 + $0x630] sm:$0xff]  ;;  %v1575_v30 = vrot.slane %v1505_v9, 2  ;;  %v2362_v63 = vld [vmem:[#allocation8 + $0x8e8] sm:$0xff]  ;;  %v2344_v1 = vld [vmem:[#allocation8 + $0x858] sm:$0xff] }
 0x140   : > { %4419 = vmatprep.subr.mxu0 %v1983_v26  ;;  %4993 = vmatprep.subr.mxu1 %v2000_v62  ;;  %v1543_v26 = vrot.slane %v1505_v9, 1  ;;  %v2343_v9 = vld [vmem:[#allocation8 + $0x850] sm:$0xff] }
 0x141   : > { %1706 = vmatprep.mubr.f32.mxu0 %v6230_v18  ;;  %4420 = vmatpush3.msra.mxu0 %v1967_v16  ;;  %v1991_v16 = vld [vmem:[#allocation8 + $0x730] sm:$0xff] }
 0x142   : > { %4994 = vmatpush3.msra.mxu1 %v2000_v62  ;;  %1707 = vmatmul.mubr.f32.gmra.mxu0 %v6215_v56  ;;  %v1974_v62 = vld [vmem:[#allocation8 + $0x6a8] sm:$0xff]  ;;  %v6302_v57 = vsel %vm448_vm0, %v1542_v52, %v1543_v26  ;;  %v2359_v52 = vld [vmem:[#allocation8 + $0x8d0] sm:$0xff] }
 0x143   : > { %4421 = vmatprep.subr.mxu0 %v1982_v17  ;;  %4995 = vmatprep.subr.mxu1 %v1999_v33  ;;  %v1507_v17 = vld [vmem:[%s6025_s11 + $0x78] sm:$0xff]  ;;  %v2326_v26 = vld [vmem:[#allocation8 + $0x7c8] sm:$0xff] }
 0x144   : > { %4422 = vmatpush3.msra.mxu0 %v1966_v20  ;;  %4996 = vmatpush3.msra.mxu1 %v1999_v33  ;;  %v1973_v33 = vld [vmem:[#allocation8 + $0x6a0] sm:$0xff]  ;;  %v1574_v20 = vrot.slane %v6281_v8, 2 }
 0x145   : > { %4423 = vmatprep.subr.mxu0 %v1981_v21  ;;  %4997 = vmatprep.subr.mxu1 %v1998_v48  ;;  %v1990_v21 = vld [vmem:[#allocation8 + $0x728] sm:$0xff] }
 0x146   : > { %1711 = vmatprep.mubr.f32.mxu0 %v6242_v28  ;;  %4424 = vmatpush3.msra.mxu0 %v1965_v23  ;;  %v1578_v23 = vrot.slane %v1507_v17, 2  ;;  %v6308_v27 = vsel %vm481_vm1, %v1574_v20, %v1575_v30  ;;  %v2340_v20 = vld [vmem:[#allocation8 + $0x838] sm:$0xff] }
 0x147   : > { %4998 = vmatpush3.msra.mxu1 %v1998_v48  ;;  %1712 = vmatmul.mubr.f32.gmra.mxu0 %v6223_v47  ;;  %v1577_v48 = vrot.slane %v6296_v36, 2 }
 0x148   : > { %4425 = vmatprep.subr.mxu0 %v1980_v25  ;;  %4999 = vmatprep.subr.mxu1 %v1997_v31  ;;  %v1546_v25 = vrot.slane %v1507_v17, 1  ;;  %v2325_v17 = vld [vmem:[#allocation8 + $0x7c0] sm:$0xff] }
 0x149   : > { %4984 = vmatprep.mubr.f32.mxu1 %v6248_v34  ;;  %4426 = vmatpush3.msra.mxu0 %v1964_v61  ;;  %v6312_v61 = vsel %vm481_vm1, %v1577_v48, %v1578_v23  ;;  %v2324_v48 = vld [vmem:[#allocation8 + $0x7b8] sm:$0xff] }
 0x14a   : > { %5000 = vmatpush3.msra.mxu1 %v1997_v31  ;;  %4427 = vmatprep.subr.mxu0 %v1979_v19  ;;  %v1956_v31 = vld [vmem:[#allocation8 + $0x618] sm:$0xff] }
 0x14b   : > { %4985 = vmatmul.mubr.f32.gmra.mxu1 %v6256_v37  ;;  %5001 = vmatprep.subr.mxu1 %v1996_v38  ;;  %v1988_v19 = vld [vmem:[#allocation8 + $0x718] sm:$0xff] }
 0x14c   : > { %1716 = vmatprep.mubr.f32.mxu0 %v6260_v40  ;;  %4428 = vmatpush3.msra.mxu0 %v1963_v42  ;;  %v1955_v42 = vld [vmem:[#allocation8 + $0x610] sm:$0xff] }
 0x14d   : > { %5002 = vmatpush3.msra.mxu1 %v1996_v38  ;;  %1717 = vmatmul.mubr.f32.gmra.mxu0 %v6236_v12  ;;  %v6316_v38 = vsel %vm448_vm0, %v1545_v3, %v1546_v25 }
 0x14e   : > { %4429 = vmatprep.subr.mxu0 %v1978_v44  ;;  %5003 = vmatprep.subr.mxu1 %v1995_v45  ;;  %v1954_v44 = vld [vmem:[#allocation8 + $0x608] sm:$0xff] }
 0x14f   : > { %4430 = vmatpush3.msra.mxu0 %v1962_v46  ;;  %5004 = vmatpush3.msra.mxu1 %v1995_v45  ;;  %v1969_v45 = vld [vmem:[#allocation8 + $0x680] sm:$0xff]  ;;  %v1986_v46 = vld [vmem:[#allocation8 + $0x708] sm:$0xff] }
 0x150   : > { %4431 = vmatprep.subr.mxu0 %v1977_v50  ;;  %5005 = vmatprep.subr.mxu1 %v1994_v53  ;;  %v1985_v50 = vld [vmem:[#allocation8 + $0x700] sm:$0xff] }
 0x151   : > { %1721 = vmatprep.mubr.f32.mxu0 %v6272_v54  ;;  %4432 = vmatpush3.msra.mxu0 %v1961_v55  ;;  %v2364_v55 = vld [vmem:[#allocation8 + $0x8f8] sm:$0xff] }
 0x152   : > { %5006 = vmatpush3.msra.mxu1 %v1994_v53  ;;  %1722 = vmatmul.mubr.f32.gmra.mxu0 %v6251_v35  ;;  %v2347_v53 = vld [vmem:[#allocation8 + $0x870] sm:$0xff] }
 0x153   : > { %4433 = vmatprep.subr.mxu0 %v1976_v60  ;;  %5007 = vmatprep.subr.mxu1 %v1993_v4  ;;  %v2330_v60 = vld [vmem:[#allocation8 + $0x7e8] sm:$0xff] }
 0x154   : > { %4987 = vmatprep.mubr.f32.mxu1 %v6278_v6  ;;  %4434 = vmatpush3.msra.mxu0 %v1960_v7  ;;  %v2328_v7 = vld [vmem:[#allocation8 + $0x7d8] sm:$0xff] }
 0x155   : > { %5008 = vmatpush3.msra.mxu1 %v1993_v4  ;;  %4435 = vmatprep.subr.mxu0 %v1975_v13  ;;  %v2361_v4 = vld [vmem:[#allocation8 + $0x8e0] sm:$0xff]  ;;  %v2360_v13 = vld [vmem:[#allocation8 + $0x8d8] sm:$0xff] }
 0x156   : > { %4988 = vmatmul.mubr.f32.gmra.mxu1 %v6286_v10  ;;  %5009 = vmatprep.subr.mxu1 %v1992_v14 }
 0x157   : > { %1726 = vmatprep.mubr.f32.mxu0 %v6290_v5  ;;  %4436 = vmatpush3.msra.mxu0 %v1959_v15  ;;  %v2342_v15 = vld [vmem:[#allocation8 + $0x848] sm:$0xff] }
 0x158   : > { %5010 = vmatpush3.msra.mxu1 %v1992_v14  ;;  %1727 = vmatmul.mubr.f32.gmra.mxu0 %v6266_v49  ;;  %v2327_v14 = vld [vmem:[#allocation8 + $0x7d0] sm:$0xff] }
 0x159   : > { %4437 = vmatprep.subr.mxu0 %v1974_v62  ;;  %5011 = vmatprep.subr.mxu1 %v1991_v16  ;;  %v2341_v62 = vld [vmem:[#allocation8 + $0x840] sm:$0xff] }
 0x15a   : > { %4438 = vmatpush3.msra.mxu0 %v1958_v0  ;;  %5012 = vmatpush3.msra.mxu1 %v1991_v16  ;;  %v2358_v0 = vld [vmem:[#allocation8 + $0x8c8] sm:$0xff] }
 0x15b   : > { %4439 = vmatprep.subr.mxu0 %v1973_v33  ;;  %5013 = vmatprep.subr.mxu1 %v1990_v21 }
 0x15c   : > { %1731 = vmatprep.mubr.f32.mxu0 %v6302_v57  ;;  %4440 = vmatpush3.msra.mxu0 %v1957_v22  ;;  %v2357_v22 = vld [vmem:[#allocation8 + $0x8c0] sm:$0xff] }
 0x15d   : > { %5014 = vmatpush3.msra.mxu1 %v1990_v21  ;;  %1732 = vmatmul.mubr.f32.gmra.mxu0 %v6281_v8 }
 0x15e   : > { %4441 = vmatprep.subr.mxu0 %v1972_v24  ;;  %5015 = vmatprep.subr.mxu1 %v1989_v41  ;;  %v2339_v24 = vld [vmem:[#allocation8 + $0x830] sm:$0xff] }
 0x15f   : > { %4990 = vmatprep.mubr.f32.mxu1 %v6308_v27  ;;  %4442 = vmatpush3.msra.mxu0 %v1956_v31  ;;  %v2323_v31 = vld [vmem:[#allocation8 + $0x7b0] sm:$0xff] }
 0x160   : > { %5016 = vmatpush3.msra.mxu1 %v1989_v41  ;;  %4443 = vmatprep.subr.mxu0 %v1971_v29  ;;  %v2356_v41 = vld [vmem:[#allocation8 + $0x8b8] sm:$0xff] }
 0x161   : > { %4991 = vmatmul.mubr.f32.gmra.mxu1 %v6312_v61  ;;  %5017 = vmatprep.subr.mxu1 %v1988_v19 }
 0x162   : > { %1736 = vmatprep.mubr.f32.mxu0 %v6316_v38  ;;  %4444 = vmatpush3.msra.mxu0 %v1955_v42  ;;  %v2355_v42 = vld [vmem:[#allocation8 + $0x8b0] sm:$0xff] }
 0x163   : > { %5018 = vmatpush3.msra.mxu1 %v1988_v19  ;;  %1737 = vmatmul.mubr.f32.gmra.mxu0 %v6296_v36  ;;  %v2338_v19 = vld [vmem:[#allocation8 + $0x828] sm:$0xff] }
 0x164   : > { %4445 = vmatprep.subr.mxu0 %v1970_v59  ;;  %5019 = vmatprep.subr.mxu1 %v1987_v43 }
 0x165   : > { %4446 = vmatpush3.msra.mxu0 %v1954_v44  ;;  %5020 = vmatpush3.msra.mxu1 %v1987_v43  ;;  %v2322_v43 = vld [vmem:[#allocation8 + $0x7a8] sm:$0xff]  ;;  %v6341_v44 = vld [vmem:[%s6025_s11 + $0x80] sm:$0xff] }
 0x166   : > { %4447 = vmatprep.subr.mxu0 %v1969_v45  ;;  %5021 = vmatprep.subr.mxu1 %v1986_v46  ;;  %v4038_v45 = vld [vmem:[%s6025_s11 + $0x88] sm:$0xff] }
 0x167   : > { %4448 = vmatpush3.msra.mxu0 %v1953_v39  ;;  %2065 = vmatprep.mubr.f32.mxu0 %v6230_v18  ;;  %v2363_v18 = vld [vmem:[#allocation8 + $0x8f0] sm:$0xff] }
 0x168   : > { %5022 = vmatpush3.msra.mxu1 %v1986_v46  ;;  %2066 = vmatmul.mubr.f32.vlgmr.msra.gmra.mxu0 %v6215_v56  ;;  %v2345_v56 = vld [vmem:[#allocation8 + $0x860] sm:$0xff] }
 0x169   : > { %5023 = vmatprep.subr.mxu1 %v1985_v50  ;;  %4497 = vmatprep.subr.mxu0 %v2348_v11  ;;  %v2337_v46 = vld [vmem:[#allocation8 + $0x820] sm:$0xff]  ;;  %v2354_v11 = vld [vmem:[#allocation8 + $0x8a8] sm:$0xff] }
 0x16a   : > { %5024 = vmatpush3.msra.mxu1 %v1985_v50  ;;  %5025 = vmatprep.mubr.f32.mxu1 %v6227_v2  ;;  %v2329_v2 = vld [vmem:[#allocation8 + $0x7e0] sm:$0xff] }
 0x16b   : > { %4498 = vmatpush3.msra.mxu0 %v2332_v51  ;;  %5026 = vmatmul.mubr.f32.vlgmr.msra.gmra.mxu1 %v6248_v34  ;;  %v2321_v51 = vld [vmem:[#allocation8 + $0x7a0] sm:$0xff] }
 0x16c   : > { %4499 = vmatprep.subr.mxu0 %v2347_v53  ;;  %5037 = vmatprep.subr.mxu1 %v2364_v55  ;;  %v1941_v53 = vrot.slane %v6341_v44, 2 }
 0x16d   : > { %2070 = vmatprep.mubr.f32.mxu0 %v6242_v28  ;;  %4500 = vmatpush3.msra.mxu0 %v2331_v58 }
 0x16e   : > { %5038 = vmatpush3.msra.mxu1 %v2364_v55  ;;  %2071 = vmatmul.mubr.f32.gmra.mxu0 %v6223_v47  ;;  %v1942_v55 = vrot.slane %v4038_v45, 2 }
 0x16f   : > { %4501 = vmatprep.subr.mxu0 %v2346_v32  ;;  %5039 = vmatprep.subr.mxu1 %v2363_v18  ;;  %v2336_v32 = vld [vmem:[#allocation8 + $0x818] sm:$0xff] }
 0x170   : > { %4502 = vmatpush3.msra.mxu0 %v2330_v60  ;;  %5040 = vmatpush3.msra.mxu1 %v2363_v18  ;;  %v1909_v18 = vrot.slane %v6341_v44, 1  ;;  %v1910_v60 = vrot.slane %v4038_v45, 1  ;;  %v2727_v45 = vld [vmem:[#allocation8 + $0xa78] sm:$0xff] }
 0x171   : > { %4503 = vmatprep.subr.mxu0 %v2345_v56  ;;  %5041 = vmatprep.subr.mxu1 %v2362_v63 }
 0x172   : > { %2075 = vmatprep.mubr.f32.mxu0 %v6260_v40  ;;  %4504 = vmatpush3.msra.mxu0 %v2329_v2  ;;  %v2353_v2 = vld [vmem:[#allocation8 + $0x8a0] sm:$0xff] }
 0x173   : > { %5042 = vmatpush3.msra.mxu1 %v2362_v63  ;;  %2076 = vmatmul.mubr.f32.gmra.mxu0 %v6236_v12 }
 0x174   : > { %4505 = vmatprep.subr.mxu0 %v2344_v1  ;;  %5043 = vmatprep.subr.mxu1 %v2361_v4  ;;  %v2320_v1 = vld [vmem:[#allocation8 + $0x798] sm:$0xff] }
 0x175   : > { %5028 = vmatprep.mubr.f32.mxu1 %v6256_v37  ;;  %4506 = vmatpush3.msra.mxu0 %v2328_v7  ;;  %v6352_v7 = vsel %vm481_vm1, %v1941_v53, %v1942_v55  ;;  %v2708_v53 = vld [vmem:[#allocation8 + $0x9e0] sm:$0xff] }
 0x176   : > { %5044 = vmatpush3.msra.mxu1 %v2361_v4  ;;  %4507 = vmatprep.subr.mxu0 %v2343_v9  ;;  %v2335_v9 = vld [vmem:[#allocation8 + $0x810] sm:$0xff] }
 0x177   : > { %5029 = vmatmul.mubr.f32.gmra.mxu1 %v6278_v6  ;;  %5045 = vmatprep.subr.mxu1 %v2360_v13 }
 0x178   : > { %2080 = vmatprep.mubr.f32.mxu0 %v6272_v54  ;;  %4508 = vmatpush3.msra.mxu0 %v2327_v14  ;;  %v4129_v16 = vpop.f32.mrf.mxu0 }
 0x179   : > { %5046 = vmatpush3.msra.mxu1 %v2360_v13  ;;  %2081 = vmatmul.mubr.f32.gmra.mxu0 %v6251_v35 }
 0x17a   : > { %4509 = vmatprep.subr.mxu0 %v2342_v15  ;;  %5047 = vmatprep.subr.mxu1 %v2359_v52  ;;  %v4130_v33 = vpop.f32.mrf.mxu0  ;;  %v2352_v15 = vld [vmem:[#allocation8 + $0x898] sm:$0xff] }
 0x17b   : > { %4510 = vmatpush3.msra.mxu0 %v2326_v26  ;;  %5048 = vmatpush3.msra.mxu1 %v2359_v52  ;;  %v4131_v30 = vadd.f32 %v4130_v33, %v4129_v16  ;;  %v4851_v21 = vpop.f32.mrf.mxu1  ;;  %v6358_v52 = vsel %vm448_vm0, %v1909_v18, %v1910_v60  ;;  %v2319_v26 = vld [vmem:[#allocation8 + $0x790] sm:$0xff]  ;;  %v2334_v16 = vld [vmem:[#allocation8 + $0x808] sm:$0xff]  ;;  %v2707_v18 = vld [vmem:[#allocation8 + $0x9d8] sm:$0xff] }
 0x17c   : > { %4511 = vmatprep.subr.mxu0 %v2341_v62  ;;  %5049 = vmatprep.subr.mxu1 %v2358_v0  ;;  %v2318_v33 = vld [vmem:[#allocation8 + $0x788] sm:$0xff] }
 0x17d   : > { %2085 = vmatprep.mubr.f32.mxu0 %v6290_v5  ;;  %4512 = vmatpush3.msra.mxu0 %v2325_v17  ;;  %v879_v23 = vpop.f32.mrf.mxu1  ;;  %v2351_v17 = vld [vmem:[#allocation8 + $0x890] sm:$0xff] }
 0x17e   : > { %5050 = vmatpush3.msra.mxu1 %v2358_v0  ;;  %2086 = vmatmul.mubr.f32.gmra.mxu0 %v6266_v49  ;;  %v4132_v3 = vpop.f32.mrf.mxu0  ;;  %v6335_v25 = vadd.f32 %v4131_v30, %v879_v23 }
 0x17f   : > { %4513 = vmatprep.subr.mxu0 %v2340_v20  ;;  %5051 = vmatprep.subr.mxu1 %v2357_v22  ;;  %v2333_v20 = vld [vmem:[#allocation8 + $0x800] sm:$0xff] }
 0x180   : > { %5031 = vmatprep.mubr.f32.mxu1 %v6286_v10  ;;  %4514 = vmatpush3.msra.mxu0 %v2324_v48  ;;  %v4133_v29 = vpop.f32.mrf.mxu0  ;;  %v2317_v48 = vld [vmem:[#allocation8 + $0x780] sm:$0xff] }
 0x181   : > { %5052 = vmatpush3.msra.mxu1 %v2357_v22  ;;  %4515 = vmatprep.subr.mxu0 %v2339_v24  ;;  %v4134_v59 = vadd.f32 %v4133_v29, %v4132_v3  ;;  %v2350_v22 = vld [vmem:[#allocation8 + $0x888] sm:$0xff]  ;;  %v2349_v24 = vld [vmem:[#allocation8 + $0x880] sm:$0xff]  ;;  %v2695_v29 = vld [vmem:[#allocation8 + $0x978] sm:$0xff] }
 0x182   : > { %5032 = vmatmul.mubr.f32.gmra.mxu1 %v6308_v27  ;;  %5053 = vmatprep.subr.mxu1 %v2356_v41 }
 0x183   : > { %2090 = vmatprep.mubr.f32.mxu0 %v6302_v57  ;;  %4516 = vmatpush3.msra.mxu0 %v2323_v31  ;;  %v6344_v39 = vadd.f32 %v4851_v21, %v4134_v59  ;;  %v4135_v50 = vpop.f32.mrf.mxu0  ;;  %v2711_v31 = vld [vmem:[#allocation8 + $0x9f8] sm:$0xff] }
 0x184   : > { %5054 = vmatpush3.msra.mxu1 %v2356_v41  ;;  %2091 = vmatmul.mubr.f32.gmra.mxu0 %v6281_v8 }
 0x185   : > { %4517 = vmatprep.subr.mxu0 %v2338_v19  ;;  %5055 = vmatprep.subr.mxu1 %v2355_v42  ;;  %v4136_v58 = vpop.f32.mrf.mxu0 }
 0x186   : > { %4518 = vmatpush3.msra.mxu0 %v2322_v43  ;;  %5056 = vmatpush3.msra.mxu1 %v2355_v42  ;;  %v4137_v56 = vadd.f32 %v4136_v58, %v4135_v50  ;;  %v2710_v42 = vld [vmem:[#allocation8 + $0x9f0] sm:$0xff] }
 0x187   : > { %4519 = vmatprep.subr.mxu0 %v2337_v46  ;;  %v4854_v63 = vpop.f32.mrf.mxu1  ;;  %5057 = vmatprep.subr.mxu1 %v2354_v11  ;;  %v2694_v46 = vld [vmem:[#allocation8 + $0x970] sm:$0xff] }
 0x188   : > { %2095 = vmatprep.mubr.f32.mxu0 %v6316_v38  ;;  %4520 = vmatpush3.msra.mxu0 %v2321_v51  ;;  %v2693_v51 = vld [vmem:[#allocation8 + $0x968] sm:$0xff] }
 0x189   : > { %5058 = vmatpush3.msra.mxu1 %v2354_v11  ;;  %v889_v4 = vpop.f32.mrf.mxu1  ;;  %2096 = vmatmul.mubr.f32.gmra.mxu0 %v6296_v36  ;;  %v4138_v13 = vpop.f32.mrf.mxu0 }
 0x18a   : > { %4521 = vmatprep.subr.mxu0 %v2336_v32  ;;  %v6354_v14 = vadd.f32 %v4137_v56, %v889_v4  ;;  %5059 = vmatprep.subr.mxu1 %v2353_v2  ;;  %v2724_v56 = vld [vmem:[#allocation8 + $0xa60] sm:$0xff] }
 0x18b   : > { %5034 = vmatprep.mubr.f32.mxu1 %v6312_v61  ;;  %4522 = vmatpush3.msra.mxu0 %v2320_v1  ;;  %v4139_v62 = vpop.f32.mrf.mxu0 }
 0x18c   : > { %5060 = vmatpush3.msra.mxu1 %v2353_v2  ;;  %4523 = vmatprep.subr.mxu0 %v2335_v9  ;;  %v4140_v0 = vadd.f32 %v4139_v62, %v4138_v13  ;;  %v2723_v9 = vld [vmem:[#allocation8 + $0xa58] sm:$0xff]  ;;  %v2690_v13 = vld [vmem:[#allocation8 + $0x950] sm:$0xff]  ;;  %v2689_v62 = vld [vmem:[#allocation8 + $0x948] sm:$0xff] }
 0x18d   : > { %5035 = vmatmul.mubr.f32.gmra.mxu1 %v6352_v7  ;;  %5061 = vmatprep.subr.mxu1 %v2352_v15 }
 0x18e   : > { %2100 = vmatprep.mubr.f32.mxu0 %v6358_v52  ;;  %4524 = vmatpush3.msra.mxu0 %v2319_v26  ;;  %v6362_v30 = vadd.f32 %v4854_v63, %v4140_v0  ;;  %v4141_v21 = vpop.f32.mrf.mxu0  ;;  %v2691_v63 = vld [vmem:[#allocation8 + $0x958] sm:$0xff] }
 0x18f   : > { %5062 = vmatpush3.msra.mxu1 %v2352_v15  ;;  %2101 = vmatmul.mubr.f32.gmra.mxu0 %v6341_v44  ;;  %v2705_v15 = vld [vmem:[#allocation8 + $0x9c8] sm:$0xff] }
 0x190   : > { %4525 = vmatprep.subr.mxu0 %v2334_v16  ;;  %5063 = vmatprep.subr.mxu1 %v2351_v17  ;;  %v4142_v23 = vpop.f32.mrf.mxu0  ;;  %v2704_v16 = vld [vmem:[#allocation8 + $0x9c0] sm:$0xff] }
 0x191   : > { %4526 = vmatpush3.msra.mxu0 %v2318_v33  ;;  %5064 = vmatpush3.msra.mxu1 %v2351_v17  ;;  %v4143_v3 = vadd.f32 %v4142_v23, %v4141_v21  ;;  %v2721_v17 = vld [vmem:[#allocation8 + $0xa48] sm:$0xff]  ;;  %v2720_v21 = vld [vmem:[#allocation8 + $0xa40] sm:$0xff]  ;;  %v2702_v23 = vld [vmem:[#allocation8 + $0x9b0] sm:$0xff] }
 0x192   : > { %4527 = vmatprep.subr.mxu0 %v2333_v20  ;;  %v4857_v41 = vpop.f32.mrf.mxu1  ;;  %5065 = vmatprep.subr.mxu1 %v2350_v22  ;;  %v2703_v20 = vld [vmem:[#allocation8 + $0x9b8] sm:$0xff] }
 0x193   : > { %4528 = vmatpush3.msra.mxu0 %v2317_v48  ;;  %2429 = vmatprep.mubr.f32.mxu0 %v6242_v28  ;;  %v2709_v28 = vld [vmem:[#allocation8 + $0x9e8] sm:$0xff]  ;;  %v2687_v48 = vld [vmem:[#allocation8 + $0x938] sm:$0xff] }
 0x194   : > { %5066 = vmatpush3.msra.mxu1 %v2350_v22  ;;  %v899_v19 = vpop.f32.mrf.mxu1  ;;  %2430 = vmatmul.mubr.f32.vlgmr.msra.gmra.mxu0 %v6223_v47  ;;  %v4144_v59 = vpop.f32.mrf.mxu0  ;;  %v2726_v47 = vld [vmem:[#allocation8 + $0xa70] sm:$0xff] }
 0x195   : > { %5067 = vmatprep.subr.mxu1 %v2349_v24  ;;  %v6367_v43 = vadd.f32 %v4143_v3, %v899_v19  ;;  %4577 = vmatprep.subr.mxu0 %v2711_v31  ;;  %v2686_v31 = vld [vmem:[#allocation8 + $0x930] sm:$0xff] }
 0x196   : > { %5068 = vmatpush3.msra.mxu1 %v2349_v24  ;;  %5069 = vmatprep.mubr.f32.mxu1 %v6248_v34  ;;  %v4145_v50 = vpop.f32.mrf.mxu0  ;;  %v2725_v34 = vld [vmem:[#allocation8 + $0xa68] sm:$0xff] }
 0x197   : > { %4578 = vmatpush3.msra.mxu0 %v2695_v29  ;;  %5070 = vmatmul.mubr.f32.vlgmr.msra.gmra.mxu1 %v6256_v37  ;;  %v4146_v11 = vadd.f32 %v4145_v50, %v4144_v59  ;;  %v2692_v37 = vld [vmem:[#allocation8 + $0x960] sm:$0xff]  ;;  %v6394_v59 = vld [vmem:[%s6025_s11 + $0x90] sm:$0xff] }
 0x198   : > { %4579 = vmatprep.subr.mxu0 %v2710_v42  ;;  %5081 = vmatprep.subr.mxu1 %v2727_v45  ;;  %v2685_v42 = vld [vmem:[#allocation8 + $0x928] sm:$0xff] }
 0x199   : > { %2434 = vmatprep.mubr.f32.mxu0 %v6260_v40  ;;  %4580 = vmatpush3.msra.mxu0 %v2694_v46  ;;  %v6372_v55 = vadd.f32 %v4857_v41, %v4146_v11  ;;  %v4147_v58 = vpop.f32.mrf.mxu0  ;;  %v2719_v41 = vld [vmem:[#allocation8 + $0xa38] sm:$0xff]  ;;  %v2305_v11 = vrot.slane %v6394_v59, 2 }
 0x19a   : > { %5082 = vmatpush3.msra.mxu1 %v2727_v45  ;;  %2435 = vmatmul.mubr.f32.gmra.mxu0 %v6236_v12  ;;  %v2706_v12 = vld [vmem:[#allocation8 + $0x9d0] sm:$0xff]  ;;  %v2700_v45 = vld [vmem:[#allocation8 + $0x9a0] sm:$0xff] }
 0x19b   : > { %4581 = vmatprep.subr.mxu0 %v2709_v28  ;;  %5083 = vmatprep.subr.mxu1 %v2726_v47  ;;  %v4148_v32 = vpop.f32.mrf.mxu0  ;;  %v2684_v28 = vld [vmem:[#allocation8 + $0x920] sm:$0xff] }
 0x19c   : > { %4582 = vmatpush3.msra.mxu0 %v2693_v51  ;;  %5084 = vmatpush3.msra.mxu1 %v2726_v47  ;;  %v4149_v40 = vadd.f32 %v4148_v32, %v4147_v58 }
 0x19d   : > { %4583 = vmatprep.subr.mxu0 %v2708_v53  ;;  %v4860_v60 = vpop.f32.mrf.mxu1  ;;  %5085 = vmatprep.subr.mxu1 %v2725_v34  ;;  %v2699_v53 = vld [vmem:[#allocation8 + $0x998] sm:$0xff] }
 0x19e   : > { %2439 = vmatprep.mubr.f32.mxu0 %v6272_v54  ;;  %4584 = vmatpush3.msra.mxu0 %v2692_v37  ;;  %v2683_v37 = vld [vmem:[#allocation8 + $0x918] sm:$0xff] }
 0x19f   : > { %5086 = vmatpush3.msra.mxu1 %v2725_v34  ;;  %v909_v2 = vpop.f32.mrf.mxu1  ;;  %2440 = vmatmul.mubr.f32.gmra.mxu0 %v6251_v35  ;;  %v4150_v1 = vpop.f32.mrf.mxu0  ;;  %v2722_v35 = vld [vmem:[#allocation8 + $0xa50] sm:$0xff]  ;;  %v2716_v34 = vld [vmem:[#allocation8 + $0xa20] sm:$0xff] }
 0x1a0   : > { %4585 = vmatprep.subr.mxu0 %v2707_v18  ;;  %v6377_v4 = vadd.f32 %v4149_v40, %v909_v2  ;;  %5087 = vmatprep.subr.mxu1 %v2724_v56 }
 0x1a1   : > { %5072 = vmatprep.mubr.f32.mxu1 %v6278_v6  ;;  %4586 = vmatpush3.msra.mxu0 %v2691_v63  ;;  %v4151_v54 = vpop.f32.mrf.mxu0  ;;  %v2584_v63 = vld [vmem:[%s6032_s17 + $0x8] sm:$0xff] }
 0x1a2   : > { %5088 = vmatpush3.msra.mxu1 %v2724_v56  ;;  %4587 = vmatprep.subr.mxu0 %v2706_v12  ;;  %v4152_v26 = vadd.f32 %v4151_v54, %v4150_v1  ;;  %v2583_v56 = vld [vmem:[%s6032_s17] sm:$0xff]  ;;  %v2714_v54 = vld [vmem:[#allocation8 + $0xa10] sm:$0xff] }
 0x1a3   : > { %5073 = vmatmul.mubr.f32.gmra.mxu1 %v6286_v10  ;;  %5089 = vmatprep.subr.mxu1 %v2723_v9  ;;  %v2688_v10 = vld [vmem:[#allocation8 + $0x940] sm:$0xff] }
 0x1a4   : > { %2444 = vmatprep.mubr.f32.mxu0 %v6290_v5  ;;  %4588 = vmatpush3.msra.mxu0 %v2690_v13  ;;  %v6382_v0 = vadd.f32 %v4860_v60, %v4152_v26  ;;  %v4209_v6 = vpop.f32.mrf.mxu0  ;;  %v2698_v60 = vld [vmem:[#allocation8 + $0x990] sm:$0xff]  ;;  %v2697_v13 = vld [vmem:[#allocation8 + $0x988] sm:$0xff]  ;;  %v2616_v26 = vrot.slane %v2584_v63, 1 }
 0x1a5   : > { %5090 = vmatpush3.msra.mxu1 %v2723_v9  ;;  %2445 = vmatmul.mubr.f32.gmra.mxu0 %v6266_v49 }
 0x1a6   : > { %4589 = vmatprep.subr.mxu0 %v2705_v15  ;;  %5091 = vmatprep.subr.mxu1 %v2722_v35  ;;  %v4210_v33 = vpop.f32.mrf.mxu0  ;;  %v2615_v15 = vrot.slane %v2583_v56, 1 }
 0x1a7   : > { %4590 = vmatpush3.msra.mxu0 %v2689_v62  ;;  %5092 = vmatpush3.msra.mxu1 %v2722_v35  ;;  %v4211_v5 = vadd.f32 %v4210_v33, %v4209_v6  ;;  %v6414_v62 = vld [vmem:[%s6032_s17 + $0x10] sm:$0xff]  ;;  %v2713_v33 = vld [vmem:[#allocation8 + $0xa08] sm:$0xff] }
 0x1a8   : > { %4591 = vmatprep.subr.mxu0 %v2704_v16  ;;  %5093 = vmatprep.subr.mxu1 %v2721_v17  ;;  %v2586_v16 = vld [vmem:[%s6032_s17 + $0x18] sm:$0xff] }
 0x1a9   : > { %2449 = vmatprep.mubr.f32.mxu0 %v6302_v57  ;;  %v4895_v22 = vpop.f32.mrf.mxu1  ;;  %4592 = vmatpush3.msra.mxu0 %v2688_v10  ;;  %v985_v49 = vadd.f32 %v4211_v5, %v6335_v25  ;;  %v2718_v25 = vld [vmem:[#allocation8 + $0xa30] sm:$0xff]  ;;  %v2647_v5 = vrot.slane %v2583_v56, 2 }
 0x1aa   : > { %5094 = vmatpush3.msra.mxu1 %v2721_v17  ;;  %2450 = vmatmul.mubr.f32.gmra.mxu0 %v6281_v8  ;;  %v4212_v24 = vpop.f32.mrf.mxu0  ;;  %v2701_v8 = vld [vmem:[#allocation8 + $0x9a8] sm:$0xff]  ;;  %v2696_v17 = vld [vmem:[#allocation8 + $0x980] sm:$0xff] }
 0x1ab   : > { %4593 = vmatprep.subr.mxu0 %v2703_v20  ;;  %v1089_v3 = vpop.f32.mrf.mxu1  ;;  %5095 = vmatprep.subr.mxu1 %v2720_v21  ;;  %v2680_v20 = vld [vmem:[#allocation8 + $0x900] sm:$0xff] }
 0x1ac   : > { %5075 = vmatprep.mubr.f32.mxu1 %v6308_v27  ;;  %v6389_v57 = vadd.f32 %v1089_v3, %v985_v49  ;;  %4594 = vmatpush3.msra.mxu0 %v2687_v48  ;;  %v4213_v29 = vpop.f32.mrf.mxu0  ;;  %v4054_v27 = vld [vmem:[%s6025_s11 + $0x98] sm:$0xff]  ;;  %v2617_v48 = vsel %vm448_vm0, %v2615_v15, %v2616_v26  ;;  %v2650_v49 = vrot.slane %v6414_v62, 2  ;;  %v2618_v3 = vrot.slane %v6414_v62, 1  ;;  %s5494_s11 = scalar_lea.vmem %s6755_s1, 1024 }
 0x1ad   : > { %5096 = vmatpush3.msra.mxu1 %v2720_v21  ;;  %4595 = vmatprep.subr.mxu0 %v2702_v23  ;;  %v4214_v19 = vadd.f32 %v4213_v29, %v4212_v24  ;;  %v2274_v58 = vrot.slane %v4054_v27, 1  ;;  %v2648_v21 = vrot.slane %v2584_v63, 2  ;;  %v2712_v24 = vld [vmem:[#allocation8 + $0xa00] sm:$0xff]  ;;  %v3075_v29 = vld [vmem:[#allocation8 + $0xb78] sm:$0xff]  ;;  %p5495_p13 = scmp.ne.s32.totalorder %s6755_s1, %s5494_s11 }
 0x1ae   : > { %5076 = vmatmul.mubr.f32.gmra.mxu1 %v6312_v61  ;;  %5097 = vmatprep.subr.mxu1 %v2719_v41  ;;  %v2717_v61 = vld [vmem:[#allocation8 + $0xa28] sm:$0xff] }
 0x1af   : > { %2454 = vmatprep.mubr.f32.mxu0 %v6316_v38  ;;  %4596 = vmatpush3.msra.mxu0 %v2686_v31  ;;  %v990_v46 = vadd.f32 %v4214_v19, %v6344_v39  ;;  %v4215_v50 = vpop.f32.mrf.mxu0  ;;  %v2306_v38 = vrot.slane %v4054_v27, 2  ;;  %v2273_v39 = vrot.slane %v6394_v59, 1  ;;  %v6426_v19 = vld [vmem:[%s6032_s17 + $0x20] sm:$0xff]  ;;  %p5496_p11 = pnand %p5495_p13, %p5945_p12 }
 0x1b0   : > { %5098 = vmatpush3.msra.mxu1 %v2719_v41  ;;  %2455 = vmatmul.mubr.f32.gmra.mxu0 %v6296_v36  ;;  %v2619_v41 = vrot.slane %v2586_v16, 1 }
 0x1b1   : > { %4597 = vmatprep.subr.mxu0 %v2701_v8  ;;  %5099 = vmatprep.subr.mxu1 %v2718_v25  ;;  %v6400_v47 = vadd.f32 %v4895_v22, %v990_v46  ;;  %v4216_v51 = vpop.f32.mrf.mxu0  ;;  %v2307_v40 = vsel %vm481_vm1, %v2305_v11, %v2306_v38  ;;  %v2275_v12 = vsel %vm448_vm0, %v2273_v39, %v2274_v58  ;;  %v3074_v46 = vld [vmem:[#allocation8 + $0xb70] sm:$0xff]  ;;  %v3073_v58 = vld [vmem:[#allocation8 + $0xb68] sm:$0xff]  ;;  %p5497_p4 = pneg %p5496_p11 }
 0x1b2   : > { %4598 = vmatpush3.msra.mxu0 %v2685_v42  ;;  %5100 = vmatpush3.msra.mxu1 %v2718_v25  ;;  %v4217_v36 = vadd.f32 %v4216_v51, %v4215_v50  ;;  %v2649_v8 = vsel %vm481_vm1, %v2647_v5, %v2648_v21  ;;  %v3059_v25 = vld [vmem:[#allocation8 + $0xaf8] sm:$0xff]  ;;  %v2588_v42 = vld [vmem:[%s6032_s17 + $0x28] sm:$0xff]  ;;  %v3058_v38 = vld [vmem:[#allocation8 + $0xaf0] sm:$0xff] }
 0x1b3   : > { %4599 = vmatprep.subr.mxu0 %v2700_v45  ;;  %5101 = vmatprep.subr.mxu1 %v2717_v61  ;;  %v2622_v51 = vrot.slane %v2588_v42, 1  ;;  %v2654_v63 = vrot.slane %v2588_v42, 2  ;;  %v3070_v21 = vld [vmem:[#allocation8 + $0xb50] sm:$0xff]  ;;  %v3053_v42 = vld [vmem:[#allocation8 + $0xac8] sm:$0xff] }
 0x1b4   : > { %2459 = vmatprep.mubr.f32.mxu0 %v6358_v52  ;;  %4600 = vmatpush3.msra.mxu0 %v2684_v28  ;;  %v995_v18 = vadd.f32 %v4217_v36, %v6354_v14  ;;  %v2715_v52 = vld [vmem:[#allocation8 + $0xa18] sm:$0xff]  ;;  %v2682_v14 = vld [vmem:[#allocation8 + $0x910] sm:$0xff]  ;;  %v6434_v28 = vsel %vm448_vm0, %v2618_v3, %v2619_v41 }
 0x1b5   : > { %5102 = vmatpush3.msra.mxu1 %v2717_v61  ;;  %v4218_v32 = vpop.f32.mrf.mxu0  ;;  %2460 = vmatmul.mubr.f32.gmra.mxu0 %v6341_v44  ;;  %v4898_v2 = vpop.f32.mrf.mxu1  ;;  %v3091_v61 = vld [vmem:[#allocation8 + $0xbf8] sm:$0xff]  ;;  %v3090_v36 = vld [vmem:[#allocation8 + $0xbf0] sm:$0xff] }
 0x1b6   : > { %4601 = vmatprep.subr.mxu0 %v2699_v53  ;;  %5103 = vmatprep.subr.mxu1 %v2716_v34 }
 0x1b7   : > { %5078 = vmatprep.mubr.f32.mxu1 %v6352_v7  ;;  %v4219_v1 = vpop.f32.mrf.mxu0  ;;  %4602 = vmatpush3.msra.mxu0 %v2683_v37  ;;  %v1099_v9 = vpop.f32.mrf.mxu1  ;;  %v2681_v7 = vld [vmem:[#allocation8 + $0x908] sm:$0xff] }
 0x1b8   : > { %5104 = vmatpush3.msra.mxu1 %v2716_v34  ;;  %v4220_v44 = vadd.f32 %v4219_v1, %v4218_v32  ;;  %4603 = vmatprep.subr.mxu0 %v2698_v60  ;;  %v6411_v35 = vadd.f32 %v1099_v9, %v995_v18  ;;  %v3057_v37 = vld [vmem:[#allocation8 + $0xae8] sm:$0xff]  ;;  %v6442_v32 = vld [vmem:[%s6032_s17 + $0x30] sm:$0xff]  ;;  %v2590_v18 = vld [vmem:[%s6032_s17 + $0x38] sm:$0xff] }
 0x1b9   : > { %5079 = vmatmul.mubr.f32.gmra.mxu1 %v2307_v40  ;;  %5105 = vmatprep.subr.mxu1 %v2715_v52  ;;  %v3072_v60 = vld [vmem:[#allocation8 + $0xb60] sm:$0xff]  ;;  %v2625_v15 = vrot.slane %v2590_v18, 1 }
 0x1ba   : > { %2464 = vmatprep.mubr.f32.mxu0 %v2275_v12  ;;  %v1000_v6 = vadd.f32 %v4220_v44, %v6362_v30  ;;  %4604 = vmatpush3.msra.mxu0 %v2682_v14  ;;  %v4221_v10 = vpop.f32.mrf.mxu0  ;;  %v2651_v30 = vrot.slane %v2586_v16, 2  ;;  %v3056_v14 = vld [vmem:[#allocation8 + $0xae0] sm:$0xff]  ;;  %v2657_v44 = vrot.slane %v2590_v18, 2 }
 0x1bb   : > { %5106 = vmatpush3.msra.mxu1 %v2715_v52  ;;  %2465 = vmatmul.mubr.f32.gmra.mxu0 %v6394_v59  ;;  %v3089_v52 = vld [vmem:[#allocation8 + $0xbe8] sm:$0xff] }
 0x1bc   : > { %4605 = vmatprep.subr.mxu0 %v2697_v13  ;;  %v6419_v22 = vadd.f32 %v4898_v2, %v1000_v6  ;;  %5107 = vmatprep.subr.mxu1 %v2714_v54  ;;  %v4222_v23 = vpop.f32.mrf.mxu0  ;;  %v6431_v45 = vsel %vm481_vm1, %v2650_v49, %v2651_v30  ;;  %v3071_v13 = vld [vmem:[#allocation8 + $0xb58] sm:$0xff] }
 0x1bd   : > { %4606 = vmatpush3.msra.mxu0 %v2681_v7  ;;  %5108 = vmatpush3.msra.mxu1 %v2714_v54  ;;  %v4223_v31 = vadd.f32 %v4222_v23, %v4221_v10  ;;  %v2624_v54 = vrot.slane %v6442_v32, 1  ;;  %v3088_v7 = vld [vmem:[#allocation8 + $0xbe0] sm:$0xff]  ;;  %v3055_v6 = vld [vmem:[#allocation8 + $0xad8] sm:$0xff]  ;;  %v2592_v10 = vld [vmem:[%s6032_s17 + $0x48] sm:$0xff] }
 0x1be   : > { %4607 = vmatprep.subr.mxu0 %v2696_v17  ;;  %5109 = vmatprep.subr.mxu1 %v2713_v33  ;;  %v6460_v17 = vld [vmem:[%s6032_s17 + $0x40] sm:$0xff]  ;;  %v3087_v49 = vld [vmem:[#allocation8 + $0xbd8] sm:$0xff]  ;;  %v2628_v3 = vrot.slane %v2592_v10, 1 }
 0x1bf   : > { %4608 = vmatpush3.msra.mxu0 %v2680_v20  ;;  %2792 = vmatprep.mubr.f32.mxu0 %v2617_v48  ;;  %v1005_v27 = vadd.f32 %v4223_v31, %v6367_v43  ;;  %v2621_v43 = vrot.slane %v6426_v19, 1  ;;  %v6470_v30 = vsel %vm448_vm0, %v2624_v54, %v2625_v15 }
 0x1c0   : > { %5110 = vmatpush3.msra.mxu1 %v2713_v33  ;;  %v4224_v59 = vpop.f32.mrf.mxu0  ;;  %2793 = vmatmul.mubr.f32.vlgmr.msra.gmra.mxu0 %v2583_v56  ;;  %v4901_v50 = vpop.f32.mrf.mxu1  ;;  %v2653_v56 = vrot.slane %v6426_v19, 2 }
 0x1c1   : > { %5111 = vmatprep.subr.mxu1 %v2712_v24  ;;  %4657 = vmatprep.subr.mxu0 %v3075_v29  ;;  %v6449_v12 = vsel %vm448_vm0, %v2621_v43, %v2622_v51  ;;  %v3069_v29 = vld [vmem:[#allocation8 + $0xb48] sm:$0xff] }
 0x1c2   : > { %5112 = vmatpush3.msra.mxu1 %v2712_v24  ;;  %v4225_v11 = vpop.f32.mrf.mxu0  ;;  %5113 = vmatprep.mubr.f32.mxu1 %v2649_v8  ;;  %v1109_v39 = vpop.f32.mrf.mxu1  ;;  %v6457_v16 = vsel %vm481_vm1, %v2653_v56, %v2654_v63  ;;  %v2627_v24 = vrot.slane %v6460_v17, 1  ;;  %v3086_v8 = vld [vmem:[#allocation8 + $0xbd0] sm:$0xff]  ;;  %v3085_v43 = vld [vmem:[#allocation8 + $0xbc8] sm:$0xff]  ;;  %v3084_v63 = vld [vmem:[#allocation8 + $0xbc0] sm:$0xff] }
 0x1c3   : > { %4658 = vmatpush3.msra.mxu0 %v3059_v25  ;;  %v4226_v53 = vadd.f32 %v4225_v11, %v4224_v59  ;;  %5114 = vmatmul.mubr.f32.vlgmr.msra.gmra.mxu1 %v6431_v45  ;;  %v6438_v34 = vadd.f32 %v1109_v39, %v1005_v27  ;;  %v6478_v59 = vld [vmem:[%s6032_s17 + $0x50] sm:$0xff]  ;;  %v2594_v27 = vld [vmem:[%s6032_s17 + $0x58] sm:$0xff]  ;;  %v2660_v11 = vrot.slane %v2592_v10, 2  ;;  %v3052_v39 = vld [vmem:[#allocation8 + $0xac0] sm:$0xff] }
 0x1c4   : > { %4659 = vmatprep.subr.mxu0 %v3074_v46  ;;  %5125 = vmatprep.subr.mxu1 %v3091_v61  ;;  %v6485_v51 = vsel %vm448_vm0, %v2627_v24, %v2628_v3  ;;  %v2630_v18 = vrot.slane %v6478_v59, 1  ;;  %v6514_v24 = vld [vmem:[%s6032_s17 + $0x70] sm:$0xff]  ;;  %v2598_v3 = vld [vmem:[%s6032_s17 + $0x78] sm:$0xff] }
 0x1c5   : > { %2797 = vmatprep.mubr.f32.mxu0 %v6434_v28  ;;  %v1010_v40 = vadd.f32 %v4226_v53, %v6372_v55  ;;  %4660 = vmatpush3.msra.mxu0 %v3058_v38  ;;  %v4227_v2 = vpop.f32.mrf.mxu0  ;;  %v2656_v55 = vrot.slane %v6442_v32, 2 }
 0x1c6   : > { %5126 = vmatpush3.msra.mxu1 %v3091_v61  ;;  %2798 = vmatmul.mubr.f32.gmra.mxu0 %v6414_v62  ;;  %v2659_v61 = vrot.slane %v6460_v17, 2 }
 0x1c7   : > { %4661 = vmatprep.subr.mxu0 %v3073_v58  ;;  %v6451_v1 = vadd.f32 %v4901_v50, %v1010_v40  ;;  %5127 = vmatprep.subr.mxu1 %v3090_v36  ;;  %v4228_v9 = vpop.f32.mrf.mxu0  ;;  %v6466_v5 = vsel %vm481_vm1, %v2656_v55, %v2657_v44  ;;  %v3068_v50 = vld [vmem:[#allocation8 + $0xb40] sm:$0xff]  ;;  %v2663_v58 = vrot.slane %v2594_v27, 2  ;;  %v2631_v40 = vrot.slane %v2594_v27, 1  ;;  %v2596_v55 = vld [vmem:[%s6032_s17 + $0x68] sm:$0xff] }
 0x1c8   : > { %4662 = vmatpush3.msra.mxu0 %v3057_v37  ;;  %5128 = vmatpush3.msra.mxu1 %v3090_v36  ;;  %v4229_v26 = vadd.f32 %v4228_v9, %v4227_v2  ;;  %v3067_v37 = vld [vmem:[#allocation8 + $0xb38] sm:$0xff]  ;;  %v6493_v2 = vsel %vm481_vm1, %v2659_v61, %v2660_v11  ;;  %v2669_v61 = vrot.slane %v2598_v3, 2 }
 0x1c9   : > { %4663 = vmatprep.subr.mxu0 %v3072_v60  ;;  %5129 = vmatprep.subr.mxu1 %v3089_v52 }
 0x1ca   : > { %2802 = vmatprep.mubr.f32.mxu0 %v6449_v12  ;;  %4664 = vmatpush3.msra.mxu0 %v3056_v14  ;;  %v1015_v20 = vadd.f32 %v4229_v26, %v6377_v4  ;;  %v3054_v4 = vld [vmem:[#allocation8 + $0xad0] sm:$0xff]  ;;  %v6496_v14 = vld [vmem:[%s6032_s17 + $0x60] sm:$0xff]  ;;  %v3083_v26 = vld [vmem:[#allocation8 + $0xbb8] sm:$0xff] }
 0x1cb   : > { %5130 = vmatpush3.msra.mxu1 %v3089_v52  ;;  %v4230_v33 = vpop.f32.mrf.mxu0  ;;  %2803 = vmatmul.mubr.f32.gmra.mxu0 %v6426_v19  ;;  %v4904_v48 = vpop.f32.mrf.mxu1  ;;  %v3051_v52 = vld [vmem:[#allocation8 + $0xab8] sm:$0xff]  ;;  %v2633_v10 = vrot.slane %v6496_v14, 1 }
 0x1cc   : > { %4665 = vmatprep.subr.mxu0 %v3071_v13  ;;  %5131 = vmatprep.subr.mxu1 %v3088_v7  ;;  %v3066_v13 = vld [vmem:[#allocation8 + $0xb30] sm:$0xff] }
 0x1cd   : > { %5116 = vmatprep.mubr.f32.mxu1 %v6457_v16  ;;  %v4231_v23 = vpop.f32.mrf.mxu0  ;;  %4666 = vmatpush3.msra.mxu0 %v3055_v6  ;;  %v1119_v31 = vpop.f32.mrf.mxu1  ;;  %v3050_v6 = vld [vmem:[#allocation8 + $0xab0] sm:$0xff] }
 0x1ce   : > { %5132 = vmatpush3.msra.mxu1 %v3088_v7  ;;  %v4232_v41 = vadd.f32 %v4231_v23, %v4230_v33  ;;  %4667 = vmatprep.subr.mxu0 %v3070_v21  ;;  %v6474_v25 = vadd.f32 %v1119_v31, %v1015_v20  ;;  %v6505_v7 = vsel %vm448_vm0, %v2630_v18, %v2631_v40  ;;  %v2634_v33 = vrot.slane %v2596_v55, 1 }
 0x1cf   : > { %5117 = vmatmul.mubr.f32.gmra.mxu1 %v6466_v5  ;;  %5133 = vmatprep.subr.mxu1 %v3087_v49  ;;  %v2666_v31 = vrot.slane %v2596_v55, 2  ;;  %v3079_v55 = vld [vmem:[#allocation8 + $0xb98] sm:$0xff] }
 0x1d0   : > { %2807 = vmatprep.mubr.f32.mxu0 %v6470_v30  ;;  %v1020_v46 = vadd.f32 %v4232_v41, %v6382_v0  ;;  %4668 = vmatpush3.msra.mxu0 %v3054_v4  ;;  %v4289_v38 = vpop.f32.mrf.mxu0  ;;  %v2662_v0 = vrot.slane %v6478_v59, 2  ;;  %v3049_v4 = vld [vmem:[#allocation8 + $0xaa8] sm:$0xff]  ;;  %v3064_v41 = vld [vmem:[#allocation8 + $0xb20] sm:$0xff]  ;;  %v6520_v27 = vsel %vm448_vm0, %v2633_v10, %v2634_v33  ;;  %v3078_v10 = vld [vmem:[#allocation8 + $0xb90] sm:$0xff] }
 0x1d1   : > { %5134 = vmatpush3.msra.mxu1 %v3087_v49  ;;  %2808 = vmatmul.mubr.f32.gmra.mxu0 %v6442_v32  ;;  %v3082_v49 = vld [vmem:[#allocation8 + $0xbb0] sm:$0xff]  ;;  %v3045_v33 = vld [vmem:[#allocation8 + $0xa88] sm:$0xff] }
 0x1d2   : > { %4669 = vmatprep.subr.mxu0 %v3069_v29  ;;  %v6487_v53 = vadd.f32 %v4904_v48, %v1020_v46  ;;  %5135 = vmatprep.subr.mxu1 %v3086_v8  ;;  %v4290_v36 = vpop.f32.mrf.mxu0  ;;  %v6501_v9 = vsel %vm481_vm1, %v2662_v0, %v2663_v58  ;;  %v3065_v48 = vld [vmem:[#allocation8 + $0xb28] sm:$0xff]  ;;  %v3048_v46 = vld [vmem:[#allocation8 + $0xaa0] sm:$0xff]  ;;  %v2637_v0 = vrot.slane %v2598_v3, 1 }
 0x1d3   : > { %4670 = vmatpush3.msra.mxu0 %v3053_v42  ;;  %5136 = vmatpush3.msra.mxu1 %v3086_v8  ;;  %v4291_v60 = vadd.f32 %v4290_v36, %v4289_v38  ;;  %v4939_v56 = vpop.f32.mrf.mxu1  ;;  %v3081_v42 = vld [vmem:[#allocation8 + $0xba8] sm:$0xff] }
 0x1d4   : > { %4671 = vmatprep.subr.mxu0 %v3068_v50  ;;  %5137 = vmatprep.subr.mxu1 %v3085_v43  ;;  %v2668_v50 = vrot.slane %v6514_v24, 2 }
 0x1d5   : > { %2812 = vmatprep.mubr.f32.mxu0 %v6485_v51  ;;  %4672 = vmatpush3.msra.mxu0 %v3052_v39  ;;  %v1445_v44 = vpop.f32.mrf.mxu1  ;;  %v2636_v39 = vrot.slane %v6514_v24, 1 }
 0x1d6   : > { %5138 = vmatpush3.msra.mxu1 %v3085_v43  ;;  %2813 = vmatmul.mubr.f32.gmra.mxu0 %v6460_v17  ;;  %v4292_v54 = vpop.f32.mrf.mxu0  ;;  %v1446_v15 = vadd.f32 %v4291_v60, %v1445_v44  ;;  %v3063_v43 = vld [vmem:[#allocation8 + $0xb18] sm:$0xff]  ;;  %v6533_v60 = vsel %vm481_vm1, %v2668_v50, %v2669_v61 }
 0x1d7   : > { %4673 = vmatprep.subr.mxu0 %v3067_v37  ;;  %5139 = vmatprep.subr.mxu1 %v3084_v63  ;;  %v3080_v37 = vld [vmem:[#allocation8 + $0xba0] sm:$0xff]  ;;  %v6537_v44 = vsel %vm448_vm0, %v2636_v39, %v2637_v0  ;;  %v3455_v61 = vld [vmem:[#allocation8 + $0xd78] sm:$0xff]  ;;  %v3437_v39 = vld [vmem:[#allocation8 + $0xce8] sm:$0xff] }
 0x1d8   : > { %5119 = vmatprep.mubr.f32.mxu1 %v6493_v2  ;;  %4674 = vmatpush3.msra.mxu0 %v3051_v52  ;;  %v6509_v20 = vadd.f32 %v1446_v15, %v6389_v57  ;;  %v4293_v21 = vpop.f32.mrf.mxu0  ;;  %v2665_v57 = vrot.slane %v6496_v14, 2  ;;  %v3454_v0 = vld [vmem:[#allocation8 + $0xd70] sm:$0xff] }
 0x1d9   : > { %5140 = vmatpush3.msra.mxu1 %v3084_v63  ;;  %4675 = vmatprep.subr.mxu0 %v3066_v13  ;;  %v4294_v23 = vadd.f32 %v4293_v21, %v4292_v54  ;;  %v3046_v13 = vld [vmem:[#allocation8 + $0xa90] sm:$0xff]  ;;  %v3060_v21 = vld [vmem:[#allocation8 + $0xb00] sm:$0xff] }
 0x1da   : > { %5120 = vmatmul.mubr.f32.gmra.mxu1 %v6501_v9  ;;  %5141 = vmatprep.subr.mxu1 %v3083_v26  ;;  %v6529_v18 = vsel %vm481_vm1, %v2665_v57, %v2666_v31 }
 0x1db   : > { %2817 = vmatprep.mubr.f32.mxu0 %v6505_v7  ;;  %4676 = vmatpush3.msra.mxu0 %v3050_v6  ;;  %v1451_v29 = vadd.f32 %v4939_v56, %v4294_v23  ;;  %v4295_v8 = vpop.f32.mrf.mxu0  ;;  %v3062_v56 = vld [vmem:[#allocation8 + $0xb10] sm:$0xff]  ;;  %v3044_v23 = vld [vmem:[#allocation8 + $0xa80] sm:$0xff] }
 0x1dc   : > { %5142 = vmatpush3.msra.mxu1 %v3083_v26  ;;  %2818 = vmatmul.mubr.f32.gmra.mxu0 %v6478_v59  ;;  %v3061_v26 = vld [vmem:[#allocation8 + $0xb08] sm:$0xff] }
 0x1dd   : > { %4677 = vmatprep.subr.mxu0 %v3065_v48  ;;  %5143 = vmatprep.subr.mxu1 %v3082_v49  ;;  %v6524_v11 = vadd.f32 %v1451_v29, %v6400_v47  ;;  %v4296_v38 = vpop.f32.mrf.mxu0  ;;  %v3047_v47 = vld [vmem:[#allocation8 + $0xa98] sm:$0xff] }
 0x1de   : > { %4678 = vmatpush3.msra.mxu0 %v3049_v4  ;;  %5144 = vmatpush3.msra.mxu1 %v3082_v49  ;;  %v4297_v58 = vadd.f32 %v4296_v38, %v4295_v8  ;;  %v3439_v29 = vld [vmem:[#allocation8 + $0xcf8] sm:$0xff]  ;;  %v3422_v38 = vld [vmem:[#allocation8 + $0xc70] sm:$0xff] }
 0x1df   : > { %4679 = vmatprep.subr.mxu0 %v3064_v41  ;;  %v4942_v36 = vpop.f32.mrf.mxu1  ;;  %5145 = vmatprep.subr.mxu1 %v3081_v42  ;;  %v3076_v41 = vld [vmem:[#allocation8 + $0xb80] sm:$0xff]  ;;  %v3423_v8 = vld [vmem:[#allocation8 + $0xc78] sm:$0xff] }
 0x1e0   : > { %2822 = vmatprep.mubr.f32.mxu0 %v6520_v27  ;;  %4680 = vmatpush3.msra.mxu0 %v3048_v46  ;;  %v3438_v46 = vld [vmem:[#allocation8 + $0xcf0] sm:$0xff] }
 0x1e1   : > { %5146 = vmatpush3.msra.mxu1 %v3081_v42  ;;  %v1455_v40 = vpop.f32.mrf.mxu1  ;;  %2823 = vmatmul.mubr.f32.gmra.mxu0 %v6496_v14  ;;  %v4298_v63 = vpop.f32.mrf.mxu0 }
 0x1e2   : > { %4681 = vmatprep.subr.mxu0 %v3063_v43  ;;  %v1456_v52 = vadd.f32 %v4297_v58, %v1455_v40  ;;  %5147 = vmatprep.subr.mxu1 %v3080_v37  ;;  %v3421_v58 = vld [vmem:[#allocation8 + $0xc68] sm:$0xff] }
 0x1e3   : > { %5122 = vmatprep.mubr.f32.mxu1 %v6529_v18  ;;  %4682 = vmatpush3.msra.mxu0 %v3047_v47  ;;  %v4299_v15 = vpop.f32.mrf.mxu0  ;;  %v3420_v47 = vld [vmem:[#allocation8 + $0xc60] sm:$0xff] }
 0x1e4   : > { %5148 = vmatpush3.msra.mxu1 %v3080_v37  ;;  %v6540_v54 = vadd.f32 %v1456_v52, %v6411_v35  ;;  %4683 = vmatprep.subr.mxu0 %v3062_v56  ;;  %v4300_v6 = vadd.f32 %v4299_v15, %v4298_v63  ;;  %v3077_v35 = vld [vmem:[#allocation8 + $0xb88] sm:$0xff]  ;;  %v3435_v63 = vld [vmem:[#allocation8 + $0xcd8] sm:$0xff] }
 0x1e5   : > { %5123 = vmatmul.mubr.f32.gmra.mxu1 %v6533_v60  ;;  %5149 = vmatprep.subr.mxu1 %v3079_v55  ;;  %v3419_v15 = vld [vmem:[#allocation8 + $0xc58] sm:$0xff] }
 0x1e6   : > { %2827 = vmatprep.mubr.f32.mxu0 %v6537_v44  ;;  %4684 = vmatpush3.msra.mxu0 %v3046_v13  ;;  %v1461_v48 = vadd.f32 %v4942_v36, %v4300_v6  ;;  %v4301_v49 = vpop.f32.mrf.mxu0  ;;  %v3436_v36 = vld [vmem:[#allocation8 + $0xce0] sm:$0xff]  ;;  %v3434_v6 = vld [vmem:[#allocation8 + $0xcd0] sm:$0xff] }
 0x1e7   : > { %5150 = vmatpush3.msra.mxu1 %v3079_v55  ;;  %2828 = vmatmul.mubr.f32.gmra.mxu0 %v6514_v24  ;;  %v3452_v13 = vld [vmem:[#allocation8 + $0xd60] sm:$0xff] }
 0x1e8   : > { %4685 = vmatprep.subr.mxu0 %v3061_v26  ;;  %5151 = vmatprep.subr.mxu1 %v3078_v10  ;;  %v6546_v4 = vadd.f32 %v1461_v48, %v6419_v22  ;;  %v4302_v3 = vpop.f32.mrf.mxu0 }
 0x1e9   : > { %4686 = vmatpush3.msra.mxu0 %v3045_v33  ;;  %5152 = vmatpush3.msra.mxu1 %v3078_v10  ;;  %v4303_v57 = vadd.f32 %v4302_v3, %v4301_v49  ;;  %v3451_v33 = vld [vmem:[#allocation8 + $0xd58] sm:$0xff]  ;;  %v3450_v3 = vld [vmem:[#allocation8 + $0xd50] sm:$0xff] }
 0x1ea   : > { %4687 = vmatprep.subr.mxu0 %v3060_v21  ;;  %v4945_v31 = vpop.f32.mrf.mxu1  ;;  %5153 = vmatprep.subr.mxu1 %v3077_v35  ;;  %v3418_v21 = vld [vmem:[#allocation8 + $0xc50] sm:$0xff] }
 0x1eb   : > { %4688 = vmatpush3.msra.mxu0 %v3044_v23  ;;  %3156 = vmatprep.mubr.f32.mxu0 %v6434_v28 }
 0x1ec   : > { %5154 = vmatpush3.msra.mxu1 %v3077_v35  ;;  %v1465_v42 = vpop.f32.mrf.mxu1  ;;  %3157 = vmatmul.mubr.f32.vlgmr.msra.gmra.mxu0 %v6414_v62  ;;  %v4304_v22 = vpop.f32.mrf.mxu0  ;;  %v3433_v35 = vld [vmem:[#allocation8 + $0xcc8] sm:$0xff] }
 0x1ed   : > { %5155 = vmatprep.subr.mxu1 %v3076_v41  ;;  %v1466_v50 = vadd.f32 %v4303_v57, %v1465_v42  ;;  %4737 = vmatprep.subr.mxu0 %v3439_v29  ;;  %v3432_v57 = vld [vmem:[#allocation8 + $0xcc0] sm:$0xff] }
 0x1ee   : > { %5156 = vmatpush3.msra.mxu1 %v3076_v41  ;;  %5157 = vmatprep.mubr.f32.mxu1 %v6431_v45  ;;  %v4305_v28 = vpop.f32.mrf.mxu0  ;;  %v3417_v41 = vld [vmem:[#allocation8 + $0xc48] sm:$0xff] }
 0x1ef   : > { %4738 = vmatpush3.msra.mxu0 %v3423_v8  ;;  %v6552_v43 = vadd.f32 %v1466_v50, %v6438_v34  ;;  %5158 = vmatmul.mubr.f32.vlgmr.msra.gmra.mxu1 %v6457_v16  ;;  %v4306_v62 = vadd.f32 %v4305_v28, %v4304_v22  ;;  %v3453_v34 = vld [vmem:[#allocation8 + $0xd68] sm:$0xff]  ;;  %v3416_v8 = vld [vmem:[#allocation8 + $0xc40] sm:$0xff]  ;;  %v3431_v22 = vld [vmem:[#allocation8 + $0xcb8] sm:$0xff] }
 0x1f0   : > { %4739 = vmatprep.subr.mxu0 %v3438_v46  ;;  %5169 = vmatprep.subr.mxu1 %v3455_v61  ;;  %v3415_v28 = vld [vmem:[#allocation8 + $0xc38] sm:$0xff] }
 0x1f1   : > { %3161 = vmatprep.mubr.f32.mxu0 %v6449_v12  ;;  %4740 = vmatpush3.msra.mxu0 %v3422_v38  ;;  %v1471_v45 = vadd.f32 %v4945_v31, %v4306_v62  ;;  %v4307_v37 = vpop.f32.mrf.mxu0  ;;  %v3448_v38 = vld [vmem:[#allocation8 + $0xd40] sm:$0xff]  ;;  %v3430_v62 = vld [vmem:[#allocation8 + $0xcb0] sm:$0xff] }
 0x1f2   : > { %5170 = vmatpush3.msra.mxu1 %v3455_v61  ;;  %3162 = vmatmul.mubr.f32.gmra.mxu0 %v6426_v19 }
 0x1f3   : > { %4741 = vmatprep.subr.mxu0 %v3437_v39  ;;  %5171 = vmatprep.subr.mxu1 %v3454_v0  ;;  %v6558_v40 = vadd.f32 %v1471_v45, %v6451_v1  ;;  %v4308_v56 = vpop.f32.mrf.mxu0 }
 0x1f4   : > { %4742 = vmatpush3.msra.mxu0 %v3421_v58  ;;  %5172 = vmatpush3.msra.mxu1 %v3454_v0  ;;  %v4309_v52 = vadd.f32 %v4308_v56, %v4307_v37  ;;  %v3447_v58 = vld [vmem:[#allocation8 + $0xd38] sm:$0xff] }
 0x1f5   : > { %4743 = vmatprep.subr.mxu0 %v3436_v36  ;;  %v4948_v55 = vpop.f32.mrf.mxu1  ;;  %5173 = vmatprep.subr.mxu1 %v3453_v34  ;;  %v3414_v36 = vld [vmem:[#allocation8 + $0xc30] sm:$0xff] }
 0x1f6   : > { %3166 = vmatprep.mubr.f32.mxu0 %v6470_v30  ;;  %4744 = vmatpush3.msra.mxu0 %v3420_v47  ;;  %v3446_v47 = vld [vmem:[#allocation8 + $0xd30] sm:$0xff] }
 0x1f7   : > { %5174 = vmatpush3.msra.mxu1 %v3453_v34  ;;  %v1475_v26 = vpop.f32.mrf.mxu1  ;;  %3167 = vmatmul.mubr.f32.gmra.mxu0 %v6442_v32  ;;  %v4310_v1 = vpop.f32.mrf.mxu0  ;;  %v3429_v34 = vld [vmem:[#allocation8 + $0xca8] sm:$0xff] }
 0x1f8   : > { %4745 = vmatprep.subr.mxu0 %v3435_v63  ;;  %v1476_v10 = vadd.f32 %v4309_v52, %v1475_v26  ;;  %5175 = vmatprep.subr.mxu1 %v3452_v13  ;;  %v3413_v63 = vld [vmem:[#allocation8 + $0xc28] sm:$0xff]  ;;  %v6581_v52 = vld [vmem:[%s6032_s17 + $0x80] sm:$0xff] }
 0x1f9   : > { %5160 = vmatprep.mubr.f32.mxu1 %v6466_v5  ;;  %4746 = vmatpush3.msra.mxu0 %v3419_v15  ;;  %v4311_v49 = vpop.f32.mrf.mxu0  ;;  %v3445_v26 = vld [vmem:[#allocation8 + $0xd28] sm:$0xff] }
 0x1fa   : > { %5176 = vmatpush3.msra.mxu1 %v3452_v13  ;;  %v6564_v48 = vadd.f32 %v1476_v10, %v6474_v25  ;;  %4747 = vmatprep.subr.mxu0 %v3434_v6  ;;  %v4312_v23 = vadd.f32 %v4311_v49, %v4310_v1  ;;  %v3449_v25 = vld [vmem:[#allocation8 + $0xd48] sm:$0xff]  ;;  %v3428_v13 = vld [vmem:[#allocation8 + $0xca0] sm:$0xff]  ;;  %v3032_v1 = vrot.slane %v6581_v52, 2  ;;  %v3427_v49 = vld [vmem:[#allocation8 + $0xc98] sm:$0xff] }
 0x1fb   : > { %5161 = vmatmul.mubr.f32.gmra.mxu1 %v6493_v2  ;;  %5177 = vmatprep.subr.mxu1 %v3451_v33  ;;  %v3412_v6 = vld [vmem:[#allocation8 + $0xc20] sm:$0xff] }
 0x1fc   : > { %3171 = vmatprep.mubr.f32.mxu0 %v6485_v51  ;;  %4748 = vmatpush3.msra.mxu0 %v3418_v21  ;;  %v1481_v31 = vadd.f32 %v4948_v55, %v4312_v23  ;;  %v4369_v29 = vpop.f32.mrf.mxu0  ;;  %v4070_v55 = vld [vmem:[%s6032_s17 + $0x88] sm:$0xff] }
 0x1fd   : > { %5178 = vmatpush3.msra.mxu1 %v3451_v33  ;;  %3172 = vmatmul.mubr.f32.gmra.mxu0 %v6460_v17  ;;  %v3033_v10 = vrot.slane %v4070_v55, 2  ;;  %v3001_v23 = vrot.slane %v4070_v55, 1 }
 0x1fe   : > { %4749 = vmatprep.subr.mxu0 %v3433_v35  ;;  %5179 = vmatprep.subr.mxu1 %v3450_v3  ;;  %v6570_v42 = vadd.f32 %v1481_v31, %v6487_v53  ;;  %v4370_v46 = vpop.f32.mrf.mxu0  ;;  %v3000_v35 = vrot.slane %v6581_v52, 1  ;;  %v3411_v31 = vld [vmem:[#allocation8 + $0xc18] sm:$0xff] }
 0x1ff   : > { %4750 = vmatpush3.msra.mxu0 %v3417_v41  ;;  %5180 = vmatpush3.msra.mxu1 %v3450_v3  ;;  %v4371_v50 = vadd.f32 %v4370_v46, %v4369_v29  ;;  %v4983_v61 = vpop.f32.mrf.mxu1 }
 0x200   : > { %4751 = vmatprep.subr.mxu0 %v3432_v57  ;;  %5181 = vmatprep.subr.mxu1 %v3449_v25  ;;  %v3444_v57 = vld [vmem:[#allocation8 + $0xd20] sm:$0xff] }
 0x201   : > { %3176 = vmatprep.mubr.f32.mxu0 %v6505_v7  ;;  %4752 = vmatpush3.msra.mxu0 %v3416_v8  ;;  %v1808_v39 = vpop.f32.mrf.mxu1 }
 0x202   : > { %5182 = vmatpush3.msra.mxu1 %v3449_v25  ;;  %3177 = vmatmul.mubr.f32.gmra.mxu0 %v6478_v59  ;;  %v4372_v53 = vpop.f32.mrf.mxu0  ;;  %v1809_v0 = vadd.f32 %v4371_v50, %v1808_v39  ;;  %v3426_v25 = vld [vmem:[#allocation8 + $0xc90] sm:$0xff]  ;;  %v6597_v50 = vsel %vm448_vm0, %v3000_v35, %v3001_v23  ;;  %v3425_v39 = vld [vmem:[#allocation8 + $0xc88] sm:$0xff] }
 0x203   : > { %4753 = vmatprep.subr.mxu0 %v3431_v22  ;;  %5183 = vmatprep.subr.mxu1 %v3448_v38  ;;  %v3443_v22 = vld [vmem:[#allocation8 + $0xd18] sm:$0xff] }
 0x204   : > { %5163 = vmatprep.mubr.f32.mxu1 %v6501_v9  ;;  %4754 = vmatpush3.msra.mxu0 %v3415_v28  ;;  %v6576_v45 = vadd.f32 %v1809_v0, %v6509_v20  ;;  %v4373_v37 = vpop.f32.mrf.mxu0  ;;  %v3409_v0 = vld [vmem:[#allocation8 + $0xc08] sm:$0xff] }
 0x205   : > { %5184 = vmatpush3.msra.mxu1 %v3448_v38  ;;  %4755 = vmatprep.subr.mxu0 %v3430_v62  ;;  %v4374_v56 = vadd.f32 %v4373_v37, %v4372_v53  ;;  %v3442_v53 = vld [vmem:[#allocation8 + $0xd10] sm:$0xff] }
 0x206   : > { %5164 = vmatmul.mubr.f32.gmra.mxu1 %v6529_v18  ;;  %5185 = vmatprep.subr.mxu1 %v3447_v58 }
 0x207   : > { %3181 = vmatprep.mubr.f32.mxu0 %v6520_v27  ;;  %4756 = vmatpush3.msra.mxu0 %v3414_v36  ;;  %v1814_v15 = vadd.f32 %v4983_v61, %v4374_v56  ;;  %v4375_v20 = vpop.f32.mrf.mxu0  ;;  %v3410_v61 = vld [vmem:[#allocation8 + $0xc10] sm:$0xff] }
 0x208   : > { %5186 = vmatpush3.msra.mxu1 %v3447_v58  ;;  %3182 = vmatmul.mubr.f32.gmra.mxu0 %v6496_v14  ;;  %v3424_v58 = vld [vmem:[#allocation8 + $0xc80] sm:$0xff] }
 0x209   : > { %4757 = vmatprep.subr.mxu0 %v3429_v34  ;;  %5187 = vmatprep.subr.mxu1 %v3446_v47  ;;  %v6587_v33 = vadd.f32 %v1814_v15, %v6524_v11  ;;  %v4376_v21 = vpop.f32.mrf.mxu0  ;;  %v6593_v11 = vsel %vm481_vm1, %v3032_v1, %v3033_v10  ;;  %v3408_v34 = vld [vmem:[#allocation8 + $0xc00] sm:$0xff]  ;;  %v4086_v1 = vld [vmem:[%s6032_s17 + $0x98] sm:$0xff] }
 0x20a   : > { %4758 = vmatpush3.msra.mxu0 %v3413_v63  ;;  %5188 = vmatpush3.msra.mxu1 %v3446_v47  ;;  %v4377_v3 = vadd.f32 %v4376_v21, %v4375_v20  ;;  %v3440_v63 = vld [vmem:[#allocation8 + $0xd00] sm:$0xff] }
 0x20b   : > { %4759 = vmatprep.subr.mxu0 %v3428_v13  ;;  %v4986_v41 = vpop.f32.mrf.mxu1  ;;  %5189 = vmatprep.subr.mxu1 %v3445_v26 }
 0x20c   : > { %3186 = vmatprep.mubr.f32.mxu0 %v6537_v44  ;;  %4760 = vmatpush3.msra.mxu0 %v3412_v6 }
 0x20d   : > { %5190 = vmatpush3.msra.mxu1 %v3445_v26  ;;  %v1818_v29 = vpop.f32.mrf.mxu1  ;;  %3187 = vmatmul.mubr.f32.gmra.mxu0 %v6514_v24  ;;  %v4378_v8 = vpop.f32.mrf.mxu0 }
 0x20e   : > { %4761 = vmatprep.subr.mxu0 %v3427_v49  ;;  %v1819_v46 = vadd.f32 %v4377_v3, %v1818_v29  ;;  %5191 = vmatprep.subr.mxu1 %v3444_v57  ;;  %v3365_v3 = vrot.slane %v4086_v1, 1 }
 0x20f   : > { %5166 = vmatprep.mubr.f32.mxu1 %v6533_v60  ;;  %4762 = vmatpush3.msra.mxu0 %v3411_v31  ;;  %v4379_v28 = vpop.f32.mrf.mxu0 }
 0x210   : > { %5192 = vmatpush3.msra.mxu1 %v3444_v57  ;;  %v6600_v38 = vadd.f32 %v1819_v46, %v6540_v54  ;;  %4763 = vmatprep.subr.mxu0 %v3426_v25  ;;  %v4380_v62 = vadd.f32 %v4379_v28, %v4378_v8  ;;  %v3441_v54 = vld [vmem:[#allocation8 + $0xd08] sm:$0xff] }
 0x211   : > { %5167 = vmatmul.mubr.f32.gmra.mxu1 %v6593_v11  ;;  %5193 = vmatprep.subr.mxu1 %v3443_v22 }
 0x212   : > { %3191 = vmatprep.mubr.f32.mxu0 %v6597_v50  ;;  %4764 = vmatpush3.msra.mxu0 %v3410_v61  ;;  %v1824_v36 = vadd.f32 %v4986_v41, %v4380_v62  ;;  %v4381_v37 = vpop.f32.mrf.mxu0 }
 0x213   : > { %5194 = vmatpush3.msra.mxu1 %v3443_v22  ;;  %3192 = vmatmul.mubr.f32.gmra.mxu0 %v6581_v52 }
 0x214   : > { %4765 = vmatprep.subr.mxu0 %v3425_v39  ;;  %5195 = vmatprep.subr.mxu1 %v3442_v53  ;;  %v6606_v47 = vadd.f32 %v1824_v36, %v6546_v4  ;;  %v4382_v56 = vpop.f32.mrf.mxu0 }
 0x215   : > { %4766 = vmatpush3.msra.mxu0 %v3409_v0  ;;  %5196 = vmatpush3.msra.mxu1 %v3442_v53  ;;  %v4383_v55 = vadd.f32 %v4382_v56, %v4381_v37 }
 0x216   : > { %4767 = vmatprep.subr.mxu0 %v3424_v58  ;;  %v4989_v13 = vpop.f32.mrf.mxu1  ;;  %5197 = vmatprep.subr.mxu1 %v3441_v54 }
 0x217   : > { %4768 = vmatpush3.msra.mxu0 %v3408_v34  ;;  %3520 = vmatprep.mubr.f32.mxu0 %v6449_v12 }
 0x218   : > { %5198 = vmatpush3.msra.mxu1 %v3441_v54  ;;  %v1828_v15 = vpop.f32.mrf.mxu1  ;;  %3521 = vmatmul.mubr.f32.vlgmr.msra.gmra.mxu0 %v6426_v19  ;;  %v4384_v20 = vpop.f32.mrf.mxu0  ;;  %v4085_v19 = vld [vmem:[%s6032_s17 + $0x90] sm:$0xff]  ;;  %s5500_s17 = scalar_lea.vmem %s5499_s5, 2048 }
 0x219   : > { %5199 = vmatprep.subr.mxu1 %v3440_v63  ;;  %v1829_v4 = vadd.f32 %v4383_v55, %v1828_v15  ;;  %5201 = vmatprep.mubr.f32.mxu1 %v6457_v16  ;;  %v3396_v16 = vrot.slane %v4085_v19, 2  ;;  %v3364_v23 = vrot.slane %v4085_v19, 1  ;;  %p5502_p1 = scmp.lt.s32.totalorder %s5500_s17, %s5494_s11 }
 0x21a   : > { %5200 = vmatpush3.msra.mxu1 %v3440_v63  ;;  %3525 = vmatprep.mubr.f32.mxu0 %v6470_v30  ;;  %v4385_v12 = vpop.f32.mrf.mxu0 }
 0x21b   : > { %5202 = vmatmul.mubr.f32.vlgmr.msra.gmra.mxu1 %v6466_v5  ;;  %v6614_v26 = vadd.f32 %v1829_v4, %v6552_v43  ;;  %v4386_v6 = vadd.f32 %v4385_v12, %v4384_v20  ;;  %v3397_v5 = vrot.slane %v4086_v1, 2  ;;  %p5503_p6 = por %p5502_p1, %p5501_p7 }
 0x21c   : > { %5204 = vmatprep.mubr.f32.mxu1 %v6493_v2  ;;  %3526 = vmatmul.mubr.f32.gmra.mxu0 %v6442_v32 }
 0x21d   : > { %3530 = vmatprep.mubr.f32.mxu0 %v6485_v51  ;;  %v1834_v10 = vadd.f32 %v4989_v13, %v4386_v6  ;;  %v4387_v21 = vpop.f32.mrf.mxu0  ;;  %p5504_p2 = pnand %p5503_p6, %p5497_p4 }
 0x21f   : > { %5205 = vmatmul.mubr.f32.gmra.mxu1 %v6501_v9  ;;  %v6624_v30 = vadd.f32 %v1834_v10, %v6558_v40  ;;  %v4388_v43 = vpop.f32.mrf.mxu0  ;;  %v3398_v9 = vsel %vm481_vm1, %v3396_v16, %v3397_v5 }
 0x220   : > { %5207 = vmatprep.mubr.f32.mxu1 %v6529_v18  ;;  %3531 = vmatmul.mubr.f32.gmra.mxu0 %v6460_v17  ;;  %v4389_v2 = vadd.f32 %v4388_v43, %v4387_v21 }
 0x221   : > { %v4992_v32 = vpop.f32.mrf.mxu1  ;;  %3535 = vmatprep.mubr.f32.mxu0 %v6505_v7 }
 0x223   : > { %5208 = vmatmul.mubr.f32.gmra.mxu1 %v6533_v60  ;;  %v1838_v51 = vpop.f32.mrf.mxu1  ;;  %v4390_v18 = vpop.f32.mrf.mxu0 }
 0x224   : > { %5210 = vmatprep.mubr.f32.mxu1 %v6593_v11  ;;  %v1839_v49 = vadd.f32 %v4389_v2, %v1838_v51  ;;  %3536 = vmatmul.mubr.f32.gmra.mxu0 %v6478_v59 }
 0x225   : > { %3540 = vmatprep.mubr.f32.mxu0 %v6520_v27  ;;  %v4391_v17 = vpop.f32.mrf.mxu0 }
 0x226   : > { %v1853_v40 = vadd.f32 %v1839_v49, %v6564_v48  ;;  %v4392_v35 = vadd.f32 %v4391_v17, %v4390_v18  ;;  %v3366_v48 = vsel %vm448_vm0, %v3364_v23, %v3365_v3 }
 0x227   : > { %5211 = vmatmul.mubr.f32.gmra.mxu1 %v3398_v9 }
 0x228   : > { %3541 = vmatmul.mubr.f32.gmra.mxu0 %v6496_v14  ;;  %v1844_v7 = vadd.f32 %v4992_v32, %v4392_v35  ;;  %v4449_v60 = vpop.f32.mrf.mxu0 }
 0x229   : > { %3545 = vmatprep.mubr.f32.mxu0 %v6537_v44 }
 0x22a   : > { %v1854_v41 = vadd.f32 %v1844_v7, %v6570_v42  ;;  %v4450_v57 = vpop.f32.mrf.mxu0 }
 0x22b   : > { %v4451_v31 = vadd.f32 %v4450_v57, %v4449_v60  ;;  %v5027_v59 = vpop.f32.mrf.mxu1 }
 0x22c   : > { %3546 = vmatmul.mubr.f32.gmra.mxu0 %v6514_v24 }
 0x22d   : > { %3550 = vmatprep.mubr.f32.mxu0 %v6597_v50  ;;  %v2172_v27 = vpop.f32.mrf.mxu1 }
 0x22e   : > { %v4452_v29 = vpop.f32.mrf.mxu0  ;;  %v2173_v14 = vadd.f32 %v4451_v31, %v2172_v27 }
 0x230   : > { %3551 = vmatmul.mubr.f32.gmra.mxu0 %v6581_v52  ;;  %v2211_v44 = vadd.f32 %v2173_v14, %v6576_v45  ;;  %v4453_v11 = vpop.f32.mrf.mxu0 }
 0x231   : > { %3555 = vmatprep.mubr.f32.mxu0 %v3366_v48  ;;  %v4454_v25 = vadd.f32 %v4453_v11, %v4452_v29 }
 0x233   : > { %v2178_v42 = vadd.f32 %v5027_v59, %v4454_v25  ;;  %v4455_v8 = vpop.f32.mrf.mxu0 }
 0x234   : > { %3556 = vmatmul.mubr.f32.gmra.mxu0 %v4085_v19 }
 0x235   : > { %v2212_v46 = vadd.f32 %v2178_v42, %v6587_v33  ;;  %v4456_v24 = vpop.f32.mrf.mxu0 }
 0x236   : > { %v4457_v22 = vadd.f32 %v4456_v24, %v4455_v8 }
 0x237   : > { %v5030_v50 = vpop.f32.mrf.mxu1 }
 0x239   : > { %v2182_v61 = vpop.f32.mrf.mxu1  ;;  %v4458_v28 = vpop.f32.mrf.mxu0 }
 0x23a   : > { %v2183_v39 = vadd.f32 %v4457_v22, %v2182_v61 }
 0x23b   : > { %v4459_v53 = vpop.f32.mrf.mxu0 }
 0x23c   : > { %v2213_v62 = vadd.f32 %v2183_v39, %v6600_v38  ;;  %v4460_v52 = vadd.f32 %v4459_v53, %v4458_v28 }
 0x23e   : > { %v2188_v0 = vadd.f32 %v5030_v50, %v4460_v52  ;;  %v4461_v45 = vpop.f32.mrf.mxu0 }
 0x240   : > { %v2214_v58 = vadd.f32 %v2188_v0, %v6606_v47  ;;  %v4462_v36 = vpop.f32.mrf.mxu0 }
 0x241   : > { %v4463_v37 = vadd.f32 %v4462_v36, %v4461_v45 }
 0x242   : > { %v5033_v54 = vpop.f32.mrf.mxu1 }
 0x244   : > { %v2192_v34 = vpop.f32.mrf.mxu1  ;;  %v4464_v56 = vpop.f32.mrf.mxu0 }
 0x245   : > { %v2193_v33 = vadd.f32 %v4463_v37, %v2192_v34 }
 0x246   : > { %v4465_v55 = vpop.f32.mrf.mxu0 }
 0x247   : > { %v2215_v63 = vadd.f32 %v2193_v33, %v6614_v26  ;;  %v4466_v13 = vadd.f32 %v4465_v55, %v4464_v56 }
 0x249   : > { %v2198_v15 = vadd.f32 %v5033_v54, %v4466_v13  ;;  %v4467_v20 = vpop.f32.mrf.mxu0 }
 0x24b   : > { %v2216_v38 = vadd.f32 %v2198_v15, %v6624_v30  ;;  %v4468_v4 = vpop.f32.mrf.mxu0 }
 0x24c   : > { %v4469_v12 = vadd.f32 %v4468_v4, %v4467_v20 }
 0x24d   : > { %v5036_v6 = vpop.f32.mrf.mxu1 }
 0x24f   : > { %v2202_v19 = vpop.f32.mrf.mxu1  ;;  %v4470_v1 = vpop.f32.mrf.mxu0 }
 0x250   : > { %v2203_v47 = vadd.f32 %v4469_v12, %v2202_v19 }
 0x251   : > { %v4471_v21 = vpop.f32.mrf.mxu0 }
 0x252   : > { %v2217_v10 = vadd.f32 %v2203_v47, %v1853_v40  ;;  %v4472_v16 = vadd.f32 %v4471_v21, %v4470_v1 }
 0x254   : > { %v2208_v5 = vadd.f32 %v5036_v6, %v4472_v16  ;;  %v4529_v43 = vpop.f32.mrf.mxu0 }
 0x256   : > { %v2218_v2 = vadd.f32 %v2208_v5, %v1854_v41  ;;  %v4530_v32 = vpop.f32.mrf.mxu0 }
 0x257   : > { %v4531_v26 = vadd.f32 %v4530_v32, %v4529_v43  ;;  %v5071_v51 = vpop.f32.mrf.mxu1 }
 0x259   : > { %v2536_v9 = vpop.f32.mrf.mxu1 }
 0x25a   : > { %v4532_v18 = vpop.f32.mrf.mxu0  ;;  %v2537_v49 = vadd.f32 %v4531_v26, %v2536_v9 }
 0x25c   : > { %v6647_v17 = vadd.f32 %v2537_v49, %v2211_v44  ;;  %v4533_v30 = vpop.f32.mrf.mxu0 }
 0x25d   : > { %v4534_v35 = vadd.f32 %v4533_v30, %v4532_v18 }
 0x25f   : > { %v2542_v7 = vadd.f32 %v5071_v51, %v4534_v35  ;;  %v4535_v60 = vpop.f32.mrf.mxu0 }
 0x261   : > { %v6649_v23 = vadd.f32 %v2542_v7, %v2212_v46  ;;  %v4536_v40 = vpop.f32.mrf.mxu0 }
 0x262   : > { %v4537_v3 = vadd.f32 %v4536_v40, %v4535_v60 }
 0x263   : > { %v5074_v57 = vpop.f32.mrf.mxu1 }
 0x265   : > { %v2546_v31 = vpop.f32.mrf.mxu1  ;;  %v4538_v59 = vpop.f32.mrf.mxu0 }
 0x266   : > { %v2547_v41 = vadd.f32 %v4537_v3, %v2546_v31 }
 0x267   : > { %v4539_v48 = vpop.f32.mrf.mxu0 }
 0x268   : > { %v6651_v27 = vadd.f32 %v2547_v41, %v2213_v62  ;;  %v4540_v29 = vadd.f32 %v4539_v48, %v4538_v59 }
 0x26a   : > { %v2552_v14 = vadd.f32 %v5074_v57, %v4540_v29  ;;  %v4541_v11 = vpop.f32.mrf.mxu0 }
 0x26c   : > { %v6653_v44 = vadd.f32 %v2552_v14, %v2214_v58  ;;  %v4542_v25 = vpop.f32.mrf.mxu0 }
 0x26d   : > { %v4543_v42 = vadd.f32 %v4542_v25, %v4541_v11 }
 0x26e   : > { %v5077_v8 = vpop.f32.mrf.mxu1 }
 0x270   : > { %v2556_v24 = vpop.f32.mrf.mxu1  ;;  %v4544_v46 = vpop.f32.mrf.mxu0 }
 0x271   : > { %v2557_v22 = vadd.f32 %v4543_v42, %v2556_v24 }
 0x272   : > { %v4545_v61 = vpop.f32.mrf.mxu0 }
 0x273   : > { %v6655_v50 = vadd.f32 %v2557_v22, %v2215_v63  ;;  %v4546_v28 = vadd.f32 %v4545_v61, %v4544_v46 }
 0x275   : > { %v2562_v39 = vadd.f32 %v5077_v8, %v4546_v28  ;;  %v4547_v53 = vpop.f32.mrf.mxu0 }
 0x277   : > { %v6657_v62 = vadd.f32 %v2562_v39, %v2216_v38  ;;  %v4548_v52 = vpop.f32.mrf.mxu0 }
 0x278   : > { %v4549_v0 = vadd.f32 %v4548_v52, %v4547_v53 }
 0x279   : > { %v5080_v45 = vpop.f32.mrf.mxu1 }
 0x27b   : > { %v2566_v36 = vpop.f32.mrf.mxu1  ;;  %v4550_v58 = vpop.f32.mrf.mxu0 }
 0x27c   : > { %v2567_v37 = vadd.f32 %v4549_v0, %v2566_v36 }
 0x27d   : > { %v4551_v34 = vpop.f32.mrf.mxu0 }
 0x27e   : > { %v6659_v54 = vadd.f32 %v2567_v37, %v2217_v10  ;;  %v4552_v56 = vadd.f32 %v4551_v34, %v4550_v58 }
 0x280   : > { %6978 = vst [vmem:[#allocation30_spill] sm:$0xff] %v6659_v54  ;;  %v2572_v33 = vadd.f32 %v5080_v45, %v4552_v56  ;;  %v4609_v55 = vpop.f32.mrf.mxu0 }
 0x282   : > { %v6661_v63 = vadd.f32 %v2572_v33, %v2218_v2  ;;  %v4610_v13 = vpop.f32.mrf.mxu0 }
 0x283   : > { %v5115_v2 = vpop.f32.mrf.mxu1  ;;  %v4611_v28 = vadd.f32 %v4610_v13, %v4609_v55 }
 0x284   : > { %6979 = vst [vmem:[#allocation31_spill] sm:$0xff] %v6661_v63 }
 0x285   : > { %v2899_v26 = vpop.f32.mrf.mxu1 }
 0x286   : > { %v4612_v15 = vpop.f32.mrf.mxu0  ;;  %v2900_v45 = vadd.f32 %v4611_v28, %v2899_v26 }
 0x288   : > { %v4613_v20 = vpop.f32.mrf.mxu0  ;;  %v2938_v55 = vadd.f32 %v2900_v45, %v6647_v17 }
 0x289   : > { %v4614_v36 = vadd.f32 %v4613_v20, %v4612_v15 }
 0x28b   : > { %v4615_v4 = vpop.f32.mrf.mxu0  ;;  %v2905_v13 = vadd.f32 %v5115_v2, %v4614_v36 }
 0x28d   : > { %v4616_v38 = vpop.f32.mrf.mxu0 }
 0x28e   : > { %v4617_v33 = vadd.f32 %v4616_v38, %v4615_v4  ;;  %v2939_v4 = vadd.f32 %v2905_v13, %v6649_v23 }
 0x28f   : > { %v6681_v9 = vpop.f32.mrf.mxu1 }
 0x291   : > { %v6663_v12 = vpop.f32.mrf.mxu0  ;;  %v2909_v49 = vpop.f32.mrf.mxu1 }
 0x292   : > { %v2910_v15 = vadd.f32 %v4617_v33, %v2909_v49 }
 0x293   : > { %v4619_v6 = vpop.f32.mrf.mxu0 }
 0x294   : > { %v4620_v20 = vadd.f32 %v4619_v6, %v6663_v12 }
 0x296   : > { %v6665_v19 = vpop.f32.mrf.mxu0  ;;  %v2915_v12 = vadd.f32 %v6681_v9, %v4620_v20 }
 0x298   : > { %v6667_v1 = vpop.f32.mrf.mxu0 }
 0x299   : > { %v4623_v23 = vadd.f32 %v6667_v1, %v6665_v19 }
 0x29a   : > { %v6683_v35 = vpop.f32.mrf.mxu1 }
 0x29c   : > { %v6669_v47 = vpop.f32.mrf.mxu0  ;;  %v6685_v40 = vpop.f32.mrf.mxu1 }
 0x29d   : > { %v2920_v19 = vadd.f32 %v4623_v23, %v6685_v40 }
 0x29e   : > { %v6671_v10 = vpop.f32.mrf.mxu0 }
 0x29f   : > { %v4626_v9 = vadd.f32 %v6671_v10, %v6669_v47 }
 0x2a1   : > { %v6673_v21 = vpop.f32.mrf.mxu0  ;;  %v2925_v47 = vadd.f32 %v6683_v35, %v4626_v9 }
 0x2a3   : > { %v6675_v16 = vpop.f32.mrf.mxu0 }
 0x2a4   : > { %v4629_v10 = vadd.f32 %v6675_v16, %v6673_v21  ;;  %v2943_v21 = vadd.f32 %v2925_v47, %v6657_v62 }
 0x2a5   : > { %v6687_v3 = vpop.f32.mrf.mxu1 }
 0x2a6   : > { %6980 = vst [vmem:[#allocation32_spill] sm:$0xff] %v6687_v3 }
 0x2a7   : > { %v6677_v5 = vpop.f32.mrf.mxu0  ;;  %v6689_v59 = vpop.f32.mrf.mxu1 }
 0x2a8   : > { %v2930_v16 = vadd.f32 %v4629_v10, %v6689_v59 }
 0x2a9   : > { %v6679_v43 = vpop.f32.mrf.mxu0 }
 0x2ac   : > { %v4689_v32 = vpop.f32.mrf.mxu0 }
 0x2ae   : > { %v4690_v51 = vpop.f32.mrf.mxu0 }
 0x2af   : > { %v5159_v41 = vpop.f32.mrf.mxu1  ;;  %v4691_v52 = vadd.f32 %v4690_v51, %v4689_v32 }
 0x2b1   : > { %v3263_v14 = vpop.f32.mrf.mxu1 }
 0x2b2   : > { %v4692_v18 = vpop.f32.mrf.mxu0  ;;  %v3264_v34 = vadd.f32 %v4691_v52, %v3263_v14 }
 0x2b4   : > { %v4693_v30 = vpop.f32.mrf.mxu0  ;;  %v3302_v51 = vadd.f32 %v3264_v34, %v2938_v55 }
 0x2b5   : > { %v4694_v56 = vadd.f32 %v4693_v30, %v4692_v18 }
 0x2b7   : > { %v4695_v7 = vpop.f32.mrf.mxu0 }
 0x2b9   : > { %v4696_v60 = vpop.f32.mrf.mxu0 }
 0x2bb   : > { %v5162_v11 = vpop.f32.mrf.mxu1 }
 0x2bd   : > { %v4698_v57 = vpop.f32.mrf.mxu0  ;;  %v3273_v8 = vpop.f32.mrf.mxu1 }
 0x2bf   : > { %v4699_v31 = vpop.f32.mrf.mxu0 }
 0x2c0   : > { %v4700_v17 = vadd.f32 %v4699_v31, %v4698_v57 }
 0x2c2   : > { %v4701_v48 = vpop.f32.mrf.mxu0  ;;  %v3279_v31 = vadd.f32 %v5162_v11, %v4700_v17 }
 0x2c4   : > { %v4702_v29 = vpop.f32.mrf.mxu0 }
 0x2c6   : > { %v6697_v46 = vpop.f32.mrf.mxu1 }
 0x2c8   : > { %v6691_v25 = vpop.f32.mrf.mxu0  ;;  %v6701_v61 = vpop.f32.mrf.mxu1 }
 0x2ca   : > { %v6693_v42 = vpop.f32.mrf.mxu0 }
 0x2cd   : > { %v6695_v24 = vpop.f32.mrf.mxu0 }
 0x2cf   : > { %v6699_v22 = vpop.f32.mrf.mxu0 }
 0x2d1   : > { %v6705_v53 = vpop.f32.mrf.mxu1 }
 0x2d2   : > { %6982 = vst [vmem:[#allocation34_spill] sm:$0xff] %v6705_v53 }
 0x2d3   : > { %v6703_v39 = vpop.f32.mrf.mxu0  ;;  %v6709_v58 = vpop.f32.mrf.mxu1 }
 0x2d4   : > { %6981 = vst [vmem:[#allocation33_spill] sm:$0xff] %v6703_v39  ;;  %v4697_v39 = vadd.f32 %v4696_v60, %v4695_v7 }
 0x2d5   : > { %v6707_v0 = vpop.f32.mrf.mxu0 }
 0x2d6   : > { %6983 = vst [vmem:[#allocation35_spill] sm:$0xff] %v6707_v0  ;;  %v3269_v0 = vadd.f32 %v5159_v41, %v4694_v56  ;;  %v3274_v30 = vadd.f32 %v4697_v39, %v3273_v8  ;;  %v4703_v8 = vadd.f32 %v4702_v29, %v4701_v48  ;;  %v4706_v29 = vadd.f32 %v6693_v42, %v6691_v25 }
 0x2d8   : > { %v4769_v37 = vpop.f32.mrf.mxu0  ;;  %v3284_v56 = vadd.f32 %v4703_v8, %v6701_v61  ;;  %v3289_v42 = vadd.f32 %v6697_v46, %v4706_v29  ;;  %v4709_v61 = vadd.f32 %v6699_v22, %v6695_v24  ;;  %v4632_v46 = vadd.f32 %v6679_v43, %v6677_v5  ;;  %v6989_v43 = vld [vmem:[#allocation32_spill] sm:$0xff] }
 0x2d9   : > { %v6990_v8 = vld [vmem:[#allocation34_spill] sm:$0xff] }
 0x2da   : > { %v4770_v63 = vpop.f32.mrf.mxu0  ;;  %v2935_v23 = vadd.f32 %v6989_v43, %v4632_v46 }
 0x2db   : > { %v5203_v3 = vpop.f32.mrf.mxu1  ;;  %v4771_v54 = vadd.f32 %v4770_v63, %v4769_v37  ;;  %v3303_v63 = vadd.f32 %v3269_v0, %v2939_v4 }
 0x2dc   : > { %v4772_v53 = vpop.f32.mrf.mxu0 }
 0x2dd   : > { %v3627_v32 = vpop.f32.mrf.mxu1 }
 0x2de   : > { %v3628_v26 = vadd.f32 %v4771_v54, %v3627_v32  ;;  %v4773_v28 = vpop.f32.mrf.mxu0  ;;  %v2940_v54 = vadd.f32 %v2910_v15, %v6651_v27  ;;  %v2941_v27 = vadd.f32 %v2915_v12, %v6653_v44  ;;  %v2942_v32 = vadd.f32 %v2920_v19, %v6655_v50  ;;  %v6988_v12 = vld [vmem:[#allocation30_spill] sm:$0xff] }
 0x2df   : > { %v5206_v14 = vpop.f32.mrf.mxu1  ;;  %v4774_v18 = vadd.f32 %v4773_v28, %v4772_v53 }
 0x2e0   : > { %v3666_v38 = vadd.f32 %v3628_v26, %v3302_v51  ;;  %v4775_v2 = vpop.f32.mrf.mxu0  ;;  %v3304_v57 = vadd.f32 %v3274_v30, %v2940_v54  ;;  %v3305_v48 = vadd.f32 %v3279_v31, %v2941_v27  ;;  %v3306_v20 = vadd.f32 %v3284_v56, %v2942_v32  ;;  %v6991_v27 = vld [vmem:[#allocation31_spill] sm:$0xff] }
 0x2e1   : > { %v3633_v7 = vadd.f32 %v5203_v3, %v4774_v18  ;;  %v3637_v49 = vpop.f32.mrf.mxu1  ;;  %v3307_v18 = vadd.f32 %v3289_v42, %v2943_v21  ;;  %v3294_v30 = vadd.f32 %v4709_v61, %v6709_v58  ;;  %v2945_v9 = vadd.f32 %v2935_v23, %v6991_v27 }
 0x2e2   : > { %3674 = vst [vmem:[%s6715_s26] sm:$0xff] %v3666_v38  ;;  %v4776_v6 = vpop.f32.mrf.mxu0  ;;  %v3696_v53 = vmul.f32 %v3666_v38, %v3666_v38 }
 0x2e3   : > { %v3667_v60 = vadd.f32 %v3633_v7, %v3303_v63  ;;  %v4777_v41 = vadd.f32 %v4776_v6, %v4775_v2  ;;  %v5209_v36 = vpop.f32.mrf.mxu1  ;;  %v6986_v2 = vld [vmem:[#allocation33_spill] sm:$0xff]  ;;  %v6987_v63 = vld [vmem:[#allocation35_spill] sm:$0xff]  ;;  %v2944_v6 = vadd.f32 %v2930_v16, %v6988_v12 }
 0x2e4   : > { %v4778_v39 = vpop.f32.mrf.mxu0  ;;  %v4712_v7 = vadd.f32 %v6987_v63, %v6986_v2 }
 0x2e5   : > { %3675 = vst [vmem:[%s6715_s26 + $0x8] sm:$0xff] %v3667_v60  ;;  %v3697_v52 = vmul.f32 %v3667_v60, %v3667_v60  ;;  %v3638_v3 = vadd.f32 %v4777_v41, %v3637_v49  ;;  %v3682_v0 = vadd.f32 %v3667_v60, %v3666_v38  ;;  %v3647_v13 = vpop.f32.mrf.mxu1 }
 0x2e6   : > { %v4779_v45 = vpop.f32.mrf.mxu0 }
 0x2e7   : > { %v3668_v1 = vadd.f32 %v3638_v3, %v3304_v57  ;;  %v3704_v37 = vadd.f32 %v3697_v52, %v3696_v53  ;;  %v4780_v11 = vadd.f32 %v4779_v45, %v4778_v39  ;;  %v5212_v4 = vpop.f32.mrf.mxu1  ;;  %v3308_v57 = vadd.f32 %v3294_v30, %v2944_v6 }
 0x2e8   : > { %v4781_v34 = vpop.f32.mrf.mxu0  ;;  %v3299_v39 = vadd.f32 %v6990_v8, %v4712_v7 }
 0x2e9   : > { %3676 = vst [vmem:[%s6715_s26 + $0x10] sm:$0xff] %v3668_v1  ;;  %v3683_v44 = vadd.f32 %v3682_v0, %v3668_v1  ;;  %v3698_v33 = vmul.f32 %v3668_v1, %v3668_v1  ;;  %v3643_v55 = vadd.f32 %v5206_v14, %v4780_v11  ;;  %v3657_v5 = vpop.f32.mrf.mxu1 }
 0x2ea   : > { %v4782_v40 = vpop.f32.mrf.mxu0  ;;  %v3309_v1 = vadd.f32 %v3299_v39, %v2945_v9 }
 0x2eb   : > { %v3705_v51 = vadd.f32 %v3704_v37, %v3698_v33  ;;  %v3669_v26 = vadd.f32 %v3643_v55, %v3305_v48  ;;  %v4783_v25 = vadd.f32 %v4782_v40, %v4781_v34 }
 0x2ec   : > { %v4784_v15 = vpop.f32.mrf.mxu0 }
 0x2ed   : > { %3677 = vst [vmem:[%s6715_s26 + $0x18] sm:$0xff] %v3669_v26  ;;  %v3699_v35 = vmul.f32 %v3669_v26, %v3669_v26  ;;  %v3648_v28 = vadd.f32 %v4783_v25, %v3647_v13  ;;  %v3684_v14 = vadd.f32 %v3683_v44, %v3669_v26 }
 0x2ee   : > { %v4785_v50 = vpop.f32.mrf.mxu0 }
 0x2ef   : > { %v3670_v38 = vadd.f32 %v3648_v28, %v3306_v20  ;;  %v3706_v24 = vadd.f32 %v3705_v51, %v3699_v35  ;;  %v4786_v22 = vadd.f32 %v4785_v50, %v4784_v15 }
 0x2f0   : > { %v4787_v17 = vpop.f32.mrf.mxu0 }
 0x2f1   : > { %3678 = vst [vmem:[%s6715_s26 + $0x20] sm:$0xff] %v3670_v38  ;;  %v3685_v62 = vadd.f32 %v3684_v14, %v3670_v38  ;;  %v3700_v59 = vmul.f32 %v3670_v38, %v3670_v38  ;;  %v3653_v54 = vadd.f32 %v5209_v36, %v4786_v22 }
 0x2f2   : > { %v4788_v49 = vpop.f32.mrf.mxu0 }
 0x2f3   : > { %v3707_v60 = vadd.f32 %v3706_v24, %v3700_v59  ;;  %v3671_v58 = vadd.f32 %v3653_v54, %v3307_v18  ;;  %v4789_v41 = vadd.f32 %v4788_v49, %v4787_v17 }
 0x2f4   : > { %v4790_v31 = vpop.f32.mrf.mxu0 }
 0x2f5   : > { %3679 = vst [vmem:[%s6715_s26 + $0x28] sm:$0xff] %v3671_v58  ;;  %v3701_v53 = vmul.f32 %v3671_v58, %v3671_v58  ;;  %v3658_v52 = vadd.f32 %v4789_v41, %v3657_v5  ;;  %v3686_v3 = vadd.f32 %v3685_v62, %v3671_v58 }
 0x2f6   : > { %v4791_v0 = vpop.f32.mrf.mxu0 }
 0x2f7   : > { %v3672_v45 = vadd.f32 %v3658_v52, %v3308_v57  ;;  %v3708_v36 = vadd.f32 %v3707_v60, %v3701_v53  ;;  %v4792_v19 = vadd.f32 %v4791_v0, %v4790_v31 }
 0x2f9   : > { %3680 = vst [vmem:[%s6715_s26 + $0x30] sm:$0xff] %v3672_v45  ;;  %v3687_v37 = vadd.f32 %v3686_v3, %v3672_v45  ;;  %v3702_v11 = vmul.f32 %v3672_v45, %v3672_v45  ;;  %v3663_v48 = vadd.f32 %v5212_v4, %v4792_v19 }
 0x2fb   : > { %v3709_v29 = vadd.f32 %v3708_v36, %v3702_v11  ;;  %v3673_v34 = vadd.f32 %v3663_v48, %v3309_v1 }
 0x2fd   : > { %3681 = vst [vmem:[%s6715_s26 + $0x38] sm:$0xff] %v3673_v34  ;;  %v3688_v56 = vadd.f32 %v3687_v37, %v3673_v34  ;;  %v3703_v44 = vmul.f32 %v3673_v34, %v3673_v34 }
 0x2fe   : > { %5507 = shalt.err (!%p5504_p2)
}
 0x2ff   : > { %s5508_s8 = scalar_lea.hbm %s6761_s20, 1024  ;;  %s5512_s6 = scalar_lea.hbm %s6992_s12, 16384 }
 0x300   : > { %p5509_p8 = scmp.ne.s32.totalorder %s6761_s20, %s5508_s8  ;;  %p5513_p3 = scmp.lt.s32.totalorder %s6761_s20, %s6992_s12 }
 0x301   : > { %p5514_p0 = scmp.lt.s32.totalorder %s5512_s6, %s5508_s8 }
 0x302   : > { %p5510_p10 = pnand %p5509_p8, %p5945_p12 }
 0x303   : > { %p5515_p5 = por %p5514_p0, %p5513_p3 }
 0x304   : > { %p5511_p9 = pneg %p5510_p10 }
 0x306   : > { %p5516_p13 = pnand %p5515_p5, %p5511_p9 }
 0x308   : > { %5519 = shalt.err (!%p5516_p13)
}
 0x309   : > { %s5715_s21 = smov 128   ;;  %s5716_s24 = smov 8   ;;  %v3689_v33 = vrot.slane %v3688_v56, 4  ;;  %v3710_v55 = vadd.f32 %v3709_v29, %v3703_v44 }
 0x30a   : > { %5231 = dma.vmem_to_hbm [thread:$0]  (%p5945_p12), %s6755_s1, 1024, %s6761_s20, %s3719_s2, %s5715_s21, %s5715_s21, %s5716_s24  }
 0x30b   : > { %s4091_s11 = sshll.u32 %s6985_s16, 3  ;;  %v3690_v47 = vadd.f32 %v3689_v33, %v3688_v56  ;;  %v3711_v10 = vrot.slane %v3710_v55, 4  ;;  %s407_s17 = scalar_lea.vmem [#allocation11], %s6011_s14 }
 0x30c   : > { %s3756_s9 = sadd.s32 %s6984_s4, %s4091_s11  ;;  %s3760_s8 = sshll.u32 %s407_s17, 4  ;;  %s6798_s8 = int_to_ptr.vmem [resolvable:$true] %s3760_s8 }
 0x30d   : > { %v3691_v40 = vrot.slane %v3690_v47, 2  ;;  %v3712_v13 = vadd.f32 %v3711_v10, %v3710_v55  ;;  %s4092_s5 = sshll.u32 %s3756_s9, 4  ;;  %s413_s1 = scalar_lea.vmem [#allocation13], %s6011_s14 }
 0x30e   : > { %s3775_s20 = sshll.u32 %s413_s1, 4  ;;  %s6993_s26 = sld [smem:[#allocation41_spill]]  ;;  %s6805_s20 = int_to_ptr.vmem [resolvable:$true] %s3775_s20 }
 0x30f   : > { %v3713_v32 = vrot.slane %v3712_v13, 2  ;;  %v3692_v51 = vadd.f32 %v3691_v40, %v3690_v47  ;;  %s6995_s7 = sld [smem:[#allocation42_spill]]  ;;  %s6809_s24 = scalar_lea.sflag [#allocation12], %s350_s18 }
 0x310   : > { %s5520_s9 = scalar_lea.vmem %s6798_s8, 16  ;;  %s5717_s2 = smov [#allocation11]  }
 0x311   : > { %v3693_v26 = vrot.slane %v3692_v51, 1  ;;  %v3714_v25 = vadd.f32 %v3713_v32, %v3712_v13  ;;  %p5521_p11 = scmp.ne.s32.totalorder %s6798_s8, %s5520_s9  ;;  %s5524_s16 = sshll.u32 %s5717_s2, 4  ;;  %s5525_s16 = int_to_ptr.vmem [resolvable:$false] %s5524_s16 }
 0x312   : > { %p5527_p1 = scmp.lt.s32.totalorder %s6798_s8, %s5525_s16 }
 0x313   : > { %v3694_v42 = vadd.f32 %v3693_v26, %v3692_v51  ;;  %v3715_v61 = vrot.slane %v3714_v25, 1  ;;  %p5522_p4 = pnand %p5521_p11, %p5945_p12 }
 0x314   : > { %s6994_s0 = smov %s6993_s26  ;;  %s6796_s6 = scalar_lea.hbm %s6993_s26, %s4092_s5 }
 0x315   : > { %3695 = vst [vmem:[%s407_s17] sm:$0x1] %v3694_v42  ;;  %s6996_s11 = smov %s6995_s7  ;;  %s6803_s21 = scalar_lea.hbm %s6995_s7, %s4092_s5  ;;  %v3716_v15 = vadd.f32 %v3715_v61, %v3714_v25 }
 0x316   : > { %p5523_p7 = pneg %p5522_p4  ;;  %s5526_s17 = scalar_lea.vmem %s5525_s16, 32 }
 0x317   : > { %p5528_p6 = scmp.lt.s32.totalorder %s5526_s17, %s5520_s9 }
 0x319   : > { %p5529_p2 = por %p5528_p6, %p5527_p1 }
 0x31b   : > { %p5530_p8 = pnand %p5529_p2, %p5523_p7 }
 0x31d   : > { %5533 = shalt.err (!%p5530_p8)
}
 0x31e   : > { %s5534_s30 = scalar_lea.hbm %s6796_s6, 16  ;;  %s5538_s26 = scalar_lea.hbm %s6994_s0, 256 }
 0x31f   : > { %p5535_p10 = scmp.ne.s32.totalorder %s6796_s6, %s5534_s30  ;;  %p5539_p0 = scmp.lt.s32.totalorder %s6796_s6, %s6994_s0 }
 0x320   : > { %p5540_p5 = scmp.lt.s32.totalorder %s5538_s26, %s5534_s30 }
 0x321   : > { %p5536_p9 = pnand %p5535_p10, %p5945_p12 }
 0x322   : > { %p5541_p13 = por %p5540_p5, %p5539_p0 }
 0x323   : > { %p5537_p3 = pneg %p5536_p9 }
 0x325   : > { %p5542_p11 = pnand %p5541_p13, %p5537_p3 }
 0x327   : > { %5545 = shalt.err (!%p5542_p11)
}
 0x328   : > { %5232 = dma.vmem_to_hbm [thread:$0]  (%p5945_p12), %s6798_s8, 16, %s6796_s6, %s6809_s24   ;;  %3717 = vst [vmem:[%s413_s1] sm:$0x1] %v3716_v15 }
 0x329   : > { %s5546_s7 = scalar_lea.vmem %s6805_s20, 16  ;;  %s5718_s9 = smov [#allocation13]  }
 0x32a   : > { %p5547_p4 = scmp.ne.s32.totalorder %s6805_s20, %s5546_s7  ;;  %s5550_s2 = sshll.u32 %s5718_s9, 4  ;;  %s5551_s2 = int_to_ptr.vmem [resolvable:$false] %s5550_s2 }
 0x32b   : > { %s5552_s16 = scalar_lea.vmem %s5551_s2, 32  ;;  %p5553_p6 = scmp.lt.s32.totalorder %s6805_s20, %s5551_s2 }
 0x32c   : > { %p5548_p7 = pnand %p5547_p4, %p5945_p12  ;;  %p5554_p2 = scmp.lt.s32.totalorder %s5552_s16, %s5546_s7 }
 0x32e   : > { %p5549_p1 = pneg %p5548_p7  ;;  %p5555_p8 = por %p5554_p2, %p5553_p6 }
 0x330   : > { %p5556_p10 = pnand %p5555_p8, %p5549_p1 }
 0x332   : > { %5559 = shalt.err (!%p5556_p10)
}
 0x333   : > { %s5560_s14 = scalar_lea.hbm %s6803_s21, 16  ;;  %s5564_s6 = scalar_lea.hbm %s6996_s11, 256 }
 0x334   : > { %p5561_p9 = scmp.ne.s32.totalorder %s6803_s21, %s5560_s14  ;;  %p5565_p5 = scmp.lt.s32.totalorder %s6803_s21, %s6996_s11 }
 0x335   : > { %p5566_p13 = scmp.lt.s32.totalorder %s5564_s6, %s5560_s14 }
 0x336   : > { %p5562_p3 = pnand %p5561_p9, %p5945_p12 }
 0x337   : > { %p5567_p11 = por %p5566_p13, %p5565_p5 }
 0x338   : > { %p5563_p0 = pneg %p5562_p3 }
 0x33a   : > { %p5568_p4 = pnand %p5567_p11, %p5563_p0 }
 0x33c   : > { %5571 = shalt.err (!%p5568_p4)
}
 0x33d   : > { %5233 = dma.vmem_to_hbm [thread:$0]  (%p5945_p12), %s6805_s20, 16, %s6803_s21, %s6809_s24  }
 0x33e PF: > { %p5264_p7 = scmp.ge.s32.totalorder %s5706_s10, 2  ;;  %s3787_s18 = sand.u32 1, %s5678_s27  }
 0x33f   : > { %p6997_p1 = scmp.ne.s32.totalorder %s6963_s15, 0  ;;  %s3788_s5 = scalar_lea.sflag [#allocation4], %s3787_s18 }
 0x341   : > { %p5252_p6 = pnand %p5264_p7, %p6997_p1 }
 0x343   : > { %p5253_p2 = pneg %p5252_p6 }
 0x345   : > { %5645 = dma.done.wait (%p5253_p2), %s3788_s5, 1024  }
 0x346   : > { %5647 = vsyncadd (%p5253_p2), %s3788_s5, 4294966272  ;;  %s6998_s26 = sadd.s32 4294967294, %s5706_s10  }
 0x347   : > { %s3796_s4 = sand.u32 1, %s6998_s26  }
 0x348   : > { %s3797_s19 = scalar_lea.sflag [#allocation12], %s3796_s4 }
 0x349   : > { %5649 = dma.done.wait (%p5253_p2), %s3797_s19, 32  }
 0x34a   : > { %5651 = vsyncadd (%p5253_p2), %s3797_s19, 4294967264  ;;  %s30_s10 = sadd.s32 1, %s5706_s10   ;;  %s7000_s27 = sld [smem:[#allocation21_spill]] }
 0x34b   : > { %p6862_p12 = scmp.ge.s32.totalorder %s30_s10, 18   ;;  %s7001_s26 = sld [smem:[#allocation28_spill]] }
 0x34c   : > { %s7002_s15 = sld [smem:[#allocation29_spill]]  ;;  %s7007_s21 = smov %s5658_s22 }
 0x34d   : > { %s7003_s30 = sld [smem:[#allocation24_spill]]  ;;  %s7008_s22 = smov %s5662_s23 }
 0x34e   : > { %s7004_s7 = sld [smem:[#allocation25_spill]]  ;;  %s7009_s23 = smov %s5975_s3 }
 0x34f   : > { %s7005_s8 = sld [smem:[#allocation26_spill]]  ;;  %s7010_s24 = smov %s5670_s25 }
 0x350   : > { %s7006_s9 = sld [smem:[#allocation27_spill]]  ;;  %s7011_s25 = smov %s7000_s27 }
 0x351   : > { %s7012_s27 = smov %s5682_s28  ;;  %s7013_s28 = smov %s5686_s29 }
 0x352   : > { %s7014_s29 = smov %s7002_s15  ;;  %29 = sbr.rel (!%p6862_p12) target bundleno = 23 (0x17), region = 155 }
 0x357   :  { %3809 = vsyncpa [#allocation3], 1 }
 0x358   :  { %3811 = vsyncpa [#allocation3 + $0x1], 1 }
 0x359   :  { %3812 = vsyncpa [#allocation6], 1 }
 0x35a   :  { %3814 = vsyncpa [#allocation6 + $0x1], 1 }
 0x35b   :  { %3815 = vsyncpa [#allocation9], 1 }
 0x35c   :  { %3816 = vsyncpa [#allocation4], 1 }
 0x35d   :  { %3818 = vsyncpa [#allocation4 + $0x1], 1 }
 0x35e   :  { %3819 = vsyncpa [#allocation12], 1 }
 0x35f   :  { %3821 = vsyncpa [#allocation12 + $0x1], 1 }

</bundles_post_ra>
